<compile_context>
chip_gen: v7x
topology: tpu7x:2x2x1
jax: 0.10.0
libtpu: 0.0.40
codegen_flags: <defaults>
</compile_context>

<pallas_src>
import jax
import jax.numpy as jnp
from jax.experimental import pallas as pl
from jax.experimental.pallas import tpu as pltpu

# ---- small, deterministic hyperparameters (stand-ins for opt.nz / opt.ngf) ----
NZ = 16
NGF = 8
BATCH = 2


# ----------------------------- fused front-end kernel -----------------------------

def _frontend_call(z, gamma, w1e, bn_g, bn_b, wqkv, bqkv):
    """ConvT(nz->C,4,1,0) on 1x1 + BN + ReLU + Dropout(id) + SelfAttention, one kernel.

    z: (B, nz) f32 (SMEM), w1e: (nz, 16, C) f32, output: (B, 16, C) bf16 (rows = oy*4+ox).
    """
    B, nz = z.shape
    _, P, C = w1e.shape
    CQ = wqkv.shape[1]          # 2*C8 + C (fused q/k/v projection)
    C8 = (CQ - C) // 2

    def kernel(z_ref, gam_ref, w1_ref, g_ref, b_ref, wqkv_ref, bqkv_ref, o_ref):
        # --- layer 1: h[b, p, co] = sum_ci z[b, ci] * w1e[ci, p, co]  (tiny -> VPU;
        #     the z scalars come straight off SMEM, no VMEM lane extracts) ---
        hs = []
        for b in range(B):
            acc = None
            for ci in range(nz):
                term = z_ref[b, ci] * w1_ref[ci]                   # scalar * (P, C)
                acc = term if acc is None else acc + term
            hs.append(acc)

        # --- BatchNorm (training-mode batch stats over B*P rows, biased var),
        #     shifted two-pass so there is no E[x^2] - mean^2 cancellation ---
        n = float(B * P)
        ssum = jnp.zeros((1, C), jnp.float32)
        for b in range(B):
            ssum = ssum + jnp.sum(hs[b], axis=0, keepdims=True)
        mean = ssum / n
        ssq = jnp.zeros((1, C), jnp.float32)
        for b in range(B):
            d = hs[b] - mean
            ssq = ssq + jnp.sum(d * d, axis=0, keepdims=True)
        scale = g_ref[...] * jax.lax.rsqrt(ssq / n + 1e-5)
        shift = b_ref[...] - mean * scale
        gam = gam_ref[0]

        # TODO(synk): nn.Dropout(0.3) is implemented as identity (eval semantics) while
        # BatchNorm uses training-mode batch statistics (no running-stat update); a
        # training-mode mask would use pltpu.prng_seed / pltpu.prng_random_bits.
        for b in range(B):
            x = jnp.maximum(hs[b] * scale + shift, 0.0)            # (P, C) f32, BN+ReLU
            xb = x.astype(jnp.bfloat16)
            # fused q/k/v projection: one (P, C) x (C, 2*C8 + C) MXU matmul
            qkv = jnp.dot(xb, wqkv_ref[...],
                          preferred_element_type=jnp.float32) + bqkv_ref[...]
            q, k, v = qkv[:, :C8], qkv[:, C8:2 * C8], qkv[:, 2 * C8:]
            # attention[i, j] = sum_m q[i, m] * k[j, m]   (== torch bmm(Q, K^T))
            attn = jax.lax.dot_general(q, k, (((1,), (1,)), ((), ())),
                                       preferred_element_type=jnp.float32)      # (P, P)
            attn = attn - jnp.max(attn, axis=-1, keepdims=True)
            e = jnp.exp(attn)
            pm = e / jnp.sum(e, axis=-1, keepdims=True)
            sav = jnp.dot(pm.astype(jnp.bfloat16), v.astype(jnp.bfloat16),
                          preferred_element_type=jnp.float32)                   # (P, C)
            o_ref[b] = (gam * sav + x).astype(jnp.bfloat16)

    return pl.pallas_call(
        kernel,
        out_shape=jax.ShapeDtypeStruct((B, P, C), jnp.bfloat16),
        grid=(1,),
        in_specs=[pl.BlockSpec(memory_space=pltpu.MemorySpace.SMEM),   # z scalars
                  pl.BlockSpec(memory_space=pltpu.MemorySpace.SMEM),   # gamma scalar
                  pl.BlockSpec((nz, P, C), lambda i: (0, 0, 0)),
                  pl.BlockSpec((1, C), lambda i: (0, 0)),
                  pl.BlockSpec((1, C), lambda i: (0, 0)),
                  pl.BlockSpec((C, CQ), lambda i: (0, 0)),
                  pl.BlockSpec((1, CQ), lambda i: (0, 0))],
        out_specs=pl.BlockSpec((B, P, C), lambda i: (0, 0, 0)),
        compiler_params=pltpu.CompilerParams(dimension_semantics=("arbitrary",)),
    )(z, gamma, w1e, bn_g, bn_b, wqkv, bqkv)


# ----------------------------- fused deconv layer kernel -----------------------------

def _phase_weights(w_t):
    """PyTorch ConvTranspose2d weight (Cin, Cout, 4, 4) -> (4, Cout, 4*Cin) bf16.

    Output phase ph = ey*2+ex (ey = oy%2, ex = ox%2) only uses the 2x2 sub-kernel
    w_t[:, :, 3-2a-ey, 3-2b-ex]; the 4 taps are concatenated along K with b (column
    tap) major and a (row tap) minor, matching the slab block layout of _build_slab.
    """
    phases = []
    for ey in range(2):
        for ex in range(2):
            taps = []
            for b in range(2):              # column tap: dx = ex + b
                for a in range(2):          # row tap:    dy = ey + a
                    taps.append(jnp.transpose(w_t[:, :, 3 - 2 * a - ey, 3 - 2 * b - ex]))
            phases.append(jnp.concatenate(taps, axis=1))           # (Cout, 4*Cin)
    return jnp.stack(phases, axis=0).astype(jnp.bfloat16)          # (4, Cout, 4*Cin)


def _build_slab(x_nhwc):
    """(B, H, W, Cin) bf16 -> (12*Cin, H*W*B) channel-major, pre-shifted tap slab.

    Block (ey, dx, a), ordered ey major / dx middle / a minor, holds
        slab[(ey*6 + dx*2 + a)*Cin + ci, (r*W + c)*B + b] = x_pad[b, r+ey+a, c+dx, ci]
    so each output phase (ey, ex) needs exactly the 4 consecutive blocks starting at
    (ey*6 + 2*ex), i.e. ONE contiguous, tile-aligned (4*Cin, H*W*B) ref slice inside
    the kernel (no in-kernel gather / concat / lane shift), with batch folded into N.
    """
    B, H, W, Cin = x_nhwc.shape
    xp = jnp.pad(x_nhwc, ((0, 0), (1, 1), (1, 1), (0, 0)))
    blocks = []
    for ey in range(2):
        for dx in range(3):
            for a in range(2):
                blk = xp[:, ey + a:ey + a + H, dx:dx + W, :]        # (B, H, W, Cin)
                blocks.append(jnp.transpose(blk, (3, 1, 2, 0)))     # (Cin, H, W, B)
    return jnp.stack(blocks, axis=0).reshape(12 * Cin, H * W * B)


def _phase_to_nhwc(o, H, W, B):
    """(4, Cout, H*W*B) phase-major -> NHWC (B, 2H, 2W, Cout): pixel (2r+ey, 2c+ex)."""
    Cout = o.shape[1]
    o6 = o.reshape(2, 2, Cout, H, W, B)
    return o6.transpose(5, 3, 0, 4, 1, 2).reshape(B, 2 * H, 2 * W, Cout)


def _phase_to_nchw(o, H, W, B):
    Cout = o.shape[1]
    o6 = o.reshape(2, 2, Cout, H, W, B)
    return o6.transpose(5, 2, 3, 0, 4, 1).reshape(B, Cout, 2 * H, 2 * W)


def _deconv_layer(x_nhwc, w_ph, bn_g=None, bn_b=None, *, final_tanh=False):
    """ConvTranspose2d(Cin->Cout, 4, 2, 1) (+BN+ReLU, or +Tanh) as one pallas_call."""
    B, H, W, Cin = x_nhwc.shape
    Cout = w_ph.shape[1]
    HWB = H * W * B
    slab = _build_slab(x_nhwc)                                      # (12*Cin, HWB) bf16

    def _acc(slab_ref, w_ref, ph):
        ey, ex = ph // 2, ph % 2
        r0 = (ey * 6 + 2 * ex) * Cin
        patch = slab_ref[r0:r0 + 4 * Cin, :]                        # (4*Cin, HWB) bf16
        # (Cout, 4*Cin) x (4*Cin, HWB) -> (Cout, HWB): one matmul per phase,
        # taps folded into K, batch folded into the (lane-dense) N dimension.
        return jax.lax.dot_general(w_ref[ph], patch, (((1,), (0,)), ((), ())),
                                   preferred_element_type=jnp.float32)

    if final_tanh:
        def kernel(slab_ref, w_ref, o_ref):
            for ph in range(4):
                o_ref[ph] = jnp.tanh(_acc(slab_ref, w_ref, ph))
    else:
        def kernel(slab_ref, w_ref, g_ref, b_ref, o_ref):
            # single-pass stores: phase accumulators stay in registers, BN stats via a
            # shifted two-pass, then each (Cout, HWB) tile is written exactly once.
            accs = []
            ssum = jnp.zeros((Cout, 1), jnp.float32)
            for ph in range(4):
                acc = _acc(slab_ref, w_ref, ph)
                accs.append(acc)
                ssum = ssum + jnp.sum(acc, axis=1, keepdims=True)
            n = float(4 * HWB)
            mean = ssum / n
            ssq = jnp.zeros((Cout, 1), jnp.float32)
            for ph in range(4):
                d = accs[ph] - mean
                ssq = ssq + jnp.sum(d * d, axis=1, keepdims=True)
            scale = g_ref[...] * jax.lax.rsqrt(ssq / n + 1e-5)
            shift = b_ref[...] - mean * scale
            for ph in range(4):
                o_ref[ph] = jnp.maximum(accs[ph] * scale + shift,
                                        0.0).astype(jnp.bfloat16)

    in_specs = [pl.BlockSpec((12 * Cin, HWB), lambda i: (0, 0)),
                pl.BlockSpec((4, Cout, 4 * Cin), lambda i: (0, 0, 0))]
    args = [slab, w_ph]
    if not final_tanh:
        in_specs += [pl.BlockSpec((Cout, 1), lambda i: (0, 0)),
                     pl.BlockSpec((Cout, 1), lambda i: (0, 0))]
        args += [bn_g, bn_b]

    o = pl.pallas_call(
        kernel,
        out_shape=jax.ShapeDtypeStruct((4, Cout, HWB),
                                       jnp.float32 if final_tanh else jnp.bfloat16),
        grid=(1,),
        in_specs=in_specs,
        out_specs=pl.BlockSpec((4, Cout, HWB), lambda i: (0, 0, 0)),
        compiler_params=pltpu.CompilerParams(dimension_semantics=("arbitrary",)),
    )(*args)

    if final_tanh:
        return _phase_to_nchw(o, H, W, B)
    return _phase_to_nhwc(o, H, W, B)


# ----------------------------- Generator forward -----------------------------

def generator_forward(z_nchw, kp):
    B = z_nchw.shape[0]
    ngf8 = NGF * 8
    z = z_nchw.reshape(B, NZ)

    # front end: ConvT(nz->ngf8,4,1,0) + BN + ReLU + Dropout(id) + SelfAttention
    h = _frontend_call(z, kp["sa_gamma"], kp["w1e"], kp["bn1_g"], kp["bn1_b"],
                       kp["sa_wqkv"], kp["sa_bqkv"])                # (B, 16, ngf8) bf16
    x = h.reshape(B, 4, 4, ngf8)                                    # NHWC (B,4,4,ngf8)

    # TODO(synk): the inter-layer phase interleave + pad + slab build stays as (fused)
    # XLA glue; collapsing all 5 stages into one pallas_call would need an in-kernel
    # lane interleave of the phase outputs.
    x = _deconv_layer(x, kp["w2_ph"], kp["bn2_g"], kp["bn2_b"])     # (B, 8, 8, 4ngf)
    x = _deconv_layer(x, kp["w3_ph"], kp["bn3_g"], kp["bn3_b"])     # (B,16,16, 2ngf)
    x = _deconv_layer(x, kp["w4_ph"], kp["bn4_g"], kp["bn4_b"])     # (B,32,32,  ngf)
    x = _deconv_layer(x, kp["w5_ph"], final_tanh=True)              # (B, 3,64,64) NCHW
    return x


# ----------------------------- parameters -----------------------------

def init_params(key):
    """Parameters in PyTorch layouts (ConvTranspose2d weight = (Cin, Cout, 4, 4))."""
    ngf8, ngf4, ngf2 = NGF * 8, NGF * 4, NGF * 2
    ks = jax.random.split(key, 8)

    def w(k, shape, fan_in):
        return jax.random.normal(k, shape, jnp.float32) * (1.0 / jnp.sqrt(fan_in))

    p = {}
    p["w1"] = w(ks[0], (NZ, ngf8, 4, 4), NZ)
    p["w2"] = w(ks[1], (ngf8, ngf4, 4, 4), ngf8 * 16)
    p["w3"] = w(ks[2], (ngf4, ngf2, 4, 4), ngf4 * 16)
    p["w4"] = w(ks[3], (ngf2, NGF, 4, 4), ngf2 * 16)
    p["w5"] = w(ks[4], (NGF, 3, 4, 4), NGF * 16)
    # SelfAttention 1x1 convs, stored as (Cin, Cout) matrices + biases
    p["sa_wq"] = w(ks[5], (ngf8, ngf8 // 8), ngf8)
    p["sa_wk"] = w(ks[6], (ngf8, ngf8 // 8), ngf8)
    p["sa_wv"] = w(ks[7], (ngf8, ngf8), ngf8)
    p["sa_bq"] = jnp.zeros((ngf8 // 8,), jnp.float32)
    p["sa_bk"] = jnp.zeros((ngf8 // 8,), jnp.float32)
    p["sa_bv"] = jnp.zeros((ngf8,), jnp.float32)
    p["sa_gamma"] = jnp.zeros((1,), jnp.float32)        # matches torch.zeros(1)
    for i, c in zip(range(1, 5), (ngf8, ngf4, ngf2, NGF)):
        p[f"bn{i}_g"] = jnp.ones((c,), jnp.float32)     # PyTorch BN default init
        p[f"bn{i}_b"] = jnp.zeros((c,), jnp.float32)
    return p


def prepare_params(p):
    """One-time conversion PyTorch layouts -> kernel-ready layouts (outside jit)."""
    ngf8 = NGF * 8
    c8 = ngf8 // 8
    q = {}
    # layer 1 (1x1 input): out[b, p, co] = sum_ci z[b,ci]*w1[ci, co, oy, ox], p = oy*4+ox
    q["w1e"] = jnp.transpose(p["w1"], (0, 2, 3, 1)).reshape(NZ, 16, ngf8)
    for i, name in zip(range(2, 6), ("w2", "w3", "w4", "w5")):
        q[f"w{i}_ph"] = _phase_weights(p[name])                     # (4, Cout, 4Cin) bf16
    q["bn1_g"] = p["bn1_g"].reshape(1, ngf8)
    q["bn1_b"] = p["bn1_b"].reshape(1, ngf8)
    for i, name in zip(range(2, 5), ("w2", "w3", "w4")):
        c = p[name].shape[1]
        q[f"bn{i}_g"] = p[f"bn{i}_g"].reshape(c, 1)
        q[f"bn{i}_b"] = p[f"bn{i}_b"].reshape(c, 1)
    # fused q/k/v projection (single matmul in-kernel) + fused bias row
    q["sa_wqkv"] = jnp.concatenate([p["sa_wq"], p["sa_wk"], p["sa_wv"]],
                                   axis=1).astype(jnp.bfloat16)     # (C, 2*C8 + C)
    q["sa_bqkv"] = jnp.concatenate([p["sa_bq"], p["sa_bk"],
                                    p["sa_bv"]]).reshape(1, 2 * c8 + ngf8)
    q["sa_gamma"] = p["sa_gamma"].reshape(1)
    return q


if __name__ == "__main__":
    key = jax.random.PRNGKey(0)
    pkey, zkey = jax.random.split(key)
    params = prepare_params(init_params(pkey))
    z = jax.random.normal(zkey, (BATCH, NZ, 1, 1), jnp.float32)     # NCHW, like PyTorch
    out = jax.jit(generator_forward)(z, params)
    out = jax.block_until_ready(out)
    assert out.shape == (BATCH, 3, 64, 64), out.shape
    assert bool(jnp.all(jnp.isfinite(out)))
    assert bool(jnp.all(jnp.abs(out) <= 1.0))     # tanh range
    print("KERNEL_OK")
</pallas_src>

<mosaic_0001>
module attributes {stable_mosaic.version = 11 : i64} {
  func.func @kernel(%arg0: i32, %arg1: memref<2x16xf32, #tpu.memory_space<smem>>, %arg2: memref<1xf32, #tpu.memory_space<smem>>, %arg3: memref<16x16x64xf32, #tpu.memory_space<vmem>>, %arg4: memref<1x64xf32, #tpu.memory_space<vmem>>, %arg5: memref<1x64xf32, #tpu.memory_space<vmem>>, %arg6: memref<64x80xbf16, #tpu.memory_space<vmem>>, %arg7: memref<1x80xf32, #tpu.memory_space<vmem>>, %arg8: memref<2x16x64xbf16, #tpu.memory_space<vmem>>) attributes {dimension_semantics = [#tpu.dimension_semantics<arbitrary>], iteration_bounds = array<i64: 1>, scalar_prefetch = 0 : i64, scratch_operands = 0 : i64, tpu.core_type = #tpu.core_type<tc>, window_params = [{transform_indices = @transform_0, window_bounds = array<i64: 2, 16>}, {transform_indices = @transform_1, window_bounds = array<i64: 1>}, {pipeline_mode = #tpu.pipeline_mode<synchronous>, transform_indices = @transform_2, window_bounds = array<i64: 16, 16, 64>}, {pipeline_mode = #tpu.pipeline_mode<synchronous>, transform_indices = @transform_3, window_bounds = array<i64: 1, 64>}, {pipeline_mode = #tpu.pipeline_mode<synchronous>, transform_indices = @transform_4, window_bounds = array<i64: 1, 64>}, {pipeline_mode = #tpu.pipeline_mode<synchronous>, transform_indices = @transform_5, window_bounds = array<i64: 64, 80>}, {pipeline_mode = #tpu.pipeline_mode<synchronous>, transform_indices = @transform_6, window_bounds = array<i64: 1, 80>}, {pipeline_mode = #tpu.pipeline_mode<synchronous>, transform_indices = @transform_7, window_bounds = array<i64: 2, 16, 64>}]} {
    %c0 = arith.constant 0 : index
    %c0_0 = arith.constant 0 : index
    %0 = memref.load %arg1[%c0, %c0_0] : memref<2x16xf32, #tpu.memory_space<smem>>
    %c0_1 = arith.constant 0 : index
    %c0_2 = arith.constant 0 : index
    %c0_3 = arith.constant 0 : index
    %1 = vector.load %arg3[%c0_1, %c0_2, %c0_3] : memref<16x16x64xf32, #tpu.memory_space<vmem>>, vector<1x16x64xf32>
    %2 = vector.shape_cast %1 : vector<1x16x64xf32> to vector<16x64xf32>
    %3 = vector.broadcast %0 : f32 to vector<16x64xf32>
    %4 = arith.mulf %3, %2 : vector<16x64xf32>
    %c0_4 = arith.constant 0 : index
    %c1 = arith.constant 1 : index
    %5 = memref.load %arg1[%c0_4, %c1] : memref<2x16xf32, #tpu.memory_space<smem>>
    %c1_5 = arith.constant 1 : index
    %c0_6 = arith.constant 0 : index
    %c0_7 = arith.constant 0 : index
    %6 = vector.load %arg3[%c1_5, %c0_6, %c0_7] : memref<16x16x64xf32, #tpu.memory_space<vmem>>, vector<1x16x64xf32>
    %7 = vector.shape_cast %6 : vector<1x16x64xf32> to vector<16x64xf32>
    %8 = vector.broadcast %5 : f32 to vector<16x64xf32>
    %9 = arith.mulf %8, %7 : vector<16x64xf32>
    %10 = arith.addf %4, %9 : vector<16x64xf32>
    %c0_8 = arith.constant 0 : index
    %c2 = arith.constant 2 : index
    %11 = memref.load %arg1[%c0_8, %c2] : memref<2x16xf32, #tpu.memory_space<smem>>
    %c2_9 = arith.constant 2 : index
    %c0_10 = arith.constant 0 : index
    %c0_11 = arith.constant 0 : index
    %12 = vector.load %arg3[%c2_9, %c0_10, %c0_11] : memref<16x16x64xf32, #tpu.memory_space<vmem>>, vector<1x16x64xf32>
    %13 = vector.shape_cast %12 : vector<1x16x64xf32> to vector<16x64xf32>
    %14 = vector.broadcast %11 : f32 to vector<16x64xf32>
    %15 = arith.mulf %14, %13 : vector<16x64xf32>
    %16 = arith.addf %10, %15 : vector<16x64xf32>
    %c0_12 = arith.constant 0 : index
    %c3 = arith.constant 3 : index
    %17 = memref.load %arg1[%c0_12, %c3] : memref<2x16xf32, #tpu.memory_space<smem>>
    %c3_13 = arith.constant 3 : index
    %c0_14 = arith.constant 0 : index
    %c0_15 = arith.constant 0 : index
    %18 = vector.load %arg3[%c3_13, %c0_14, %c0_15] : memref<16x16x64xf32, #tpu.memory_space<vmem>>, vector<1x16x64xf32>
    %19 = vector.shape_cast %18 : vector<1x16x64xf32> to vector<16x64xf32>
    %20 = vector.broadcast %17 : f32 to vector<16x64xf32>
    %21 = arith.mulf %20, %19 : vector<16x64xf32>
    %22 = arith.addf %16, %21 : vector<16x64xf32>
    %c0_16 = arith.constant 0 : index
    %c4 = arith.constant 4 : index
    %23 = memref.load %arg1[%c0_16, %c4] : memref<2x16xf32, #tpu.memory_space<smem>>
    %c4_17 = arith.constant 4 : index
    %c0_18 = arith.constant 0 : index
    %c0_19 = arith.constant 0 : index
    %24 = vector.load %arg3[%c4_17, %c0_18, %c0_19] : memref<16x16x64xf32, #tpu.memory_space<vmem>>, vector<1x16x64xf32>
    %25 = vector.shape_cast %24 : vector<1x16x64xf32> to vector<16x64xf32>
    %26 = vector.broadcast %23 : f32 to vector<16x64xf32>
    %27 = arith.mulf %26, %25 : vector<16x64xf32>
    %28 = arith.addf %22, %27 : vector<16x64xf32>
    %c0_20 = arith.constant 0 : index
    %c5 = arith.constant 5 : index
    %29 = memref.load %arg1[%c0_20, %c5] : memref<2x16xf32, #tpu.memory_space<smem>>
    %c5_21 = arith.constant 5 : index
    %c0_22 = arith.constant 0 : index
    %c0_23 = arith.constant 0 : index
    %30 = vector.load %arg3[%c5_21, %c0_22, %c0_23] : memref<16x16x64xf32, #tpu.memory_space<vmem>>, vector<1x16x64xf32>
    %31 = vector.shape_cast %30 : vector<1x16x64xf32> to vector<16x64xf32>
    %32 = vector.broadcast %29 : f32 to vector<16x64xf32>
    %33 = arith.mulf %32, %31 : vector<16x64xf32>
    %34 = arith.addf %28, %33 : vector<16x64xf32>
    %c0_24 = arith.constant 0 : index
    %c6 = arith.constant 6 : index
    %35 = memref.load %arg1[%c0_24, %c6] : memref<2x16xf32, #tpu.memory_space<smem>>
    %c6_25 = arith.constant 6 : index
    %c0_26 = arith.constant 0 : index
    %c0_27 = arith.constant 0 : index
    %36 = vector.load %arg3[%c6_25, %c0_26, %c0_27] : memref<16x16x64xf32, #tpu.memory_space<vmem>>, vector<1x16x64xf32>
    %37 = vector.shape_cast %36 : vector<1x16x64xf32> to vector<16x64xf32>
    %38 = vector.broadcast %35 : f32 to vector<16x64xf32>
    %39 = arith.mulf %38, %37 : vector<16x64xf32>
    %40 = arith.addf %34, %39 : vector<16x64xf32>
    %c0_28 = arith.constant 0 : index
    %c7 = arith.constant 7 : index
    %41 = memref.load %arg1[%c0_28, %c7] : memref<2x16xf32, #tpu.memory_space<smem>>
    %c7_29 = arith.constant 7 : index
    %c0_30 = arith.constant 0 : index
    %c0_31 = arith.constant 0 : index
    %42 = vector.load %arg3[%c7_29, %c0_30, %c0_31] : memref<16x16x64xf32, #tpu.memory_space<vmem>>, vector<1x16x64xf32>
    %43 = vector.shape_cast %42 : vector<1x16x64xf32> to vector<16x64xf32>
    %44 = vector.broadcast %41 : f32 to vector<16x64xf32>
    %45 = arith.mulf %44, %43 : vector<16x64xf32>
    %46 = arith.addf %40, %45 : vector<16x64xf32>
    %c0_32 = arith.constant 0 : index
    %c8 = arith.constant 8 : index
    %47 = memref.load %arg1[%c0_32, %c8] : memref<2x16xf32, #tpu.memory_space<smem>>
    %c8_33 = arith.constant 8 : index
    %c0_34 = arith.constant 0 : index
    %c0_35 = arith.constant 0 : index
    %48 = vector.load %arg3[%c8_33, %c0_34, %c0_35] : memref<16x16x64xf32, #tpu.memory_space<vmem>>, vector<1x16x64xf32>
    %49 = vector.shape_cast %48 : vector<1x16x64xf32> to vector<16x64xf32>
    %50 = vector.broadcast %47 : f32 to vector<16x64xf32>
    %51 = arith.mulf %50, %49 : vector<16x64xf32>
    %52 = arith.addf %46, %51 : vector<16x64xf32>
    %c0_36 = arith.constant 0 : index
    %c9 = arith.constant 9 : index
    %53 = memref.load %arg1[%c0_36, %c9] : memref<2x16xf32, #tpu.memory_space<smem>>
    %c9_37 = arith.constant 9 : index
    %c0_38 = arith.constant 0 : index
    %c0_39 = arith.constant 0 : index
    %54 = vector.load %arg3[%c9_37, %c0_38, %c0_39] : memref<16x16x64xf32, #tpu.memory_space<vmem>>, vector<1x16x64xf32>
    %55 = vector.shape_cast %54 : vector<1x16x64xf32> to vector<16x64xf32>
    %56 = vector.broadcast %53 : f32 to vector<16x64xf32>
    %57 = arith.mulf %56, %55 : vector<16x64xf32>
    %58 = arith.addf %52, %57 : vector<16x64xf32>
    %c0_40 = arith.constant 0 : index
    %c10 = arith.constant 10 : index
    %59 = memref.load %arg1[%c0_40, %c10] : memref<2x16xf32, #tpu.memory_space<smem>>
    %c10_41 = arith.constant 10 : index
    %c0_42 = arith.constant 0 : index
    %c0_43 = arith.constant 0 : index
    %60 = vector.load %arg3[%c10_41, %c0_42, %c0_43] : memref<16x16x64xf32, #tpu.memory_space<vmem>>, vector<1x16x64xf32>
    %61 = vector.shape_cast %60 : vector<1x16x64xf32> to vector<16x64xf32>
    %62 = vector.broadcast %59 : f32 to vector<16x64xf32>
    %63 = arith.mulf %62, %61 : vector<16x64xf32>
    %64 = arith.addf %58, %63 : vector<16x64xf32>
    %c0_44 = arith.constant 0 : index
    %c11 = arith.constant 11 : index
    %65 = memref.load %arg1[%c0_44, %c11] : memref<2x16xf32, #tpu.memory_space<smem>>
    %c11_45 = arith.constant 11 : index
    %c0_46 = arith.constant 0 : index
    %c0_47 = arith.constant 0 : index
    %66 = vector.load %arg3[%c11_45, %c0_46, %c0_47] : memref<16x16x64xf32, #tpu.memory_space<vmem>>, vector<1x16x64xf32>
    %67 = vector.shape_cast %66 : vector<1x16x64xf32> to vector<16x64xf32>
    %68 = vector.broadcast %65 : f32 to vector<16x64xf32>
    %69 = arith.mulf %68, %67 : vector<16x64xf32>
    %70 = arith.addf %64, %69 : vector<16x64xf32>
    %c0_48 = arith.constant 0 : index
    %c12 = arith.constant 12 : index
    %71 = memref.load %arg1[%c0_48, %c12] : memref<2x16xf32, #tpu.memory_space<smem>>
    %c12_49 = arith.constant 12 : index
    %c0_50 = arith.constant 0 : index
    %c0_51 = arith.constant 0 : index
    %72 = vector.load %arg3[%c12_49, %c0_50, %c0_51] : memref<16x16x64xf32, #tpu.memory_space<vmem>>, vector<1x16x64xf32>
    %73 = vector.shape_cast %72 : vector<1x16x64xf32> to vector<16x64xf32>
    %74 = vector.broadcast %71 : f32 to vector<16x64xf32>
    %75 = arith.mulf %74, %73 : vector<16x64xf32>
    %76 = arith.addf %70, %75 : vector<16x64xf32>
    %c0_52 = arith.constant 0 : index
    %c13 = arith.constant 13 : index
    %77 = memref.load %arg1[%c0_52, %c13] : memref<2x16xf32, #tpu.memory_space<smem>>
    %c13_53 = arith.constant 13 : index
    %c0_54 = arith.constant 0 : index
    %c0_55 = arith.constant 0 : index
    %78 = vector.load %arg3[%c13_53, %c0_54, %c0_55] : memref<16x16x64xf32, #tpu.memory_space<vmem>>, vector<1x16x64xf32>
    %79 = vector.shape_cast %78 : vector<1x16x64xf32> to vector<16x64xf32>
    %80 = vector.broadcast %77 : f32 to vector<16x64xf32>
    %81 = arith.mulf %80, %79 : vector<16x64xf32>
    %82 = arith.addf %76, %81 : vector<16x64xf32>
    %c0_56 = arith.constant 0 : index
    %c14 = arith.constant 14 : index
    %83 = memref.load %arg1[%c0_56, %c14] : memref<2x16xf32, #tpu.memory_space<smem>>
    %c14_57 = arith.constant 14 : index
    %c0_58 = arith.constant 0 : index
    %c0_59 = arith.constant 0 : index
    %84 = vector.load %arg3[%c14_57, %c0_58, %c0_59] : memref<16x16x64xf32, #tpu.memory_space<vmem>>, vector<1x16x64xf32>
    %85 = vector.shape_cast %84 : vector<1x16x64xf32> to vector<16x64xf32>
    %86 = vector.broadcast %83 : f32 to vector<16x64xf32>
    %87 = arith.mulf %86, %85 : vector<16x64xf32>
    %88 = arith.addf %82, %87 : vector<16x64xf32>
    %c0_60 = arith.constant 0 : index
    %c15 = arith.constant 15 : index
    %89 = memref.load %arg1[%c0_60, %c15] : memref<2x16xf32, #tpu.memory_space<smem>>
    %c15_61 = arith.constant 15 : index
    %c0_62 = arith.constant 0 : index
    %c0_63 = arith.constant 0 : index
    %90 = vector.load %arg3[%c15_61, %c0_62, %c0_63] : memref<16x16x64xf32, #tpu.memory_space<vmem>>, vector<1x16x64xf32>
    %91 = vector.shape_cast %90 : vector<1x16x64xf32> to vector<16x64xf32>
    %92 = vector.broadcast %89 : f32 to vector<16x64xf32>
    %93 = arith.mulf %92, %91 : vector<16x64xf32>
    %94 = arith.addf %88, %93 : vector<16x64xf32>
    %c1_64 = arith.constant 1 : index
    %c0_65 = arith.constant 0 : index
    %95 = memref.load %arg1[%c1_64, %c0_65] : memref<2x16xf32, #tpu.memory_space<smem>>
    %c0_66 = arith.constant 0 : index
    %c0_67 = arith.constant 0 : index
    %c0_68 = arith.constant 0 : index
    %96 = vector.load %arg3[%c0_66, %c0_67, %c0_68] : memref<16x16x64xf32, #tpu.memory_space<vmem>>, vector<1x16x64xf32>
    %97 = vector.shape_cast %96 : vector<1x16x64xf32> to vector<16x64xf32>
    %98 = vector.broadcast %95 : f32 to vector<16x64xf32>
    %99 = arith.mulf %98, %97 : vector<16x64xf32>
    %c1_69 = arith.constant 1 : index
    %c1_70 = arith.constant 1 : index
    %100 = memref.load %arg1[%c1_69, %c1_70] : memref<2x16xf32, #tpu.memory_space<smem>>
    %c1_71 = arith.constant 1 : index
    %c0_72 = arith.constant 0 : index
    %c0_73 = arith.constant 0 : index
    %101 = vector.load %arg3[%c1_71, %c0_72, %c0_73] : memref<16x16x64xf32, #tpu.memory_space<vmem>>, vector<1x16x64xf32>
    %102 = vector.shape_cast %101 : vector<1x16x64xf32> to vector<16x64xf32>
    %103 = vector.broadcast %100 : f32 to vector<16x64xf32>
    %104 = arith.mulf %103, %102 : vector<16x64xf32>
    %105 = arith.addf %99, %104 : vector<16x64xf32>
    %c1_74 = arith.constant 1 : index
    %c2_75 = arith.constant 2 : index
    %106 = memref.load %arg1[%c1_74, %c2_75] : memref<2x16xf32, #tpu.memory_space<smem>>
    %c2_76 = arith.constant 2 : index
    %c0_77 = arith.constant 0 : index
    %c0_78 = arith.constant 0 : index
    %107 = vector.load %arg3[%c2_76, %c0_77, %c0_78] : memref<16x16x64xf32, #tpu.memory_space<vmem>>, vector<1x16x64xf32>
    %108 = vector.shape_cast %107 : vector<1x16x64xf32> to vector<16x64xf32>
    %109 = vector.broadcast %106 : f32 to vector<16x64xf32>
    %110 = arith.mulf %109, %108 : vector<16x64xf32>
    %111 = arith.addf %105, %110 : vector<16x64xf32>
    %c1_79 = arith.constant 1 : index
    %c3_80 = arith.constant 3 : index
    %112 = memref.load %arg1[%c1_79, %c3_80] : memref<2x16xf32, #tpu.memory_space<smem>>
    %c3_81 = arith.constant 3 : index
    %c0_82 = arith.constant 0 : index
    %c0_83 = arith.constant 0 : index
    %113 = vector.load %arg3[%c3_81, %c0_82, %c0_83] : memref<16x16x64xf32, #tpu.memory_space<vmem>>, vector<1x16x64xf32>
    %114 = vector.shape_cast %113 : vector<1x16x64xf32> to vector<16x64xf32>
    %115 = vector.broadcast %112 : f32 to vector<16x64xf32>
    %116 = arith.mulf %115, %114 : vector<16x64xf32>
    %117 = arith.addf %111, %116 : vector<16x64xf32>
    %c1_84 = arith.constant 1 : index
    %c4_85 = arith.constant 4 : index
    %118 = memref.load %arg1[%c1_84, %c4_85] : memref<2x16xf32, #tpu.memory_space<smem>>
    %c4_86 = arith.constant 4 : index
    %c0_87 = arith.constant 0 : index
    %c0_88 = arith.constant 0 : index
    %119 = vector.load %arg3[%c4_86, %c0_87, %c0_88] : memref<16x16x64xf32, #tpu.memory_space<vmem>>, vector<1x16x64xf32>
    %120 = vector.shape_cast %119 : vector<1x16x64xf32> to vector<16x64xf32>
    %121 = vector.broadcast %118 : f32 to vector<16x64xf32>
    %122 = arith.mulf %121, %120 : vector<16x64xf32>
    %123 = arith.addf %117, %122 : vector<16x64xf32>
    %c1_89 = arith.constant 1 : index
    %c5_90 = arith.constant 5 : index
    %124 = memref.load %arg1[%c1_89, %c5_90] : memref<2x16xf32, #tpu.memory_space<smem>>
    %c5_91 = arith.constant 5 : index
    %c0_92 = arith.constant 0 : index
    %c0_93 = arith.constant 0 : index
    %125 = vector.load %arg3[%c5_91, %c0_92, %c0_93] : memref<16x16x64xf32, #tpu.memory_space<vmem>>, vector<1x16x64xf32>
    %126 = vector.shape_cast %125 : vector<1x16x64xf32> to vector<16x64xf32>
    %127 = vector.broadcast %124 : f32 to vector<16x64xf32>
    %128 = arith.mulf %127, %126 : vector<16x64xf32>
    %129 = arith.addf %123, %128 : vector<16x64xf32>
    %c1_94 = arith.constant 1 : index
    %c6_95 = arith.constant 6 : index
    %130 = memref.load %arg1[%c1_94, %c6_95] : memref<2x16xf32, #tpu.memory_space<smem>>
    %c6_96 = arith.constant 6 : index
    %c0_97 = arith.constant 0 : index
    %c0_98 = arith.constant 0 : index
    %131 = vector.load %arg3[%c6_96, %c0_97, %c0_98] : memref<16x16x64xf32, #tpu.memory_space<vmem>>, vector<1x16x64xf32>
    %132 = vector.shape_cast %131 : vector<1x16x64xf32> to vector<16x64xf32>
    %133 = vector.broadcast %130 : f32 to vector<16x64xf32>
    %134 = arith.mulf %133, %132 : vector<16x64xf32>
    %135 = arith.addf %129, %134 : vector<16x64xf32>
    %c1_99 = arith.constant 1 : index
    %c7_100 = arith.constant 7 : index
    %136 = memref.load %arg1[%c1_99, %c7_100] : memref<2x16xf32, #tpu.memory_space<smem>>
    %c7_101 = arith.constant 7 : index
    %c0_102 = arith.constant 0 : index
    %c0_103 = arith.constant 0 : index
    %137 = vector.load %arg3[%c7_101, %c0_102, %c0_103] : memref<16x16x64xf32, #tpu.memory_space<vmem>>, vector<1x16x64xf32>
    %138 = vector.shape_cast %137 : vector<1x16x64xf32> to vector<16x64xf32>
    %139 = vector.broadcast %136 : f32 to vector<16x64xf32>
    %140 = arith.mulf %139, %138 : vector<16x64xf32>
    %141 = arith.addf %135, %140 : vector<16x64xf32>
    %c1_104 = arith.constant 1 : index
    %c8_105 = arith.constant 8 : index
    %142 = memref.load %arg1[%c1_104, %c8_105] : memref<2x16xf32, #tpu.memory_space<smem>>
    %c8_106 = arith.constant 8 : index
    %c0_107 = arith.constant 0 : index
    %c0_108 = arith.constant 0 : index
    %143 = vector.load %arg3[%c8_106, %c0_107, %c0_108] : memref<16x16x64xf32, #tpu.memory_space<vmem>>, vector<1x16x64xf32>
    %144 = vector.shape_cast %143 : vector<1x16x64xf32> to vector<16x64xf32>
    %145 = vector.broadcast %142 : f32 to vector<16x64xf32>
    %146 = arith.mulf %145, %144 : vector<16x64xf32>
    %147 = arith.addf %141, %146 : vector<16x64xf32>
    %c1_109 = arith.constant 1 : index
    %c9_110 = arith.constant 9 : index
    %148 = memref.load %arg1[%c1_109, %c9_110] : memref<2x16xf32, #tpu.memory_space<smem>>
    %c9_111 = arith.constant 9 : index
    %c0_112 = arith.constant 0 : index
    %c0_113 = arith.constant 0 : index
    %149 = vector.load %arg3[%c9_111, %c0_112, %c0_113] : memref<16x16x64xf32, #tpu.memory_space<vmem>>, vector<1x16x64xf32>
    %150 = vector.shape_cast %149 : vector<1x16x64xf32> to vector<16x64xf32>
    %151 = vector.broadcast %148 : f32 to vector<16x64xf32>
    %152 = arith.mulf %151, %150 : vector<16x64xf32>
    %153 = arith.addf %147, %152 : vector<16x64xf32>
    %c1_114 = arith.constant 1 : index
    %c10_115 = arith.constant 10 : index
    %154 = memref.load %arg1[%c1_114, %c10_115] : memref<2x16xf32, #tpu.memory_space<smem>>
    %c10_116 = arith.constant 10 : index
    %c0_117 = arith.constant 0 : index
    %c0_118 = arith.constant 0 : index
    %155 = vector.load %arg3[%c10_116, %c0_117, %c0_118] : memref<16x16x64xf32, #tpu.memory_space<vmem>>, vector<1x16x64xf32>
    %156 = vector.shape_cast %155 : vector<1x16x64xf32> to vector<16x64xf32>
    %157 = vector.broadcast %154 : f32 to vector<16x64xf32>
    %158 = arith.mulf %157, %156 : vector<16x64xf32>
    %159 = arith.addf %153, %158 : vector<16x64xf32>
    %c1_119 = arith.constant 1 : index
    %c11_120 = arith.constant 11 : index
    %160 = memref.load %arg1[%c1_119, %c11_120] : memref<2x16xf32, #tpu.memory_space<smem>>
    %c11_121 = arith.constant 11 : index
    %c0_122 = arith.constant 0 : index
    %c0_123 = arith.constant 0 : index
    %161 = vector.load %arg3[%c11_121, %c0_122, %c0_123] : memref<16x16x64xf32, #tpu.memory_space<vmem>>, vector<1x16x64xf32>
    %162 = vector.shape_cast %161 : vector<1x16x64xf32> to vector<16x64xf32>
    %163 = vector.broadcast %160 : f32 to vector<16x64xf32>
    %164 = arith.mulf %163, %162 : vector<16x64xf32>
    %165 = arith.addf %159, %164 : vector<16x64xf32>
    %c1_124 = arith.constant 1 : index
    %c12_125 = arith.constant 12 : index
    %166 = memref.load %arg1[%c1_124, %c12_125] : memref<2x16xf32, #tpu.memory_space<smem>>
    %c12_126 = arith.constant 12 : index
    %c0_127 = arith.constant 0 : index
    %c0_128 = arith.constant 0 : index
    %167 = vector.load %arg3[%c12_126, %c0_127, %c0_128] : memref<16x16x64xf32, #tpu.memory_space<vmem>>, vector<1x16x64xf32>
    %168 = vector.shape_cast %167 : vector<1x16x64xf32> to vector<16x64xf32>
    %169 = vector.broadcast %166 : f32 to vector<16x64xf32>
    %170 = arith.mulf %169, %168 : vector<16x64xf32>
    %171 = arith.addf %165, %170 : vector<16x64xf32>
    %c1_129 = arith.constant 1 : index
    %c13_130 = arith.constant 13 : index
    %172 = memref.load %arg1[%c1_129, %c13_130] : memref<2x16xf32, #tpu.memory_space<smem>>
    %c13_131 = arith.constant 13 : index
    %c0_132 = arith.constant 0 : index
    %c0_133 = arith.constant 0 : index
    %173 = vector.load %arg3[%c13_131, %c0_132, %c0_133] : memref<16x16x64xf32, #tpu.memory_space<vmem>>, vector<1x16x64xf32>
    %174 = vector.shape_cast %173 : vector<1x16x64xf32> to vector<16x64xf32>
    %175 = vector.broadcast %172 : f32 to vector<16x64xf32>
    %176 = arith.mulf %175, %174 : vector<16x64xf32>
    %177 = arith.addf %171, %176 : vector<16x64xf32>
    %c1_134 = arith.constant 1 : index
    %c14_135 = arith.constant 14 : index
    %178 = memref.load %arg1[%c1_134, %c14_135] : memref<2x16xf32, #tpu.memory_space<smem>>
    %c14_136 = arith.constant 14 : index
    %c0_137 = arith.constant 0 : index
    %c0_138 = arith.constant 0 : index
    %179 = vector.load %arg3[%c14_136, %c0_137, %c0_138] : memref<16x16x64xf32, #tpu.memory_space<vmem>>, vector<1x16x64xf32>
    %180 = vector.shape_cast %179 : vector<1x16x64xf32> to vector<16x64xf32>
    %181 = vector.broadcast %178 : f32 to vector<16x64xf32>
    %182 = arith.mulf %181, %180 : vector<16x64xf32>
    %183 = arith.addf %177, %182 : vector<16x64xf32>
    %c1_139 = arith.constant 1 : index
    %c15_140 = arith.constant 15 : index
    %184 = memref.load %arg1[%c1_139, %c15_140] : memref<2x16xf32, #tpu.memory_space<smem>>
    %c15_141 = arith.constant 15 : index
    %c0_142 = arith.constant 0 : index
    %c0_143 = arith.constant 0 : index
    %185 = vector.load %arg3[%c15_141, %c0_142, %c0_143] : memref<16x16x64xf32, #tpu.memory_space<vmem>>, vector<1x16x64xf32>
    %186 = vector.shape_cast %185 : vector<1x16x64xf32> to vector<16x64xf32>
    %187 = vector.broadcast %184 : f32 to vector<16x64xf32>
    %188 = arith.mulf %187, %186 : vector<16x64xf32>
    %189 = arith.addf %183, %188 : vector<16x64xf32>
    %cst = arith.constant 0.000000e+00 : f32
    %190 = vector.broadcast %cst : f32 to vector<1x64xf32>
    %cst_144 = arith.constant dense<0.000000e+00> : vector<64xf32>
    %191 = vector.multi_reduction <add>, %94, %cst_144 [0] : vector<16x64xf32> to vector<64xf32>
    %192 = vector.shape_cast %191 : vector<64xf32> to vector<1x64xf32>
    %193 = arith.addf %190, %192 : vector<1x64xf32>
    %cst_145 = arith.constant dense<0.000000e+00> : vector<64xf32>
    %194 = vector.multi_reduction <add>, %189, %cst_145 [0] : vector<16x64xf32> to vector<64xf32>
    %195 = vector.shape_cast %194 : vector<64xf32> to vector<1x64xf32>
    %196 = arith.addf %193, %195 : vector<1x64xf32>
    %cst_146 = arith.constant 3.200000e+01 : f32
    %197 = vector.broadcast %cst_146 : f32 to vector<1x64xf32>
    %198 = arith.divf %196, %197 : vector<1x64xf32>
    %cst_147 = arith.constant 0.000000e+00 : f32
    %199 = vector.broadcast %cst_147 : f32 to vector<1x64xf32>
    %200 = vector.broadcast %198 : vector<1x64xf32> to vector<16x64xf32>
    %201 = arith.subf %94, %200 : vector<16x64xf32>
    %202 = arith.mulf %201, %201 : vector<16x64xf32>
    %cst_148 = arith.constant dense<0.000000e+00> : vector<64xf32>
    %203 = vector.multi_reduction <add>, %202, %cst_148 [0] : vector<16x64xf32> to vector<64xf32>
    %204 = vector.shape_cast %203 : vector<64xf32> to vector<1x64xf32>
    %205 = arith.addf %199, %204 : vector<1x64xf32>
    %206 = vector.broadcast %198 : vector<1x64xf32> to vector<16x64xf32>
    %207 = arith.subf %189, %206 : vector<16x64xf32>
    %208 = arith.mulf %207, %207 : vector<16x64xf32>
    %cst_149 = arith.constant dense<0.000000e+00> : vector<64xf32>
    %209 = vector.multi_reduction <add>, %208, %cst_149 [0] : vector<16x64xf32> to vector<64xf32>
    %210 = vector.shape_cast %209 : vector<64xf32> to vector<1x64xf32>
    %211 = arith.addf %205, %210 : vector<1x64xf32>
    %c0_150 = arith.constant 0 : index
    %c0_151 = arith.constant 0 : index
    %212 = vector.load %arg4[%c0_150, %c0_151] : memref<1x64xf32, #tpu.memory_space<vmem>>, vector<1x64xf32>
    %cst_152 = arith.constant 3.200000e+01 : f32
    %213 = vector.broadcast %cst_152 : f32 to vector<1x64xf32>
    %214 = arith.divf %211, %213 : vector<1x64xf32>
    %cst_153 = arith.constant 9.99999974E-6 : f32
    %215 = vector.broadcast %cst_153 : f32 to vector<1x64xf32>
    %216 = arith.addf %214, %215 : vector<1x64xf32>
    %217 = math.rsqrt %216 : vector<1x64xf32>
    %218 = arith.mulf %212, %217 : vector<1x64xf32>
    %c0_154 = arith.constant 0 : index
    %c0_155 = arith.constant 0 : index
    %219 = vector.load %arg5[%c0_154, %c0_155] : memref<1x64xf32, #tpu.memory_space<vmem>>, vector<1x64xf32>
    %220 = arith.mulf %198, %218 : vector<1x64xf32>
    %221 = arith.subf %219, %220 : vector<1x64xf32>
    %c0_156 = arith.constant 0 : index
    %222 = memref.load %arg2[%c0_156] : memref<1xf32, #tpu.memory_space<smem>>
    %223 = vector.broadcast %218 : vector<1x64xf32> to vector<16x64xf32>
    %224 = arith.mulf %94, %223 : vector<16x64xf32>
    %225 = vector.broadcast %221 : vector<1x64xf32> to vector<16x64xf32>
    %226 = arith.addf %224, %225 : vector<16x64xf32>
    %cst_157 = arith.constant 0.000000e+00 : f32
    %227 = vector.broadcast %cst_157 : f32 to vector<16x64xf32>
    %228 = arith.maximumf %226, %227 : vector<16x64xf32>
    %229 = arith.truncf %228 : vector<16x64xf32> to vector<16x64xbf16>
    %c0_158 = arith.constant 0 : index
    %c0_159 = arith.constant 0 : index
    %230 = vector.load %arg6[%c0_158, %c0_159] : memref<64x80xbf16, #tpu.memory_space<vmem>>, vector<64x80xbf16>
    %cst_160 = arith.constant dense<0.000000e+00> : vector<16x80xf32>
    %231 = tpu.matmul %229, %230, %cst_160 {dimension_numbers = #tpu.dot_dimension_numbers<[1], [0], [0], [1], [0, 0, 1, 1], [], []>} : vector<16x64xbf16>, vector<64x80xbf16>, vector<16x80xf32> -> vector<16x80xf32>
    %c0_161 = arith.constant 0 : index
    %c0_162 = arith.constant 0 : index
    %232 = vector.load %arg7[%c0_161, %c0_162] : memref<1x80xf32, #tpu.memory_space<vmem>>, vector<1x80xf32>
    %233 = vector.broadcast %232 : vector<1x80xf32> to vector<16x80xf32>
    %234 = arith.addf %231, %233 : vector<16x80xf32>
    %235 = vector.extract_strided_slice %234 {offsets = [0, 0], sizes = [16, 8], strides = [1, 1]} : vector<16x80xf32> to vector<16x8xf32>
    %236 = vector.extract_strided_slice %234 {offsets = [0, 8], sizes = [16, 8], strides = [1, 1]} : vector<16x80xf32> to vector<16x8xf32>
    %237 = vector.extract_strided_slice %234 {offsets = [0, 16], sizes = [16, 64], strides = [1, 1]} : vector<16x80xf32> to vector<16x64xf32>
    %cst_163 = arith.constant dense<0.000000e+00> : vector<16x16xf32>
    %238 = tpu.matmul %235, %236, %cst_163 {dimension_numbers = #tpu.dot_dimension_numbers<[1], [1], [0], [0], [0, 0, 1, 0], [], []>} : vector<16x8xf32>, vector<16x8xf32>, vector<16x16xf32> -> vector<16x16xf32>
    %cst_164 = arith.constant dense<0xFF800000> : vector<16xf32>
    %239 = vector.multi_reduction <maximumf>, %238, %cst_164 [1] : vector<16x16xf32> to vector<16xf32>
    %240 = vector.shape_cast %239 : vector<16xf32> to vector<16x1xf32>
    %241 = vector.broadcast %240 : vector<16x1xf32> to vector<16x16xf32>
    %242 = arith.subf %238, %241 : vector<16x16xf32>
    %243 = math.exp %242 : vector<16x16xf32>
    %cst_165 = arith.constant dense<0.000000e+00> : vector<16xf32>
    %244 = vector.multi_reduction <add>, %243, %cst_165 [1] : vector<16x16xf32> to vector<16xf32>
    %245 = vector.shape_cast %244 : vector<16xf32> to vector<16x1xf32>
    %246 = vector.broadcast %245 : vector<16x1xf32> to vector<16x16xf32>
    %247 = arith.divf %243, %246 : vector<16x16xf32>
    %248 = arith.truncf %247 : vector<16x16xf32> to vector<16x16xbf16>
    %249 = arith.truncf %237 : vector<16x64xf32> to vector<16x64xbf16>
    %cst_166 = arith.constant dense<0.000000e+00> : vector<16x64xf32>
    %250 = tpu.matmul %248, %249, %cst_166 {dimension_numbers = #tpu.dot_dimension_numbers<[1], [0], [0], [1], [0, 0, 1, 1], [], []>} : vector<16x16xbf16>, vector<16x64xbf16>, vector<16x64xf32> -> vector<16x64xf32>
    %251 = vector.broadcast %222 : f32 to vector<16x64xf32>
    %252 = arith.mulf %251, %250 : vector<16x64xf32>
    %253 = arith.addf %252, %228 : vector<16x64xf32>
    %254 = arith.truncf %253 : vector<16x64xf32> to vector<16x64xbf16>
    %c0_167 = arith.constant 0 : index
    %c0_168 = arith.constant 0 : index
    %c0_169 = arith.constant 0 : index
    %255 = vector.load %arg8[%c0_167, %c0_168, %c0_169] : memref<2x16x64xbf16, #tpu.memory_space<vmem>>, vector<1x16x64xbf16>
    %256 = vector.shape_cast %255 : vector<1x16x64xbf16> to vector<16x64xbf16>
    %257 = vector.shape_cast %254 : vector<16x64xbf16> to vector<1x16x64xbf16>
    tpu.vector_store %arg8[%c0_167, %c0_168, %c0_169], %257 {strides = array<i32>} : memref<2x16x64xbf16, #tpu.memory_space<vmem>>, vector<1x16x64xbf16>,
    %258 = vector.broadcast %218 : vector<1x64xf32> to vector<16x64xf32>
    %259 = arith.mulf %189, %258 : vector<16x64xf32>
    %260 = vector.broadcast %221 : vector<1x64xf32> to vector<16x64xf32>
    %261 = arith.addf %259, %260 : vector<16x64xf32>
    %cst_170 = arith.constant 0.000000e+00 : f32
    %262 = vector.broadcast %cst_170 : f32 to vector<16x64xf32>
    %263 = arith.maximumf %261, %262 : vector<16x64xf32>
    %264 = arith.truncf %263 : vector<16x64xf32> to vector<16x64xbf16>
    %c0_171 = arith.constant 0 : index
    %c0_172 = arith.constant 0 : index
    %265 = vector.load %arg6[%c0_171, %c0_172] : memref<64x80xbf16, #tpu.memory_space<vmem>>, vector<64x80xbf16>
    %cst_173 = arith.constant dense<0.000000e+00> : vector<16x80xf32>
    %266 = tpu.matmul %264, %265, %cst_173 {dimension_numbers = #tpu.dot_dimension_numbers<[1], [0], [0], [1], [0, 0, 1, 1], [], []>} : vector<16x64xbf16>, vector<64x80xbf16>, vector<16x80xf32> -> vector<16x80xf32>
    %c0_174 = arith.constant 0 : index
    %c0_175 = arith.constant 0 : index
    %267 = vector.load %arg7[%c0_174, %c0_175] : memref<1x80xf32, #tpu.memory_space<vmem>>, vector<1x80xf32>
    %268 = vector.broadcast %267 : vector<1x80xf32> to vector<16x80xf32>
    %269 = arith.addf %266, %268 : vector<16x80xf32>
    %270 = vector.extract_strided_slice %269 {offsets = [0, 0], sizes = [16, 8], strides = [1, 1]} : vector<16x80xf32> to vector<16x8xf32>
    %271 = vector.extract_strided_slice %269 {offsets = [0, 8], sizes = [16, 8], strides = [1, 1]} : vector<16x80xf32> to vector<16x8xf32>
    %272 = vector.extract_strided_slice %269 {offsets = [0, 16], sizes = [16, 64], strides = [1, 1]} : vector<16x80xf32> to vector<16x64xf32>
    %cst_176 = arith.constant dense<0.000000e+00> : vector<16x16xf32>
    %273 = tpu.matmul %270, %271, %cst_176 {dimension_numbers = #tpu.dot_dimension_numbers<[1], [1], [0], [0], [0, 0, 1, 0], [], []>} : vector<16x8xf32>, vector<16x8xf32>, vector<16x16xf32> -> vector<16x16xf32>
    %cst_177 = arith.constant dense<0xFF800000> : vector<16xf32>
    %274 = vector.multi_reduction <maximumf>, %273, %cst_177 [1] : vector<16x16xf32> to vector<16xf32>
    %275 = vector.shape_cast %274 : vector<16xf32> to vector<16x1xf32>
    %276 = vector.broadcast %275 : vector<16x1xf32> to vector<16x16xf32>
    %277 = arith.subf %273, %276 : vector<16x16xf32>
    %278 = math.exp %277 : vector<16x16xf32>
    %cst_178 = arith.constant dense<0.000000e+00> : vector<16xf32>
    %279 = vector.multi_reduction <add>, %278, %cst_178 [1] : vector<16x16xf32> to vector<16xf32>
    %280 = vector.shape_cast %279 : vector<16xf32> to vector<16x1xf32>
    %281 = vector.broadcast %280 : vector<16x1xf32> to vector<16x16xf32>
    %282 = arith.divf %278, %281 : vector<16x16xf32>
    %283 = arith.truncf %282 : vector<16x16xf32> to vector<16x16xbf16>
    %284 = arith.truncf %272 : vector<16x64xf32> to vector<16x64xbf16>
    %cst_179 = arith.constant dense<0.000000e+00> : vector<16x64xf32>
    %285 = tpu.matmul %283, %284, %cst_179 {dimension_numbers = #tpu.dot_dimension_numbers<[1], [0], [0], [1], [0, 0, 1, 1], [], []>} : vector<16x16xbf16>, vector<16x64xbf16>, vector<16x64xf32> -> vector<16x64xf32>
    %286 = vector.broadcast %222 : f32 to vector<16x64xf32>
    %287 = arith.mulf %286, %285 : vector<16x64xf32>
    %288 = arith.addf %287, %263 : vector<16x64xf32>
    %289 = arith.truncf %288 : vector<16x64xf32> to vector<16x64xbf16>
    %c1_180 = arith.constant 1 : index
    %c0_181 = arith.constant 0 : index
    %c0_182 = arith.constant 0 : index
    %290 = vector.load %arg8[%c1_180, %c0_181, %c0_182] : memref<2x16x64xbf16, #tpu.memory_space<vmem>>, vector<1x16x64xbf16>
    %291 = vector.shape_cast %290 : vector<1x16x64xbf16> to vector<16x64xbf16>
    %292 = vector.shape_cast %289 : vector<16x64xbf16> to vector<1x16x64xbf16>
    tpu.vector_store %arg8[%c1_180, %c0_181, %c0_182], %292 {strides = array<i32>} : memref<2x16x64xbf16, #tpu.memory_space<vmem>>, vector<1x16x64xbf16>,
    return
  }
  func.func @transform_0(%arg0: i32) -> (i32, i32) {
    %c0_i32 = arith.constant 0 : i32
    %c0_i32_0 = arith.constant 0 : i32
    %c0_i32_1 = arith.constant 0 : i32
    return %c0_i32, %c0_i32_0 : i32, i32
  }
  func.func @transform_1(%arg0: i32) -> i32 {
    %c0_i32 = arith.constant 0 : i32
    %c0_i32_0 = arith.constant 0 : i32
    return %c0_i32 : i32
  }
  func.func @transform_2(%arg0: i32) -> (i32, i32, i32) {
    %c0_i32 = arith.constant 0 : i32
    %c0_i32_0 = arith.constant 0 : i32
    %c0_i32_1 = arith.constant 0 : i32
    %c0_i32_2 = arith.constant 0 : i32
    return %c0_i32, %c0_i32_0, %c0_i32_1 : i32, i32, i32
  }
  func.func @transform_3(%arg0: i32) -> (i32, i32) {
    %c0_i32 = arith.constant 0 : i32
    %c0_i32_0 = arith.constant 0 : i32
    %c0_i32_1 = arith.constant 0 : i32
    return %c0_i32, %c0_i32_0 : i32, i32
  }
  func.func @transform_4(%arg0: i32) -> (i32, i32) {
    %c0_i32 = arith.constant 0 : i32
    %c0_i32_0 = arith.constant 0 : i32
    %c0_i32_1 = arith.constant 0 : i32
    return %c0_i32, %c0_i32_0 : i32, i32
  }
  func.func @transform_5(%arg0: i32) -> (i32, i32) {
    %c0_i32 = arith.constant 0 : i32
    %c0_i32_0 = arith.constant 0 : i32
    %c0_i32_1 = arith.constant 0 : i32
    return %c0_i32, %c0_i32_0 : i32, i32
  }
  func.func @transform_6(%arg0: i32) -> (i32, i32) {
    %c0_i32 = arith.constant 0 : i32
    %c0_i32_0 = arith.constant 0 : i32
    %c0_i32_1 = arith.constant 0 : i32
    return %c0_i32, %c0_i32_0 : i32, i32
  }
  func.func @transform_7(%arg0: i32) -> (i32, i32, i32) {
    %c0_i32 = arith.constant 0 : i32
    %c0_i32_0 = arith.constant 0 : i32
    %c0_i32_1 = arith.constant 0 : i32
    %c0_i32_2 = arith.constant 0 : i32
    return %c0_i32, %c0_i32_0, %c0_i32_1 : i32, i32, i32
  }
}

module attributes {stable_mosaic.version = 11 : i64} {
  func.func @kernel(%arg0: i32, %arg1: memref<768x32xbf16, #tpu.memory_space<vmem>>, %arg2: memref<4x32x256xbf16, #tpu.memory_space<vmem>>, %arg3: memref<32x1xf32, #tpu.memory_space<vmem>>, %arg4: memref<32x1xf32, #tpu.memory_space<vmem>>, %arg5: memref<4x32x32xbf16, #tpu.memory_space<vmem>>) attributes {dimension_semantics = [#tpu.dimension_semantics<arbitrary>], iteration_bounds = array<i64: 1>, scalar_prefetch = 0 : i64, scratch_operands = 0 : i64, tpu.core_type = #tpu.core_type<tc>, window_params = [{pipeline_mode = #tpu.pipeline_mode<synchronous>, transform_indices = @transform_0, window_bounds = array<i64: 768, 32>}, {pipeline_mode = #tpu.pipeline_mode<synchronous>, transform_indices = @transform_1, window_bounds = array<i64: 4, 32, 256>}, {pipeline_mode = #tpu.pipeline_mode<synchronous>, transform_indices = @transform_2, window_bounds = array<i64: 32, 1>}, {pipeline_mode = #tpu.pipeline_mode<synchronous>, transform_indices = @transform_3, window_bounds = array<i64: 32, 1>}, {pipeline_mode = #tpu.pipeline_mode<synchronous>, transform_indices = @transform_4, window_bounds = array<i64: 4, 32, 32>}]} {
    %cst = arith.constant 0.000000e+00 : f32
    %0 = vector.broadcast %cst : f32 to vector<32x1xf32>
    %c0 = arith.constant 0 : index
    %c0_0 = arith.constant 0 : index
    %1 = vector.load %arg1[%c0, %c0_0] : memref<768x32xbf16, #tpu.memory_space<vmem>>, vector<256x32xbf16>
    %c0_1 = arith.constant 0 : index
    %c0_2 = arith.constant 0 : index
    %c0_3 = arith.constant 0 : index
    %2 = vector.load %arg2[%c0_1, %c0_2, %c0_3] : memref<4x32x256xbf16, #tpu.memory_space<vmem>>, vector<1x32x256xbf16>
    %3 = vector.shape_cast %2 : vector<1x32x256xbf16> to vector<32x256xbf16>
    %cst_4 = arith.constant dense<0.000000e+00> : vector<32x32xf32>
    %4 = tpu.matmul %3, %1, %cst_4 {dimension_numbers = #tpu.dot_dimension_numbers<[1], [0], [0], [1], [0, 0, 1, 1], [], []>} : vector<32x256xbf16>, vector<256x32xbf16>, vector<32x32xf32> -> vector<32x32xf32>
    %cst_5 = arith.constant dense<0.000000e+00> : vector<32xf32>
    %5 = vector.multi_reduction <add>, %4, %cst_5 [1] : vector<32x32xf32> to vector<32xf32>
    %6 = vector.shape_cast %5 : vector<32xf32> to vector<32x1xf32>
    %7 = arith.addf %0, %6 : vector<32x1xf32>
    %c128 = arith.constant 128 : index
    %c0_6 = arith.constant 0 : index
    %8 = vector.load %arg1[%c128, %c0_6] : memref<768x32xbf16, #tpu.memory_space<vmem>>, vector<256x32xbf16>
    %c1 = arith.constant 1 : index
    %c0_7 = arith.constant 0 : index
    %c0_8 = arith.constant 0 : index
    %9 = vector.load %arg2[%c1, %c0_7, %c0_8] : memref<4x32x256xbf16, #tpu.memory_space<vmem>>, vector<1x32x256xbf16>
    %10 = vector.shape_cast %9 : vector<1x32x256xbf16> to vector<32x256xbf16>
    %cst_9 = arith.constant dense<0.000000e+00> : vector<32x32xf32>
    %11 = tpu.matmul %10, %8, %cst_9 {dimension_numbers = #tpu.dot_dimension_numbers<[1], [0], [0], [1], [0, 0, 1, 1], [], []>} : vector<32x256xbf16>, vector<256x32xbf16>, vector<32x32xf32> -> vector<32x32xf32>
    %cst_10 = arith.constant dense<0.000000e+00> : vector<32xf32>
    %12 = vector.multi_reduction <add>, %11, %cst_10 [1] : vector<32x32xf32> to vector<32xf32>
    %13 = vector.shape_cast %12 : vector<32xf32> to vector<32x1xf32>
    %14 = arith.addf %7, %13 : vector<32x1xf32>
    %c384 = arith.constant 384 : index
    %c0_11 = arith.constant 0 : index
    %15 = vector.load %arg1[%c384, %c0_11] : memref<768x32xbf16, #tpu.memory_space<vmem>>, vector<256x32xbf16>
    %c2 = arith.constant 2 : index
    %c0_12 = arith.constant 0 : index
    %c0_13 = arith.constant 0 : index
    %16 = vector.load %arg2[%c2, %c0_12, %c0_13] : memref<4x32x256xbf16, #tpu.memory_space<vmem>>, vector<1x32x256xbf16>
    %17 = vector.shape_cast %16 : vector<1x32x256xbf16> to vector<32x256xbf16>
    %cst_14 = arith.constant dense<0.000000e+00> : vector<32x32xf32>
    %18 = tpu.matmul %17, %15, %cst_14 {dimension_numbers = #tpu.dot_dimension_numbers<[1], [0], [0], [1], [0, 0, 1, 1], [], []>} : vector<32x256xbf16>, vector<256x32xbf16>, vector<32x32xf32> -> vector<32x32xf32>
    %cst_15 = arith.constant dense<0.000000e+00> : vector<32xf32>
    %19 = vector.multi_reduction <add>, %18, %cst_15 [1] : vector<32x32xf32> to vector<32xf32>
    %20 = vector.shape_cast %19 : vector<32xf32> to vector<32x1xf32>
    %21 = arith.addf %14, %20 : vector<32x1xf32>
    %c512 = arith.constant 512 : index
    %c0_16 = arith.constant 0 : index
    %22 = vector.load %arg1[%c512, %c0_16] : memref<768x32xbf16, #tpu.memory_space<vmem>>, vector<256x32xbf16>
    %c3 = arith.constant 3 : index
    %c0_17 = arith.constant 0 : index
    %c0_18 = arith.constant 0 : index
    %23 = vector.load %arg2[%c3, %c0_17, %c0_18] : memref<4x32x256xbf16, #tpu.memory_space<vmem>>, vector<1x32x256xbf16>
    %24 = vector.shape_cast %23 : vector<1x32x256xbf16> to vector<32x256xbf16>
    %cst_19 = arith.constant dense<0.000000e+00> : vector<32x32xf32>
    %25 = tpu.matmul %24, %22, %cst_19 {dimension_numbers = #tpu.dot_dimension_numbers<[1], [0], [0], [1], [0, 0, 1, 1], [], []>} : vector<32x256xbf16>, vector<256x32xbf16>, vector<32x32xf32> -> vector<32x32xf32>
    %cst_20 = arith.constant dense<0.000000e+00> : vector<32xf32>
    %26 = vector.multi_reduction <add>, %25, %cst_20 [1] : vector<32x32xf32> to vector<32xf32>
    %27 = vector.shape_cast %26 : vector<32xf32> to vector<32x1xf32>
    %28 = arith.addf %21, %27 : vector<32x1xf32>
    %cst_21 = arith.constant 1.280000e+02 : f32
    %29 = vector.broadcast %cst_21 : f32 to vector<32x1xf32>
    %30 = arith.divf %28, %29 : vector<32x1xf32>
    %cst_22 = arith.constant 0.000000e+00 : f32
    %31 = vector.broadcast %cst_22 : f32 to vector<32x1xf32>
    %32 = vector.broadcast %30 : vector<32x1xf32> to vector<32x32xf32>
    %33 = arith.subf %4, %32 : vector<32x32xf32>
    %34 = arith.mulf %33, %33 : vector<32x32xf32>
    %cst_23 = arith.constant dense<0.000000e+00> : vector<32xf32>
    %35 = vector.multi_reduction <add>, %34, %cst_23 [1] : vector<32x32xf32> to vector<32xf32>
    %36 = vector.shape_cast %35 : vector<32xf32> to vector<32x1xf32>
    %37 = arith.addf %31, %36 : vector<32x1xf32>
    %38 = vector.broadcast %30 : vector<32x1xf32> to vector<32x32xf32>
    %39 = arith.subf %11, %38 : vector<32x32xf32>
    %40 = arith.mulf %39, %39 : vector<32x32xf32>
    %cst_24 = arith.constant dense<0.000000e+00> : vector<32xf32>
    %41 = vector.multi_reduction <add>, %40, %cst_24 [1] : vector<32x32xf32> to vector<32xf32>
    %42 = vector.shape_cast %41 : vector<32xf32> to vector<32x1xf32>
    %43 = arith.addf %37, %42 : vector<32x1xf32>
    %44 = vector.broadcast %30 : vector<32x1xf32> to vector<32x32xf32>
    %45 = arith.subf %18, %44 : vector<32x32xf32>
    %46 = arith.mulf %45, %45 : vector<32x32xf32>
    %cst_25 = arith.constant dense<0.000000e+00> : vector<32xf32>
    %47 = vector.multi_reduction <add>, %46, %cst_25 [1] : vector<32x32xf32> to vector<32xf32>
    %48 = vector.shape_cast %47 : vector<32xf32> to vector<32x1xf32>
    %49 = arith.addf %43, %48 : vector<32x1xf32>
    %50 = vector.broadcast %30 : vector<32x1xf32> to vector<32x32xf32>
    %51 = arith.subf %25, %50 : vector<32x32xf32>
    %52 = arith.mulf %51, %51 : vector<32x32xf32>
    %cst_26 = arith.constant dense<0.000000e+00> : vector<32xf32>
    %53 = vector.multi_reduction <add>, %52, %cst_26 [1] : vector<32x32xf32> to vector<32xf32>
    %54 = vector.shape_cast %53 : vector<32xf32> to vector<32x1xf32>
    %55 = arith.addf %49, %54 : vector<32x1xf32>
    %c0_27 = arith.constant 0 : index
    %c0_28 = arith.constant 0 : index
    %56 = vector.load %arg3[%c0_27, %c0_28] : memref<32x1xf32, #tpu.memory_space<vmem>>, vector<32x1xf32>
    %cst_29 = arith.constant 1.280000e+02 : f32
    %57 = vector.broadcast %cst_29 : f32 to vector<32x1xf32>
    %58 = arith.divf %55, %57 : vector<32x1xf32>
    %cst_30 = arith.constant 9.99999974E-6 : f32
    %59 = vector.broadcast %cst_30 : f32 to vector<32x1xf32>
    %60 = arith.addf %58, %59 : vector<32x1xf32>
    %61 = math.rsqrt %60 : vector<32x1xf32>
    %62 = arith.mulf %56, %61 : vector<32x1xf32>
    %c0_31 = arith.constant 0 : index
    %c0_32 = arith.constant 0 : index
    %63 = vector.load %arg4[%c0_31, %c0_32] : memref<32x1xf32, #tpu.memory_space<vmem>>, vector<32x1xf32>
    %64 = arith.mulf %30, %62 : vector<32x1xf32>
    %65 = arith.subf %63, %64 : vector<32x1xf32>
    %66 = vector.broadcast %62 : vector<32x1xf32> to vector<32x32xf32>
    %67 = arith.mulf %4, %66 : vector<32x32xf32>
    %68 = vector.broadcast %65 : vector<32x1xf32> to vector<32x32xf32>
    %69 = arith.addf %67, %68 : vector<32x32xf32>
    %cst_33 = arith.constant 0.000000e+00 : f32
    %70 = vector.broadcast %cst_33 : f32 to vector<32x32xf32>
    %71 = arith.maximumf %69, %70 : vector<32x32xf32>
    %72 = arith.truncf %71 : vector<32x32xf32> to vector<32x32xbf16>
    %c0_34 = arith.constant 0 : index
    %c0_35 = arith.constant 0 : index
    %c0_36 = arith.constant 0 : index
    %73 = vector.load %arg5[%c0_34, %c0_35, %c0_36] : memref<4x32x32xbf16, #tpu.memory_space<vmem>>, vector<1x32x32xbf16>
    %74 = vector.shape_cast %73 : vector<1x32x32xbf16> to vector<32x32xbf16>
    %75 = vector.shape_cast %72 : vector<32x32xbf16> to vector<1x32x32xbf16>
    tpu.vector_store %arg5[%c0_34, %c0_35, %c0_36], %75 {strides = array<i32>} : memref<4x32x32xbf16, #tpu.memory_space<vmem>>, vector<1x32x32xbf16>,
    %76 = vector.broadcast %62 : vector<32x1xf32> to vector<32x32xf32>
    %77 = arith.mulf %11, %76 : vector<32x32xf32>
    %78 = vector.broadcast %65 : vector<32x1xf32> to vector<32x32xf32>
    %79 = arith.addf %77, %78 : vector<32x32xf32>
    %cst_37 = arith.constant 0.000000e+00 : f32
    %80 = vector.broadcast %cst_37 : f32 to vector<32x32xf32>
    %81 = arith.maximumf %79, %80 : vector<32x32xf32>
    %82 = arith.truncf %81 : vector<32x32xf32> to vector<32x32xbf16>
    %c1_38 = arith.constant 1 : index
    %c0_39 = arith.constant 0 : index
    %c0_40 = arith.constant 0 : index
    %83 = vector.load %arg5[%c1_38, %c0_39, %c0_40] : memref<4x32x32xbf16, #tpu.memory_space<vmem>>, vector<1x32x32xbf16>
    %84 = vector.shape_cast %83 : vector<1x32x32xbf16> to vector<32x32xbf16>
    %85 = vector.shape_cast %82 : vector<32x32xbf16> to vector<1x32x32xbf16>
    tpu.vector_store %arg5[%c1_38, %c0_39, %c0_40], %85 {strides = array<i32>} : memref<4x32x32xbf16, #tpu.memory_space<vmem>>, vector<1x32x32xbf16>,
    %86 = vector.broadcast %62 : vector<32x1xf32> to vector<32x32xf32>
    %87 = arith.mulf %18, %86 : vector<32x32xf32>
    %88 = vector.broadcast %65 : vector<32x1xf32> to vector<32x32xf32>
    %89 = arith.addf %87, %88 : vector<32x32xf32>
    %cst_41 = arith.constant 0.000000e+00 : f32
    %90 = vector.broadcast %cst_41 : f32 to vector<32x32xf32>
    %91 = arith.maximumf %89, %90 : vector<32x32xf32>
    %92 = arith.truncf %91 : vector<32x32xf32> to vector<32x32xbf16>
    %c2_42 = arith.constant 2 : index
    %c0_43 = arith.constant 0 : index
    %c0_44 = arith.constant 0 : index
    %93 = vector.load %arg5[%c2_42, %c0_43, %c0_44] : memref<4x32x32xbf16, #tpu.memory_space<vmem>>, vector<1x32x32xbf16>
    %94 = vector.shape_cast %93 : vector<1x32x32xbf16> to vector<32x32xbf16>
    %95 = vector.shape_cast %92 : vector<32x32xbf16> to vector<1x32x32xbf16>
    tpu.vector_store %arg5[%c2_42, %c0_43, %c0_44], %95 {strides = array<i32>} : memref<4x32x32xbf16, #tpu.memory_space<vmem>>, vector<1x32x32xbf16>,
    %96 = vector.broadcast %62 : vector<32x1xf32> to vector<32x32xf32>
    %97 = arith.mulf %25, %96 : vector<32x32xf32>
    %98 = vector.broadcast %65 : vector<32x1xf32> to vector<32x32xf32>
    %99 = arith.addf %97, %98 : vector<32x32xf32>
    %cst_45 = arith.constant 0.000000e+00 : f32
    %100 = vector.broadcast %cst_45 : f32 to vector<32x32xf32>
    %101 = arith.maximumf %99, %100 : vector<32x32xf32>
    %102 = arith.truncf %101 : vector<32x32xf32> to vector<32x32xbf16>
    %c3_46 = arith.constant 3 : index
    %c0_47 = arith.constant 0 : index
    %c0_48 = arith.constant 0 : index
    %103 = vector.load %arg5[%c3_46, %c0_47, %c0_48] : memref<4x32x32xbf16, #tpu.memory_space<vmem>>, vector<1x32x32xbf16>
    %104 = vector.shape_cast %103 : vector<1x32x32xbf16> to vector<32x32xbf16>
    %105 = vector.shape_cast %102 : vector<32x32xbf16> to vector<1x32x32xbf16>
    tpu.vector_store %arg5[%c3_46, %c0_47, %c0_48], %105 {strides = array<i32>} : memref<4x32x32xbf16, #tpu.memory_space<vmem>>, vector<1x32x32xbf16>,
    return
  }
  func.func @transform_0(%arg0: i32) -> (i32, i32) {
    %c0_i32 = arith.constant 0 : i32
    %c0_i32_0 = arith.constant 0 : i32
    %c0_i32_1 = arith.constant 0 : i32
    return %c0_i32, %c0_i32_0 : i32, i32
  }
  func.func @transform_1(%arg0: i32) -> (i32, i32, i32) {
    %c0_i32 = arith.constant 0 : i32
    %c0_i32_0 = arith.constant 0 : i32
    %c0_i32_1 = arith.constant 0 : i32
    %c0_i32_2 = arith.constant 0 : i32
    return %c0_i32, %c0_i32_0, %c0_i32_1 : i32, i32, i32
  }
  func.func @transform_2(%arg0: i32) -> (i32, i32) {
    %c0_i32 = arith.constant 0 : i32
    %c0_i32_0 = arith.constant 0 : i32
    %c0_i32_1 = arith.constant 0 : i32
    return %c0_i32, %c0_i32_0 : i32, i32
  }
  func.func @transform_3(%arg0: i32) -> (i32, i32) {
    %c0_i32 = arith.constant 0 : i32
    %c0_i32_0 = arith.constant 0 : i32
    %c0_i32_1 = arith.constant 0 : i32
    return %c0_i32, %c0_i32_0 : i32, i32
  }
  func.func @transform_4(%arg0: i32) -> (i32, i32, i32) {
    %c0_i32 = arith.constant 0 : i32
    %c0_i32_0 = arith.constant 0 : i32
    %c0_i32_1 = arith.constant 0 : i32
    %c0_i32_2 = arith.constant 0 : i32
    return %c0_i32, %c0_i32_0, %c0_i32_1 : i32, i32, i32
  }
}

module attributes {stable_mosaic.version = 11 : i64} {
  func.func @kernel(%arg0: i32, %arg1: memref<384x128xbf16, #tpu.memory_space<vmem>>, %arg2: memref<4x16x128xbf16, #tpu.memory_space<vmem>>, %arg3: memref<16x1xf32, #tpu.memory_space<vmem>>, %arg4: memref<16x1xf32, #tpu.memory_space<vmem>>, %arg5: memref<4x16x128xbf16, #tpu.memory_space<vmem>>) attributes {dimension_semantics = [#tpu.dimension_semantics<arbitrary>], iteration_bounds = array<i64: 1>, scalar_prefetch = 0 : i64, scratch_operands = 0 : i64, tpu.core_type = #tpu.core_type<tc>, window_params = [{pipeline_mode = #tpu.pipeline_mode<synchronous>, transform_indices = @transform_0, window_bounds = array<i64: 384, 128>}, {pipeline_mode = #tpu.pipeline_mode<synchronous>, transform_indices = @transform_1, window_bounds = array<i64: 4, 16, 128>}, {pipeline_mode = #tpu.pipeline_mode<synchronous>, transform_indices = @transform_2, window_bounds = array<i64: 16, 1>}, {pipeline_mode = #tpu.pipeline_mode<synchronous>, transform_indices = @transform_3, window_bounds = array<i64: 16, 1>}, {pipeline_mode = #tpu.pipeline_mode<synchronous>, transform_indices = @transform_4, window_bounds = array<i64: 4, 16, 128>}]} {
    %cst = arith.constant 0.000000e+00 : f32
    %0 = vector.broadcast %cst : f32 to vector<16x1xf32>
    %c0 = arith.constant 0 : index
    %c0_0 = arith.constant 0 : index
    %1 = vector.load %arg1[%c0, %c0_0] : memref<384x128xbf16, #tpu.memory_space<vmem>>, vector<128x128xbf16>
    %c0_1 = arith.constant 0 : index
    %c0_2 = arith.constant 0 : index
    %c0_3 = arith.constant 0 : index
    %2 = vector.load %arg2[%c0_1, %c0_2, %c0_3] : memref<4x16x128xbf16, #tpu.memory_space<vmem>>, vector<1x16x128xbf16>
    %3 = vector.shape_cast %2 : vector<1x16x128xbf16> to vector<16x128xbf16>
    %cst_4 = arith.constant dense<0.000000e+00> : vector<16x128xf32>
    %4 = tpu.matmul %3, %1, %cst_4 {dimension_numbers = #tpu.dot_dimension_numbers<[1], [0], [0], [1], [0, 0, 1, 1], [], []>} : vector<16x128xbf16>, vector<128x128xbf16>, vector<16x128xf32> -> vector<16x128xf32>
    %cst_5 = arith.constant dense<0.000000e+00> : vector<16xf32>
    %5 = vector.multi_reduction <add>, %4, %cst_5 [1] : vector<16x128xf32> to vector<16xf32>
    %6 = vector.shape_cast %5 : vector<16xf32> to vector<16x1xf32>
    %7 = arith.addf %0, %6 : vector<16x1xf32>
    %c64 = arith.constant 64 : index
    %c0_6 = arith.constant 0 : index
    %8 = vector.load %arg1[%c64, %c0_6] : memref<384x128xbf16, #tpu.memory_space<vmem>>, vector<128x128xbf16>
    %c1 = arith.constant 1 : index
    %c0_7 = arith.constant 0 : index
    %c0_8 = arith.constant 0 : index
    %9 = vector.load %arg2[%c1, %c0_7, %c0_8] : memref<4x16x128xbf16, #tpu.memory_space<vmem>>, vector<1x16x128xbf16>
    %10 = vector.shape_cast %9 : vector<1x16x128xbf16> to vector<16x128xbf16>
    %cst_9 = arith.constant dense<0.000000e+00> : vector<16x128xf32>
    %11 = tpu.matmul %10, %8, %cst_9 {dimension_numbers = #tpu.dot_dimension_numbers<[1], [0], [0], [1], [0, 0, 1, 1], [], []>} : vector<16x128xbf16>, vector<128x128xbf16>, vector<16x128xf32> -> vector<16x128xf32>
    %cst_10 = arith.constant dense<0.000000e+00> : vector<16xf32>
    %12 = vector.multi_reduction <add>, %11, %cst_10 [1] : vector<16x128xf32> to vector<16xf32>
    %13 = vector.shape_cast %12 : vector<16xf32> to vector<16x1xf32>
    %14 = arith.addf %7, %13 : vector<16x1xf32>
    %c192 = arith.constant 192 : index
    %c0_11 = arith.constant 0 : index
    %15 = vector.load %arg1[%c192, %c0_11] : memref<384x128xbf16, #tpu.memory_space<vmem>>, vector<128x128xbf16>
    %c2 = arith.constant 2 : index
    %c0_12 = arith.constant 0 : index
    %c0_13 = arith.constant 0 : index
    %16 = vector.load %arg2[%c2, %c0_12, %c0_13] : memref<4x16x128xbf16, #tpu.memory_space<vmem>>, vector<1x16x128xbf16>
    %17 = vector.shape_cast %16 : vector<1x16x128xbf16> to vector<16x128xbf16>
    %cst_14 = arith.constant dense<0.000000e+00> : vector<16x128xf32>
    %18 = tpu.matmul %17, %15, %cst_14 {dimension_numbers = #tpu.dot_dimension_numbers<[1], [0], [0], [1], [0, 0, 1, 1], [], []>} : vector<16x128xbf16>, vector<128x128xbf16>, vector<16x128xf32> -> vector<16x128xf32>
    %cst_15 = arith.constant dense<0.000000e+00> : vector<16xf32>
    %19 = vector.multi_reduction <add>, %18, %cst_15 [1] : vector<16x128xf32> to vector<16xf32>
    %20 = vector.shape_cast %19 : vector<16xf32> to vector<16x1xf32>
    %21 = arith.addf %14, %20 : vector<16x1xf32>
    %c256 = arith.constant 256 : index
    %c0_16 = arith.constant 0 : index
    %22 = vector.load %arg1[%c256, %c0_16] : memref<384x128xbf16, #tpu.memory_space<vmem>>, vector<128x128xbf16>
    %c3 = arith.constant 3 : index
    %c0_17 = arith.constant 0 : index
    %c0_18 = arith.constant 0 : index
    %23 = vector.load %arg2[%c3, %c0_17, %c0_18] : memref<4x16x128xbf16, #tpu.memory_space<vmem>>, vector<1x16x128xbf16>
    %24 = vector.shape_cast %23 : vector<1x16x128xbf16> to vector<16x128xbf16>
    %cst_19 = arith.constant dense<0.000000e+00> : vector<16x128xf32>
    %25 = tpu.matmul %24, %22, %cst_19 {dimension_numbers = #tpu.dot_dimension_numbers<[1], [0], [0], [1], [0, 0, 1, 1], [], []>} : vector<16x128xbf16>, vector<128x128xbf16>, vector<16x128xf32> -> vector<16x128xf32>
    %cst_20 = arith.constant dense<0.000000e+00> : vector<16xf32>
    %26 = vector.multi_reduction <add>, %25, %cst_20 [1] : vector<16x128xf32> to vector<16xf32>
    %27 = vector.shape_cast %26 : vector<16xf32> to vector<16x1xf32>
    %28 = arith.addf %21, %27 : vector<16x1xf32>
    %cst_21 = arith.constant 5.120000e+02 : f32
    %29 = vector.broadcast %cst_21 : f32 to vector<16x1xf32>
    %30 = arith.divf %28, %29 : vector<16x1xf32>
    %cst_22 = arith.constant 0.000000e+00 : f32
    %31 = vector.broadcast %cst_22 : f32 to vector<16x1xf32>
    %32 = vector.broadcast %30 : vector<16x1xf32> to vector<16x128xf32>
    %33 = arith.subf %4, %32 : vector<16x128xf32>
    %34 = arith.mulf %33, %33 : vector<16x128xf32>
    %cst_23 = arith.constant dense<0.000000e+00> : vector<16xf32>
    %35 = vector.multi_reduction <add>, %34, %cst_23 [1] : vector<16x128xf32> to vector<16xf32>
    %36 = vector.shape_cast %35 : vector<16xf32> to vector<16x1xf32>
    %37 = arith.addf %31, %36 : vector<16x1xf32>
    %38 = vector.broadcast %30 : vector<16x1xf32> to vector<16x128xf32>
    %39 = arith.subf %11, %38 : vector<16x128xf32>
    %40 = arith.mulf %39, %39 : vector<16x128xf32>
    %cst_24 = arith.constant dense<0.000000e+00> : vector<16xf32>
    %41 = vector.multi_reduction <add>, %40, %cst_24 [1] : vector<16x128xf32> to vector<16xf32>
    %42 = vector.shape_cast %41 : vector<16xf32> to vector<16x1xf32>
    %43 = arith.addf %37, %42 : vector<16x1xf32>
    %44 = vector.broadcast %30 : vector<16x1xf32> to vector<16x128xf32>
    %45 = arith.subf %18, %44 : vector<16x128xf32>
    %46 = arith.mulf %45, %45 : vector<16x128xf32>
    %cst_25 = arith.constant dense<0.000000e+00> : vector<16xf32>
    %47 = vector.multi_reduction <add>, %46, %cst_25 [1] : vector<16x128xf32> to vector<16xf32>
    %48 = vector.shape_cast %47 : vector<16xf32> to vector<16x1xf32>
    %49 = arith.addf %43, %48 : vector<16x1xf32>
    %50 = vector.broadcast %30 : vector<16x1xf32> to vector<16x128xf32>
    %51 = arith.subf %25, %50 : vector<16x128xf32>
    %52 = arith.mulf %51, %51 : vector<16x128xf32>
    %cst_26 = arith.constant dense<0.000000e+00> : vector<16xf32>
    %53 = vector.multi_reduction <add>, %52, %cst_26 [1] : vector<16x128xf32> to vector<16xf32>
    %54 = vector.shape_cast %53 : vector<16xf32> to vector<16x1xf32>
    %55 = arith.addf %49, %54 : vector<16x1xf32>
    %c0_27 = arith.constant 0 : index
    %c0_28 = arith.constant 0 : index
    %56 = vector.load %arg3[%c0_27, %c0_28] : memref<16x1xf32, #tpu.memory_space<vmem>>, vector<16x1xf32>
    %cst_29 = arith.constant 5.120000e+02 : f32
    %57 = vector.broadcast %cst_29 : f32 to vector<16x1xf32>
    %58 = arith.divf %55, %57 : vector<16x1xf32>
    %cst_30 = arith.constant 9.99999974E-6 : f32
    %59 = vector.broadcast %cst_30 : f32 to vector<16x1xf32>
    %60 = arith.addf %58, %59 : vector<16x1xf32>
    %61 = math.rsqrt %60 : vector<16x1xf32>
    %62 = arith.mulf %56, %61 : vector<16x1xf32>
    %c0_31 = arith.constant 0 : index
    %c0_32 = arith.constant 0 : index
    %63 = vector.load %arg4[%c0_31, %c0_32] : memref<16x1xf32, #tpu.memory_space<vmem>>, vector<16x1xf32>
    %64 = arith.mulf %30, %62 : vector<16x1xf32>
    %65 = arith.subf %63, %64 : vector<16x1xf32>
    %66 = vector.broadcast %62 : vector<16x1xf32> to vector<16x128xf32>
    %67 = arith.mulf %4, %66 : vector<16x128xf32>
    %68 = vector.broadcast %65 : vector<16x1xf32> to vector<16x128xf32>
    %69 = arith.addf %67, %68 : vector<16x128xf32>
    %cst_33 = arith.constant 0.000000e+00 : f32
    %70 = vector.broadcast %cst_33 : f32 to vector<16x128xf32>
    %71 = arith.maximumf %69, %70 : vector<16x128xf32>
    %72 = arith.truncf %71 : vector<16x128xf32> to vector<16x128xbf16>
    %c0_34 = arith.constant 0 : index
    %c0_35 = arith.constant 0 : index
    %c0_36 = arith.constant 0 : index
    %73 = vector.load %arg5[%c0_34, %c0_35, %c0_36] : memref<4x16x128xbf16, #tpu.memory_space<vmem>>, vector<1x16x128xbf16>
    %74 = vector.shape_cast %73 : vector<1x16x128xbf16> to vector<16x128xbf16>
    %75 = vector.shape_cast %72 : vector<16x128xbf16> to vector<1x16x128xbf16>
    tpu.vector_store %arg5[%c0_34, %c0_35, %c0_36], %75 {strides = array<i32>} : memref<4x16x128xbf16, #tpu.memory_space<vmem>>, vector<1x16x128xbf16>,
    %76 = vector.broadcast %62 : vector<16x1xf32> to vector<16x128xf32>
    %77 = arith.mulf %11, %76 : vector<16x128xf32>
    %78 = vector.broadcast %65 : vector<16x1xf32> to vector<16x128xf32>
    %79 = arith.addf %77, %78 : vector<16x128xf32>
    %cst_37 = arith.constant 0.000000e+00 : f32
    %80 = vector.broadcast %cst_37 : f32 to vector<16x128xf32>
    %81 = arith.maximumf %79, %80 : vector<16x128xf32>
    %82 = arith.truncf %81 : vector<16x128xf32> to vector<16x128xbf16>
    %c1_38 = arith.constant 1 : index
    %c0_39 = arith.constant 0 : index
    %c0_40 = arith.constant 0 : index
    %83 = vector.load %arg5[%c1_38, %c0_39, %c0_40] : memref<4x16x128xbf16, #tpu.memory_space<vmem>>, vector<1x16x128xbf16>
    %84 = vector.shape_cast %83 : vector<1x16x128xbf16> to vector<16x128xbf16>
    %85 = vector.shape_cast %82 : vector<16x128xbf16> to vector<1x16x128xbf16>
    tpu.vector_store %arg5[%c1_38, %c0_39, %c0_40], %85 {strides = array<i32>} : memref<4x16x128xbf16, #tpu.memory_space<vmem>>, vector<1x16x128xbf16>,
    %86 = vector.broadcast %62 : vector<16x1xf32> to vector<16x128xf32>
    %87 = arith.mulf %18, %86 : vector<16x128xf32>
    %88 = vector.broadcast %65 : vector<16x1xf32> to vector<16x128xf32>
    %89 = arith.addf %87, %88 : vector<16x128xf32>
    %cst_41 = arith.constant 0.000000e+00 : f32
    %90 = vector.broadcast %cst_41 : f32 to vector<16x128xf32>
    %91 = arith.maximumf %89, %90 : vector<16x128xf32>
    %92 = arith.truncf %91 : vector<16x128xf32> to vector<16x128xbf16>
    %c2_42 = arith.constant 2 : index
    %c0_43 = arith.constant 0 : index
    %c0_44 = arith.constant 0 : index
    %93 = vector.load %arg5[%c2_42, %c0_43, %c0_44] : memref<4x16x128xbf16, #tpu.memory_space<vmem>>, vector<1x16x128xbf16>
    %94 = vector.shape_cast %93 : vector<1x16x128xbf16> to vector<16x128xbf16>
    %95 = vector.shape_cast %92 : vector<16x128xbf16> to vector<1x16x128xbf16>
    tpu.vector_store %arg5[%c2_42, %c0_43, %c0_44], %95 {strides = array<i32>} : memref<4x16x128xbf16, #tpu.memory_space<vmem>>, vector<1x16x128xbf16>,
    %96 = vector.broadcast %62 : vector<16x1xf32> to vector<16x128xf32>
    %97 = arith.mulf %25, %96 : vector<16x128xf32>
    %98 = vector.broadcast %65 : vector<16x1xf32> to vector<16x128xf32>
    %99 = arith.addf %97, %98 : vector<16x128xf32>
    %cst_45 = arith.constant 0.000000e+00 : f32
    %100 = vector.broadcast %cst_45 : f32 to vector<16x128xf32>
    %101 = arith.maximumf %99, %100 : vector<16x128xf32>
    %102 = arith.truncf %101 : vector<16x128xf32> to vector<16x128xbf16>
    %c3_46 = arith.constant 3 : index
    %c0_47 = arith.constant 0 : index
    %c0_48 = arith.constant 0 : index
    %103 = vector.load %arg5[%c3_46, %c0_47, %c0_48] : memref<4x16x128xbf16, #tpu.memory_space<vmem>>, vector<1x16x128xbf16>
    %104 = vector.shape_cast %103 : vector<1x16x128xbf16> to vector<16x128xbf16>
    %105 = vector.shape_cast %102 : vector<16x128xbf16> to vector<1x16x128xbf16>
    tpu.vector_store %arg5[%c3_46, %c0_47, %c0_48], %105 {strides = array<i32>} : memref<4x16x128xbf16, #tpu.memory_space<vmem>>, vector<1x16x128xbf16>,
    return
  }
  func.func @transform_0(%arg0: i32) -> (i32, i32) {
    %c0_i32 = arith.constant 0 : i32
    %c0_i32_0 = arith.constant 0 : i32
    %c0_i32_1 = arith.constant 0 : i32
    return %c0_i32, %c0_i32_0 : i32, i32
  }
  func.func @transform_1(%arg0: i32) -> (i32, i32, i32) {
    %c0_i32 = arith.constant 0 : i32
    %c0_i32_0 = arith.constant 0 : i32
    %c0_i32_1 = arith.constant 0 : i32
    %c0_i32_2 = arith.constant 0 : i32
    return %c0_i32, %c0_i32_0, %c0_i32_1 : i32, i32, i32
  }
  func.func @transform_2(%arg0: i32) -> (i32, i32) {
    %c0_i32 = arith.constant 0 : i32
    %c0_i32_0 = arith.constant 0 : i32
    %c0_i32_1 = arith.constant 0 : i32
    return %c0_i32, %c0_i32_0 : i32, i32
  }
  func.func @transform_3(%arg0: i32) -> (i32, i32) {
    %c0_i32 = arith.constant 0 : i32
    %c0_i32_0 = arith.constant 0 : i32
    %c0_i32_1 = arith.constant 0 : i32
    return %c0_i32, %c0_i32_0 : i32, i32
  }
  func.func @transform_4(%arg0: i32) -> (i32, i32, i32) {
    %c0_i32 = arith.constant 0 : i32
    %c0_i32_0 = arith.constant 0 : i32
    %c0_i32_1 = arith.constant 0 : i32
    %c0_i32_2 = arith.constant 0 : i32
    return %c0_i32, %c0_i32_0, %c0_i32_1 : i32, i32, i32
  }
}

module attributes {stable_mosaic.version = 11 : i64} {
  func.func @kernel(%arg0: i32, %arg1: memref<192x512xbf16, #tpu.memory_space<vmem>>, %arg2: memref<4x8x64xbf16, #tpu.memory_space<vmem>>, %arg3: memref<8x1xf32, #tpu.memory_space<vmem>>, %arg4: memref<8x1xf32, #tpu.memory_space<vmem>>, %arg5: memref<4x8x512xbf16, #tpu.memory_space<vmem>>) attributes {dimension_semantics = [#tpu.dimension_semantics<arbitrary>], iteration_bounds = array<i64: 1>, scalar_prefetch = 0 : i64, scratch_operands = 0 : i64, tpu.core_type = #tpu.core_type<tc>, window_params = [{pipeline_mode = #tpu.pipeline_mode<synchronous>, transform_indices = @transform_0, window_bounds = array<i64: 192, 512>}, {pipeline_mode = #tpu.pipeline_mode<synchronous>, transform_indices = @transform_1, window_bounds = array<i64: 4, 8, 64>}, {pipeline_mode = #tpu.pipeline_mode<synchronous>, transform_indices = @transform_2, window_bounds = array<i64: 8, 1>}, {pipeline_mode = #tpu.pipeline_mode<synchronous>, transform_indices = @transform_3, window_bounds = array<i64: 8, 1>}, {pipeline_mode = #tpu.pipeline_mode<synchronous>, transform_indices = @transform_4, window_bounds = array<i64: 4, 8, 512>}]} {
    %cst = arith.constant 0.000000e+00 : f32
    %0 = vector.broadcast %cst : f32 to vector<8x1xf32>
    %c0 = arith.constant 0 : index
    %c0_0 = arith.constant 0 : index
    %1 = vector.load %arg1[%c0, %c0_0] : memref<192x512xbf16, #tpu.memory_space<vmem>>, vector<64x512xbf16>
    %c0_1 = arith.constant 0 : index
    %c0_2 = arith.constant 0 : index
    %c0_3 = arith.constant 0 : index
    %2 = vector.load %arg2[%c0_1, %c0_2, %c0_3] : memref<4x8x64xbf16, #tpu.memory_space<vmem>>, vector<1x8x64xbf16>
    %3 = vector.shape_cast %2 : vector<1x8x64xbf16> to vector<8x64xbf16>
    %cst_4 = arith.constant dense<0.000000e+00> : vector<8x512xf32>
    %4 = tpu.matmul %3, %1, %cst_4 {dimension_numbers = #tpu.dot_dimension_numbers<[1], [0], [0], [1], [0, 0, 1, 1], [], []>} : vector<8x64xbf16>, vector<64x512xbf16>, vector<8x512xf32> -> vector<8x512xf32>
    %cst_5 = arith.constant dense<0.000000e+00> : vector<8xf32>
    %5 = vector.multi_reduction <add>, %4, %cst_5 [1] : vector<8x512xf32> to vector<8xf32>
    %6 = vector.shape_cast %5 : vector<8xf32> to vector<8x1xf32>
    %7 = arith.addf %0, %6 : vector<8x1xf32>
    %c32 = arith.constant 32 : index
    %c0_6 = arith.constant 0 : index
    %8 = vector.load %arg1[%c32, %c0_6] : memref<192x512xbf16, #tpu.memory_space<vmem>>, vector<64x512xbf16>
    %c1 = arith.constant 1 : index
    %c0_7 = arith.constant 0 : index
    %c0_8 = arith.constant 0 : index
    %9 = vector.load %arg2[%c1, %c0_7, %c0_8] : memref<4x8x64xbf16, #tpu.memory_space<vmem>>, vector<1x8x64xbf16>
    %10 = vector.shape_cast %9 : vector<1x8x64xbf16> to vector<8x64xbf16>
    %cst_9 = arith.constant dense<0.000000e+00> : vector<8x512xf32>
    %11 = tpu.matmul %10, %8, %cst_9 {dimension_numbers = #tpu.dot_dimension_numbers<[1], [0], [0], [1], [0, 0, 1, 1], [], []>} : vector<8x64xbf16>, vector<64x512xbf16>, vector<8x512xf32> -> vector<8x512xf32>
    %cst_10 = arith.constant dense<0.000000e+00> : vector<8xf32>
    %12 = vector.multi_reduction <add>, %11, %cst_10 [1] : vector<8x512xf32> to vector<8xf32>
    %13 = vector.shape_cast %12 : vector<8xf32> to vector<8x1xf32>
    %14 = arith.addf %7, %13 : vector<8x1xf32>
    %c96 = arith.constant 96 : index
    %c0_11 = arith.constant 0 : index
    %15 = vector.load %arg1[%c96, %c0_11] : memref<192x512xbf16, #tpu.memory_space<vmem>>, vector<64x512xbf16>
    %c2 = arith.constant 2 : index
    %c0_12 = arith.constant 0 : index
    %c0_13 = arith.constant 0 : index
    %16 = vector.load %arg2[%c2, %c0_12, %c0_13] : memref<4x8x64xbf16, #tpu.memory_space<vmem>>, vector<1x8x64xbf16>
    %17 = vector.shape_cast %16 : vector<1x8x64xbf16> to vector<8x64xbf16>
    %cst_14 = arith.constant dense<0.000000e+00> : vector<8x512xf32>
    %18 = tpu.matmul %17, %15, %cst_14 {dimension_numbers = #tpu.dot_dimension_numbers<[1], [0], [0], [1], [0, 0, 1, 1], [], []>} : vector<8x64xbf16>, vector<64x512xbf16>, vector<8x512xf32> -> vector<8x512xf32>
    %cst_15 = arith.constant dense<0.000000e+00> : vector<8xf32>
    %19 = vector.multi_reduction <add>, %18, %cst_15 [1] : vector<8x512xf32> to vector<8xf32>
    %20 = vector.shape_cast %19 : vector<8xf32> to vector<8x1xf32>
    %21 = arith.addf %14, %20 : vector<8x1xf32>
    %c128 = arith.constant 128 : index
    %c0_16 = arith.constant 0 : index
    %22 = vector.load %arg1[%c128, %c0_16] : memref<192x512xbf16, #tpu.memory_space<vmem>>, vector<64x512xbf16>
    %c3 = arith.constant 3 : index
    %c0_17 = arith.constant 0 : index
    %c0_18 = arith.constant 0 : index
    %23 = vector.load %arg2[%c3, %c0_17, %c0_18] : memref<4x8x64xbf16, #tpu.memory_space<vmem>>, vector<1x8x64xbf16>
    %24 = vector.shape_cast %23 : vector<1x8x64xbf16> to vector<8x64xbf16>
    %cst_19 = arith.constant dense<0.000000e+00> : vector<8x512xf32>
    %25 = tpu.matmul %24, %22, %cst_19 {dimension_numbers = #tpu.dot_dimension_numbers<[1], [0], [0], [1], [0, 0, 1, 1], [], []>} : vector<8x64xbf16>, vector<64x512xbf16>, vector<8x512xf32> -> vector<8x512xf32>
    %cst_20 = arith.constant dense<0.000000e+00> : vector<8xf32>
    %26 = vector.multi_reduction <add>, %25, %cst_20 [1] : vector<8x512xf32> to vector<8xf32>
    %27 = vector.shape_cast %26 : vector<8xf32> to vector<8x1xf32>
    %28 = arith.addf %21, %27 : vector<8x1xf32>
    %cst_21 = arith.constant 2.048000e+03 : f32
    %29 = vector.broadcast %cst_21 : f32 to vector<8x1xf32>
    %30 = arith.divf %28, %29 : vector<8x1xf32>
    %cst_22 = arith.constant 0.000000e+00 : f32
    %31 = vector.broadcast %cst_22 : f32 to vector<8x1xf32>
    %32 = vector.broadcast %30 : vector<8x1xf32> to vector<8x512xf32>
    %33 = arith.subf %4, %32 : vector<8x512xf32>
    %34 = arith.mulf %33, %33 : vector<8x512xf32>
    %cst_23 = arith.constant dense<0.000000e+00> : vector<8xf32>
    %35 = vector.multi_reduction <add>, %34, %cst_23 [1] : vector<8x512xf32> to vector<8xf32>
    %36 = vector.shape_cast %35 : vector<8xf32> to vector<8x1xf32>
    %37 = arith.addf %31, %36 : vector<8x1xf32>
    %38 = vector.broadcast %30 : vector<8x1xf32> to vector<8x512xf32>
    %39 = arith.subf %11, %38 : vector<8x512xf32>
    %40 = arith.mulf %39, %39 : vector<8x512xf32>
    %cst_24 = arith.constant dense<0.000000e+00> : vector<8xf32>
    %41 = vector.multi_reduction <add>, %40, %cst_24 [1] : vector<8x512xf32> to vector<8xf32>
    %42 = vector.shape_cast %41 : vector<8xf32> to vector<8x1xf32>
    %43 = arith.addf %37, %42 : vector<8x1xf32>
    %44 = vector.broadcast %30 : vector<8x1xf32> to vector<8x512xf32>
    %45 = arith.subf %18, %44 : vector<8x512xf32>
    %46 = arith.mulf %45, %45 : vector<8x512xf32>
    %cst_25 = arith.constant dense<0.000000e+00> : vector<8xf32>
    %47 = vector.multi_reduction <add>, %46, %cst_25 [1] : vector<8x512xf32> to vector<8xf32>
    %48 = vector.shape_cast %47 : vector<8xf32> to vector<8x1xf32>
    %49 = arith.addf %43, %48 : vector<8x1xf32>
    %50 = vector.broadcast %30 : vector<8x1xf32> to vector<8x512xf32>
    %51 = arith.subf %25, %50 : vector<8x512xf32>
    %52 = arith.mulf %51, %51 : vector<8x512xf32>
    %cst_26 = arith.constant dense<0.000000e+00> : vector<8xf32>
    %53 = vector.multi_reduction <add>, %52, %cst_26 [1] : vector<8x512xf32> to vector<8xf32>
    %54 = vector.shape_cast %53 : vector<8xf32> to vector<8x1xf32>
    %55 = arith.addf %49, %54 : vector<8x1xf32>
    %c0_27 = arith.constant 0 : index
    %c0_28 = arith.constant 0 : index
    %56 = vector.load %arg3[%c0_27, %c0_28] : memref<8x1xf32, #tpu.memory_space<vmem>>, vector<8x1xf32>
    %cst_29 = arith.constant 2.048000e+03 : f32
    %57 = vector.broadcast %cst_29 : f32 to vector<8x1xf32>
    %58 = arith.divf %55, %57 : vector<8x1xf32>
    %cst_30 = arith.constant 9.99999974E-6 : f32
    %59 = vector.broadcast %cst_30 : f32 to vector<8x1xf32>
    %60 = arith.addf %58, %59 : vector<8x1xf32>
    %61 = math.rsqrt %60 : vector<8x1xf32>
    %62 = arith.mulf %56, %61 : vector<8x1xf32>
    %c0_31 = arith.constant 0 : index
    %c0_32 = arith.constant 0 : index
    %63 = vector.load %arg4[%c0_31, %c0_32] : memref<8x1xf32, #tpu.memory_space<vmem>>, vector<8x1xf32>
    %64 = arith.mulf %30, %62 : vector<8x1xf32>
    %65 = arith.subf %63, %64 : vector<8x1xf32>
    %66 = vector.broadcast %62 : vector<8x1xf32> to vector<8x512xf32>
    %67 = arith.mulf %4, %66 : vector<8x512xf32>
    %68 = vector.broadcast %65 : vector<8x1xf32> to vector<8x512xf32>
    %69 = arith.addf %67, %68 : vector<8x512xf32>
    %cst_33 = arith.constant 0.000000e+00 : f32
    %70 = vector.broadcast %cst_33 : f32 to vector<8x512xf32>
    %71 = arith.maximumf %69, %70 : vector<8x512xf32>
    %72 = arith.truncf %71 : vector<8x512xf32> to vector<8x512xbf16>
    %c0_34 = arith.constant 0 : index
    %c0_35 = arith.constant 0 : index
    %c0_36 = arith.constant 0 : index
    %73 = vector.load %arg5[%c0_34, %c0_35, %c0_36] : memref<4x8x512xbf16, #tpu.memory_space<vmem>>, vector<1x8x512xbf16>
    %74 = vector.shape_cast %73 : vector<1x8x512xbf16> to vector<8x512xbf16>
    %75 = vector.shape_cast %72 : vector<8x512xbf16> to vector<1x8x512xbf16>
    tpu.vector_store %arg5[%c0_34, %c0_35, %c0_36], %75 {strides = array<i32>} : memref<4x8x512xbf16, #tpu.memory_space<vmem>>, vector<1x8x512xbf16>,
    %76 = vector.broadcast %62 : vector<8x1xf32> to vector<8x512xf32>
    %77 = arith.mulf %11, %76 : vector<8x512xf32>
    %78 = vector.broadcast %65 : vector<8x1xf32> to vector<8x512xf32>
    %79 = arith.addf %77, %78 : vector<8x512xf32>
    %cst_37 = arith.constant 0.000000e+00 : f32
    %80 = vector.broadcast %cst_37 : f32 to vector<8x512xf32>
    %81 = arith.maximumf %79, %80 : vector<8x512xf32>
    %82 = arith.truncf %81 : vector<8x512xf32> to vector<8x512xbf16>
    %c1_38 = arith.constant 1 : index
    %c0_39 = arith.constant 0 : index
    %c0_40 = arith.constant 0 : index
    %83 = vector.load %arg5[%c1_38, %c0_39, %c0_40] : memref<4x8x512xbf16, #tpu.memory_space<vmem>>, vector<1x8x512xbf16>
    %84 = vector.shape_cast %83 : vector<1x8x512xbf16> to vector<8x512xbf16>
    %85 = vector.shape_cast %82 : vector<8x512xbf16> to vector<1x8x512xbf16>
    tpu.vector_store %arg5[%c1_38, %c0_39, %c0_40], %85 {strides = array<i32>} : memref<4x8x512xbf16, #tpu.memory_space<vmem>>, vector<1x8x512xbf16>,
    %86 = vector.broadcast %62 : vector<8x1xf32> to vector<8x512xf32>
    %87 = arith.mulf %18, %86 : vector<8x512xf32>
    %88 = vector.broadcast %65 : vector<8x1xf32> to vector<8x512xf32>
    %89 = arith.addf %87, %88 : vector<8x512xf32>
    %cst_41 = arith.constant 0.000000e+00 : f32
    %90 = vector.broadcast %cst_41 : f32 to vector<8x512xf32>
    %91 = arith.maximumf %89, %90 : vector<8x512xf32>
    %92 = arith.truncf %91 : vector<8x512xf32> to vector<8x512xbf16>
    %c2_42 = arith.constant 2 : index
    %c0_43 = arith.constant 0 : index
    %c0_44 = arith.constant 0 : index
    %93 = vector.load %arg5[%c2_42, %c0_43, %c0_44] : memref<4x8x512xbf16, #tpu.memory_space<vmem>>, vector<1x8x512xbf16>
    %94 = vector.shape_cast %93 : vector<1x8x512xbf16> to vector<8x512xbf16>
    %95 = vector.shape_cast %92 : vector<8x512xbf16> to vector<1x8x512xbf16>
    tpu.vector_store %arg5[%c2_42, %c0_43, %c0_44], %95 {strides = array<i32>} : memref<4x8x512xbf16, #tpu.memory_space<vmem>>, vector<1x8x512xbf16>,
    %96 = vector.broadcast %62 : vector<8x1xf32> to vector<8x512xf32>
    %97 = arith.mulf %25, %96 : vector<8x512xf32>
    %98 = vector.broadcast %65 : vector<8x1xf32> to vector<8x512xf32>
    %99 = arith.addf %97, %98 : vector<8x512xf32>
    %cst_45 = arith.constant 0.000000e+00 : f32
    %100 = vector.broadcast %cst_45 : f32 to vector<8x512xf32>
    %101 = arith.maximumf %99, %100 : vector<8x512xf32>
    %102 = arith.truncf %101 : vector<8x512xf32> to vector<8x512xbf16>
    %c3_46 = arith.constant 3 : index
    %c0_47 = arith.constant 0 : index
    %c0_48 = arith.constant 0 : index
    %103 = vector.load %arg5[%c3_46, %c0_47, %c0_48] : memref<4x8x512xbf16, #tpu.memory_space<vmem>>, vector<1x8x512xbf16>
    %104 = vector.shape_cast %103 : vector<1x8x512xbf16> to vector<8x512xbf16>
    %105 = vector.shape_cast %102 : vector<8x512xbf16> to vector<1x8x512xbf16>
    tpu.vector_store %arg5[%c3_46, %c0_47, %c0_48], %105 {strides = array<i32>} : memref<4x8x512xbf16, #tpu.memory_space<vmem>>, vector<1x8x512xbf16>,
    return
  }
  func.func @transform_0(%arg0: i32) -> (i32, i32) {
    %c0_i32 = arith.constant 0 : i32
    %c0_i32_0 = arith.constant 0 : i32
    %c0_i32_1 = arith.constant 0 : i32
    return %c0_i32, %c0_i32_0 : i32, i32
  }
  func.func @transform_1(%arg0: i32) -> (i32, i32, i32) {
    %c0_i32 = arith.constant 0 : i32
    %c0_i32_0 = arith.constant 0 : i32
    %c0_i32_1 = arith.constant 0 : i32
    %c0_i32_2 = arith.constant 0 : i32
    return %c0_i32, %c0_i32_0, %c0_i32_1 : i32, i32, i32
  }
  func.func @transform_2(%arg0: i32) -> (i32, i32) {
    %c0_i32 = arith.constant 0 : i32
    %c0_i32_0 = arith.constant 0 : i32
    %c0_i32_1 = arith.constant 0 : i32
    return %c0_i32, %c0_i32_0 : i32, i32
  }
  func.func @transform_3(%arg0: i32) -> (i32, i32) {
    %c0_i32 = arith.constant 0 : i32
    %c0_i32_0 = arith.constant 0 : i32
    %c0_i32_1 = arith.constant 0 : i32
    return %c0_i32, %c0_i32_0 : i32, i32
  }
  func.func @transform_4(%arg0: i32) -> (i32, i32, i32) {
    %c0_i32 = arith.constant 0 : i32
    %c0_i32_0 = arith.constant 0 : i32
    %c0_i32_1 = arith.constant 0 : i32
    %c0_i32_2 = arith.constant 0 : i32
    return %c0_i32, %c0_i32_0, %c0_i32_1 : i32, i32, i32
  }
}

module attributes {stable_mosaic.version = 11 : i64} {
  func.func @kernel(%arg0: i32, %arg1: memref<96x2048xbf16, #tpu.memory_space<vmem>>, %arg2: memref<4x3x32xbf16, #tpu.memory_space<vmem>>, %arg3: memref<4x3x2048xf32, #tpu.memory_space<vmem>>) attributes {dimension_semantics = [#tpu.dimension_semantics<arbitrary>], iteration_bounds = array<i64: 1>, scalar_prefetch = 0 : i64, scratch_operands = 0 : i64, tpu.core_type = #tpu.core_type<tc>, window_params = [{pipeline_mode = #tpu.pipeline_mode<synchronous>, transform_indices = @transform_0, window_bounds = array<i64: 96, 2048>}, {pipeline_mode = #tpu.pipeline_mode<synchronous>, transform_indices = @transform_1, window_bounds = array<i64: 4, 3, 32>}, {pipeline_mode = #tpu.pipeline_mode<synchronous>, transform_indices = @transform_2, window_bounds = array<i64: 4, 3, 2048>}]} {
    %c0 = arith.constant 0 : index
    %c0_0 = arith.constant 0 : index
    %0 = vector.load %arg1[%c0, %c0_0] : memref<96x2048xbf16, #tpu.memory_space<vmem>>, vector<32x2048xbf16>
    %c0_1 = arith.constant 0 : index
    %c0_2 = arith.constant 0 : index
    %c0_3 = arith.constant 0 : index
    %1 = vector.load %arg2[%c0_1, %c0_2, %c0_3] : memref<4x3x32xbf16, #tpu.memory_space<vmem>>, vector<1x3x32xbf16>
    %2 = vector.shape_cast %1 : vector<1x3x32xbf16> to vector<3x32xbf16>
    %cst = arith.constant dense<0.000000e+00> : vector<3x2048xf32>
    %3 = tpu.matmul %2, %0, %cst {dimension_numbers = #tpu.dot_dimension_numbers<[1], [0], [0], [1], [0, 0, 1, 1], [], []>} : vector<3x32xbf16>, vector<32x2048xbf16>, vector<3x2048xf32> -> vector<3x2048xf32>
    %4 = math.tanh %3 : vector<3x2048xf32>
    %c0_4 = arith.constant 0 : index
    %c0_5 = arith.constant 0 : index
    %c0_6 = arith.constant 0 : index
    %5 = vector.load %arg3[%c0_4, %c0_5, %c0_6] : memref<4x3x2048xf32, #tpu.memory_space<vmem>>, vector<1x3x2048xf32>
    %6 = vector.shape_cast %5 : vector<1x3x2048xf32> to vector<3x2048xf32>
    %7 = vector.shape_cast %4 : vector<3x2048xf32> to vector<1x3x2048xf32>
    tpu.vector_store %arg3[%c0_4, %c0_5, %c0_6], %7 {strides = array<i32>} : memref<4x3x2048xf32, #tpu.memory_space<vmem>>, vector<1x3x2048xf32>,
    %c16 = arith.constant 16 : index
    %c0_7 = arith.constant 0 : index
    %8 = vector.load %arg1[%c16, %c0_7] : memref<96x2048xbf16, #tpu.memory_space<vmem>>, vector<32x2048xbf16>
    %c1 = arith.constant 1 : index
    %c0_8 = arith.constant 0 : index
    %c0_9 = arith.constant 0 : index
    %9 = vector.load %arg2[%c1, %c0_8, %c0_9] : memref<4x3x32xbf16, #tpu.memory_space<vmem>>, vector<1x3x32xbf16>
    %10 = vector.shape_cast %9 : vector<1x3x32xbf16> to vector<3x32xbf16>
    %cst_10 = arith.constant dense<0.000000e+00> : vector<3x2048xf32>
    %11 = tpu.matmul %10, %8, %cst_10 {dimension_numbers = #tpu.dot_dimension_numbers<[1], [0], [0], [1], [0, 0, 1, 1], [], []>} : vector<3x32xbf16>, vector<32x2048xbf16>, vector<3x2048xf32> -> vector<3x2048xf32>
    %12 = math.tanh %11 : vector<3x2048xf32>
    %c1_11 = arith.constant 1 : index
    %c0_12 = arith.constant 0 : index
    %c0_13 = arith.constant 0 : index
    %13 = vector.load %arg3[%c1_11, %c0_12, %c0_13] : memref<4x3x2048xf32, #tpu.memory_space<vmem>>, vector<1x3x2048xf32>
    %14 = vector.shape_cast %13 : vector<1x3x2048xf32> to vector<3x2048xf32>
    %15 = vector.shape_cast %12 : vector<3x2048xf32> to vector<1x3x2048xf32>
    tpu.vector_store %arg3[%c1_11, %c0_12, %c0_13], %15 {strides = array<i32>} : memref<4x3x2048xf32, #tpu.memory_space<vmem>>, vector<1x3x2048xf32>,
    %c48 = arith.constant 48 : index
    %c0_14 = arith.constant 0 : index
    %16 = vector.load %arg1[%c48, %c0_14] : memref<96x2048xbf16, #tpu.memory_space<vmem>>, vector<32x2048xbf16>
    %c2 = arith.constant 2 : index
    %c0_15 = arith.constant 0 : index
    %c0_16 = arith.constant 0 : index
    %17 = vector.load %arg2[%c2, %c0_15, %c0_16] : memref<4x3x32xbf16, #tpu.memory_space<vmem>>, vector<1x3x32xbf16>
    %18 = vector.shape_cast %17 : vector<1x3x32xbf16> to vector<3x32xbf16>
    %cst_17 = arith.constant dense<0.000000e+00> : vector<3x2048xf32>
    %19 = tpu.matmul %18, %16, %cst_17 {dimension_numbers = #tpu.dot_dimension_numbers<[1], [0], [0], [1], [0, 0, 1, 1], [], []>} : vector<3x32xbf16>, vector<32x2048xbf16>, vector<3x2048xf32> -> vector<3x2048xf32>
    %20 = math.tanh %19 : vector<3x2048xf32>
    %c2_18 = arith.constant 2 : index
    %c0_19 = arith.constant 0 : index
    %c0_20 = arith.constant 0 : index
    %21 = vector.load %arg3[%c2_18, %c0_19, %c0_20] : memref<4x3x2048xf32, #tpu.memory_space<vmem>>, vector<1x3x2048xf32>
    %22 = vector.shape_cast %21 : vector<1x3x2048xf32> to vector<3x2048xf32>
    %23 = vector.shape_cast %20 : vector<3x2048xf32> to vector<1x3x2048xf32>
    tpu.vector_store %arg3[%c2_18, %c0_19, %c0_20], %23 {strides = array<i32>} : memref<4x3x2048xf32, #tpu.memory_space<vmem>>, vector<1x3x2048xf32>,
    %c64 = arith.constant 64 : index
    %c0_21 = arith.constant 0 : index
    %24 = vector.load %arg1[%c64, %c0_21] : memref<96x2048xbf16, #tpu.memory_space<vmem>>, vector<32x2048xbf16>
    %c3 = arith.constant 3 : index
    %c0_22 = arith.constant 0 : index
    %c0_23 = arith.constant 0 : index
    %25 = vector.load %arg2[%c3, %c0_22, %c0_23] : memref<4x3x32xbf16, #tpu.memory_space<vmem>>, vector<1x3x32xbf16>
    %26 = vector.shape_cast %25 : vector<1x3x32xbf16> to vector<3x32xbf16>
    %cst_24 = arith.constant dense<0.000000e+00> : vector<3x2048xf32>
    %27 = tpu.matmul %26, %24, %cst_24 {dimension_numbers = #tpu.dot_dimension_numbers<[1], [0], [0], [1], [0, 0, 1, 1], [], []>} : vector<3x32xbf16>, vector<32x2048xbf16>, vector<3x2048xf32> -> vector<3x2048xf32>
    %28 = math.tanh %27 : vector<3x2048xf32>
    %c3_25 = arith.constant 3 : index
    %c0_26 = arith.constant 0 : index
    %c0_27 = arith.constant 0 : index
    %29 = vector.load %arg3[%c3_25, %c0_26, %c0_27] : memref<4x3x2048xf32, #tpu.memory_space<vmem>>, vector<1x3x2048xf32>
    %30 = vector.shape_cast %29 : vector<1x3x2048xf32> to vector<3x2048xf32>
    %31 = vector.shape_cast %28 : vector<3x2048xf32> to vector<1x3x2048xf32>
    tpu.vector_store %arg3[%c3_25, %c0_26, %c0_27], %31 {strides = array<i32>} : memref<4x3x2048xf32, #tpu.memory_space<vmem>>, vector<1x3x2048xf32>,
    return
  }
  func.func @transform_0(%arg0: i32) -> (i32, i32) {
    %c0_i32 = arith.constant 0 : i32
    %c0_i32_0 = arith.constant 0 : i32
    %c0_i32_1 = arith.constant 0 : i32
    return %c0_i32, %c0_i32_0 : i32, i32
  }
  func.func @transform_1(%arg0: i32) -> (i32, i32, i32) {
    %c0_i32 = arith.constant 0 : i32
    %c0_i32_0 = arith.constant 0 : i32
    %c0_i32_1 = arith.constant 0 : i32
    %c0_i32_2 = arith.constant 0 : i32
    return %c0_i32, %c0_i32_0, %c0_i32_1 : i32, i32, i32
  }
  func.func @transform_2(%arg0: i32) -> (i32, i32, i32) {
    %c0_i32 = arith.constant 0 : i32
    %c0_i32_0 = arith.constant 0 : i32
    %c0_i32_1 = arith.constant 0 : i32
    %c0_i32_2 = arith.constant 0 : i32
    return %c0_i32, %c0_i32_0, %c0_i32_1 : i32, i32, i32
  }
}

</mosaic_0001>

<bundles_post_ra>
// kernel: generator_forward.5
= control target key start
LH: loop header
LB: loop body
LE: loop exit
PB: predicated region body
PF: predicated region fallthrough
CT: control target
= control target key end

     0   :  { %13 = vsyncpa [#allocation5], 0  ;;  %s1778_s0 = inlined_call_operand.hbm [shape: f32[2,16], index: 0, kind: input, shape index: {}]   ;;  %s1779_s1 = inlined_call_operand.<no memory space> [shape: f32[1], index: 1, kind: input, shape index: {}]   ;;  %s1780_s2 = inlined_call_operand.hbm [shape: f32[16,16,64], index: 2, kind: input, shape index: {}]   ;;  %s1781_s3 = inlined_call_operand.hbm [shape: f32[1,64], index: 3, kind: input, shape index: {}]   ;;  %s1782_s4 = inlined_call_operand.hbm [shape: f32[1,64], index: 4, kind: input, shape index: {}]   ;;  %s1783_s5 = inlined_call_operand.hbm [shape: bf16[64,80], index: 5, kind: input, shape index: {}]   ;;  %s1784_s6 = inlined_call_operand.hbm [shape: f32[1,80], index: 6, kind: input, shape index: {}]   ;;  %s1785_s7 = inlined_call_operand.vmem [shape: bf16[2,16,64], index: 7, kind: output, shape index: {}]  }
   0x1   :  { %14 = vsyncpa [#allocation4], 0 }
   0x2   :  { %15 = vsyncpa [#allocation8], 0 }
   0x3   :  { %16 = vsyncpa [#allocation11], 0  ;;  %s1276_s24 = smov [#allocation7]   ;;  %s1277_s26 = smov [#allocation10]  }
   0x4   :  { %s45_s25 = sshll.u32 %s1276_s24, 4  ;;  %s64_s27 = sshll.u32 %s1277_s26, 4  ;;  %s46_s25 = int_to_ptr.vmem [resolvable:$true] %s45_s25  ;;  %s1330_s27 = int_to_ptr.vmem [resolvable:$true] %s64_s27 }
   0x5   :  { %s1148_s30 = scalar_lea.hbm %s1781_s3, 16 }
   0x6   :  { %p1149_p0 = scmp.ne.s32.totalorder %s1781_s3, %s1148_s30  ;;  %p1152_p1 = scmp.lt.u32.totalorder %s1148_s30, %s1781_s3 }
   0x8   :  { %p1154_p2 = pnand %p1152_p1, %p1149_p0 }
   0xa   :  { %1157 = shalt.err (!%p1154_p2)
}
   0xb   :  { %s1158_s12 = scalar_lea.vmem %s46_s25, 16  ;;  %s1162_s13 = scalar_lea.vmem %s46_s25, 32 }
   0xc   :  { %p1159_p3 = scmp.ne.s32.totalorder %s46_s25, %s1158_s12  ;;  %p1163_p4 = scmp.lt.s32.totalorder %s46_s25, %s46_s25 }
   0xd   :  { %p1164_p5 = scmp.lt.s32.totalorder %s1162_s13, %s1158_s12 }
   0xf   :  { %p1165_p6 = por %p1164_p5, %p1163_p4 }
  0x11   :  { %p1166_p7 = pnand %p1165_p6, %p1159_p3 }
  0x13   :  { %1169 = shalt.err (!%p1166_p7)
}
  0x14   :  { %48 = dma.hbm_to_vmem [thread:$0]  %s1781_s3, 16, %s46_s25, [#allocation8]  }
  0x15   :  { %s1170_s18 = scalar_lea.hbm %s1783_s5, 512 }
  0x16   :  { %p1171_p8 = scmp.ne.s32.totalorder %s1783_s5, %s1170_s18  ;;  %p1174_p9 = scmp.lt.u32.totalorder %s1170_s18, %s1783_s5 }
  0x18   :  { %p1176_p10 = pnand %p1174_p9, %p1171_p8 }
  0x1a   :  { %1179 = shalt.err (!%p1176_p10)
}
  0x1b   :  { %s1180_s23 = scalar_lea.vmem %s1330_s27, 512  ;;  %p1185_p12 = scmp.lt.s32.totalorder %s1330_s27, %s1330_s27 }
  0x1c   :  { %p1181_p11 = scmp.ne.s32.totalorder %s1330_s27, %s1180_s23  ;;  %p1186_p13 = scmp.lt.s32.totalorder %s1180_s23, %s1180_s23 }
  0x1e   :  { %p1187_p0 = por %p1186_p13, %p1185_p12 }
  0x20   :  { %p1188_p1 = pnand %p1187_p0, %p1181_p11 }
  0x22   :  { %1191 = shalt.err (!%p1188_p1)
}
  0x23   :  { %s1278_s3 = smov 64   ;;  %s1279_s24 = smov 4  }
  0x24   :  { %70 = dma.hbm_to_vmem [thread:$0]  %s1783_s5, 512, %s1330_s27, [#allocation11], %s1278_s3, %s1278_s3, %s1279_s24  }
  0x25   :  { %s1192_s30 = scalar_lea.hbm %s1778_s0, 32 }
  0x26   :  { %p1193_p2 = scmp.ne.s32.totalorder %s1778_s0, %s1192_s30  ;;  %p1196_p3 = scmp.lt.u32.totalorder %s1192_s30, %s1778_s0 }
  0x28   :  { %p1198_p4 = pnand %p1196_p3, %p1193_p2 }
  0x2a   :  { %1201 = shalt.err (!%p1198_p4)
}
  0x2b   :  { %s1280_s12 = smov [#allocation3]   ;;  %s1281_s5 = smov [#allocation6]  }
  0x2c   :  { %24 = dma.hbm_to_smem %s1778_s0, 32, %s1280_s12, [#allocation5]  }
  0x2d   :  { %s32_s27 = sshll.u32 %s1281_s5, 4  ;;  %s1202_s17 = scalar_lea.hbm %s1780_s2, 4096  ;;  %s33_s27 = int_to_ptr.vmem [resolvable:$true] %s32_s27 }
  0x2e   :  { %p1203_p5 = scmp.ne.s32.totalorder %s1780_s2, %s1202_s17  ;;  %p1206_p6 = scmp.lt.u32.totalorder %s1202_s17, %s1780_s2 }
  0x30   :  { %p1208_p7 = pnand %p1206_p6, %p1203_p5 }
  0x32   :  { %1211 = shalt.err (!%p1208_p7)
}
  0x33   :  { %s1212_s22 = scalar_lea.vmem %s33_s27, 4096  ;;  %p1217_p9 = scmp.lt.s32.totalorder %s33_s27, %s33_s27 }
  0x34   :  { %p1213_p8 = scmp.ne.s32.totalorder %s33_s27, %s1212_s22  ;;  %p1218_p10 = scmp.lt.s32.totalorder %s1212_s22, %s1212_s22 }
  0x36   :  { %p1219_p11 = por %p1218_p10, %p1217_p9 }
  0x38   :  { %p1220_p12 = pnand %p1219_p11, %p1213_p8 }
  0x3a   :  { %1223 = shalt.err (!%p1220_p12)
}
  0x3b   :  { %s1282_s0 = smov 128   ;;  %s1283_s23 = smov 8  }
  0x3c   :  { %38 = dma.hbm_to_vmem [thread:$0]  %s1780_s2, 4096, %s33_s27, [#allocation4], %s1282_s0, %s1282_s0, %s1283_s23  }
  0x3d   :  { %s1284_s25 = smov [#allocation9]   ;;  %s1285_s28 = smov [#allocation12]  }
  0x3e   :  { %s55_s26 = sshll.u32 %s1284_s25, 4  ;;  %s77_s29 = sshll.u32 %s1285_s28, 4  ;;  %s56_s26 = int_to_ptr.vmem [resolvable:$true] %s55_s26  ;;  %s78_s29 = int_to_ptr.vmem [resolvable:$true] %s77_s29 }
  0x3f   :  { %s1224_s9 = scalar_lea.hbm %s1782_s4, 16 }
  0x40   :  { %p1225_p13 = scmp.ne.s32.totalorder %s1782_s4, %s1224_s9  ;;  %p1228_p0 = scmp.lt.u32.totalorder %s1224_s9, %s1782_s4 }
  0x42   :  { %p1230_p1 = pnand %p1228_p0, %p1225_p13 }
  0x44   :  { %1233 = shalt.err (!%p1230_p1)
}
  0x45   :  { %s1234_s2 = scalar_lea.vmem %s56_s26, 16  ;;  %s1238_s14 = scalar_lea.vmem %s56_s26, 32 }
  0x46   :  { %p1235_p2 = scmp.ne.s32.totalorder %s56_s26, %s1234_s2  ;;  %p1239_p3 = scmp.lt.s32.totalorder %s56_s26, %s56_s26 }
  0x47   :  { %p1240_p4 = scmp.lt.s32.totalorder %s1238_s14, %s1234_s2 }
  0x49   :  { %p1241_p5 = por %p1240_p4, %p1239_p3 }
  0x4b   :  { %p1242_p6 = pnand %p1241_p5, %p1235_p2 }
  0x4d   :  { %1245 = shalt.err (!%p1242_p6)
}
  0x4e   :  { %58 = dma.hbm_to_vmem [thread:$0]  %s1782_s4, 16, %s56_s26, [#allocation8]  }
  0x4f   :  { %s1246_s17 = scalar_lea.hbm %s1784_s6, 16 }
  0x50   :  { %p1247_p7 = scmp.ne.s32.totalorder %s1784_s6, %s1246_s17  ;;  %p1250_p8 = scmp.lt.u32.totalorder %s1246_s17, %s1784_s6 }
  0x52   :  { %p1252_p9 = pnand %p1250_p8, %p1247_p7 }
  0x54   :  { %1255 = shalt.err (!%p1252_p9)
}
  0x55   :  { %s1256_s22 = scalar_lea.vmem %s78_s29, 16  ;;  %s1260_s0 = scalar_lea.vmem %s78_s29, 32 }
  0x56   :  { %p1257_p10 = scmp.ne.s32.totalorder %s78_s29, %s1256_s22  ;;  %p1261_p11 = scmp.lt.s32.totalorder %s78_s29, %s78_s29 }
  0x57   :  { %p1262_p12 = scmp.lt.s32.totalorder %s1260_s0, %s1256_s22 }
  0x59   :  { %p1263_p13 = por %p1262_p12, %p1261_p11 }
  0x5b   :  { %p1264_p0 = pnand %p1263_p13, %p1257_p10 }
  0x5d   :  { %1267 = shalt.err (!%p1264_p0)
}
  0x5e   :  { %80 = dma.hbm_to_vmem [thread:$0]  %s1784_s6, 16, %s78_s29, [#allocation11]  }
  0x5f   :  { %1268 = dma.done.wait [#allocation5], 32  }
  0x60   :  { %1269 = vsyncadd [#allocation5], 4294967264 }
  0x61   :  { %1270 = dma.done.wait [#allocation4], 4096  }
  0x62   :  { %1271 = vsyncadd [#allocation4], 4294963200 }
  0x63   :  { %1272 = dma.done.wait [#allocation8], 32  }
  0x64   :  { %1273 = vsyncadd [#allocation8], 4294967264 }
  0x65   :  { %1274 = dma.done.wait [#allocation11], 528  }
  0x66   :  { %1275 = vsyncadd [#allocation11], 4294966768 }
  0x67   :  { %99 = sfence }
  0x68   :  { %v1122_v0 = vld [vmem:[#allocation10] sm:$0xff]   ;;  %v1286_v1 = vmov 0.0   ;;  %v1123_v2 = vld [vmem:[#allocation10 + $0x8] sm:$0xff]   ;;  %vm1287_vm0 = vmmov 0   ;;  %s101_s6 = sld [smem:[#allocation3]]  ;;  %s951_s3 = sld [smem:[#allocation3 + $0x1]] }
  0x69   :  { %1036 = vmatprep.subr.bf16.mxu0 %v1286_v1  ;;  %1044 = vmatprep.mubr.msk.bf16.mxu0 %vm1287_vm0, %v1286_v1  ;;  %s1413_s24 = sld [smem:[#allocation3 + $0x2]]  ;;  %v1124_v3 = vld [vmem:[#allocation10 + $0x10] sm:$0xff]   ;;  %s1415_s25 = sld [smem:[#allocation3 + $0x3]]  ;;  %v1418_v4 = vld [vmem:[#allocation6] sm:$0xff]  ;;  %v1424_v5 = vld [vmem:[#allocation6 + $0x8] sm:$0xff]  ;;  %vm336_vm1 = vcmask 523264  }
  0x6a   :  { %1037 = vmatpush3.bf16.msra.mxu0 %v1122_v0  ;;  %s1420_s26 = sld [smem:[#allocation3 + $0x4]]  ;;  %s1422_s28 = sld [smem:[#allocation3 + $0x5]]  ;;  %v1426_v6 = vld [vmem:[#allocation6 + $0x10] sm:$0xff]  ;;  %v1428_v7 = vld [vmem:[#allocation6 + $0x18] sm:$0xff]  ;;  %v1434_v11 = vld [vmem:[#allocation6 + $0x20] sm:$0xff]  ;;  %vm504_vm2 = vcmask 64512  }
  0x6b   :  { %1038 = vmatprep.subr.bf16.mxu0 %v1286_v1  ;;  %s1430_s29 = sld [smem:[#allocation3 + $0x6]]  ;;  %v1125_v8 = vld [vmem:[#allocation10 + $0x18] sm:$0xff]   ;;  %s1432_s30 = sld [smem:[#allocation3 + $0x7]]  ;;  %v1436_v12 = vld [vmem:[#allocation6 + $0x28] sm:$0xff]  ;;  %v1447_v17 = vld [vmem:[#allocation6 + $0x30] sm:$0xff]  ;;  %vm588_vm4 = vcmask 130048  }
  0x6c   :  { %s1438_s8 = sld [smem:[#allocation3 + $0x8]]  ;;  %s1440_s9 = sld [smem:[#allocation3 + $0x9]]  ;;  %v1449_v18 = vld [vmem:[#allocation6 + $0x38] sm:$0xff]  ;;  %v1453_v21 = vld [vmem:[#allocation6 + $0x40] sm:$0xff]  ;;  %v1455_v22 = vld [vmem:[#allocation6 + $0x48] sm:$0xff]  ;;  %vm674_vm5 = vcmask 519168  }
  0x6d   :  { %s1457_s10 = sld [smem:[#allocation3 + $0xa]]  ;;  %s1459_s11 = sld [smem:[#allocation3 + $0xb]]  ;;  %v1466_v30 = vld [vmem:[#allocation6 + $0x50] sm:$0xff]  ;;  %v1468_v31 = vld [vmem:[#allocation6 + $0x58] sm:$0xff]  ;;  %v1477_v37 = vld [vmem:[#allocation6 + $0x60] sm:$0xff] }
  0x6e   :  { %1039 = vmatpush3.bf16.msra.mxu0 %v1123_v2  ;;  %v104_v9 = vstv %s101_s6  ;;  %v111_v10 = vstv %s951_s3  ;;  %s1471_s12 = sld [smem:[#allocation3 + $0xc]]  ;;  %s1473_s13 = sld [smem:[#allocation3 + $0xd]]  ;;  %v1479_v38 = vld [vmem:[#allocation6 + $0x68] sm:$0xff]  ;;  %v1481_v39 = vld [vmem:[#allocation6 + $0x70] sm:$0xff]  ;;  %v1484_v41 = vld [vmem:[#allocation6 + $0x78] sm:$0xff] }
  0x6f   :  { %1040 = vmatprep.subr.bf16.mxu0 %v1286_v1  ;;  %v105_v13 = vmul.f32 %v104_v9, %v1418_v4  ;;  %v106_v14 = vmul.f32 %v104_v9, %v1424_v5  ;;  %v112_v15 = vmul.f32 %v111_v10, %v1426_v6  ;;  %v113_v16 = vmul.f32 %v111_v10, %v1428_v7  ;;  %v1487_v43 = vld [vmem:[#allocation6 + $0x80] sm:$0xff]  ;;  %v1489_v44 = vld [vmem:[#allocation6 + $0x88] sm:$0xff]  ;;  %s1491_s2 = sld [smem:[#allocation3 + $0xe]]  ;;  %v1495_v49 = vld [vmem:[#allocation6 + $0x90] sm:$0xff]  ;;  %s1501_s14 = sld [smem:[#allocation3 + $0xf]] }
  0x70   :  { %v120_v19 = vstv %s1413_s24  ;;  %v129_v20 = vstv %s1415_s25  ;;  %v138_v29 = vstv %s1420_s26  ;;  %v147_v32 = vstv %s1422_s28  ;;  %v1497_v50 = vld [vmem:[#allocation6 + $0x98] sm:$0xff]  ;;  %v1499_v51 = vld [vmem:[#allocation6 + $0xa0] sm:$0xff]  ;;  %v1506_v55 = vld [vmem:[#allocation6 + $0xa8] sm:$0xff]  ;;  %s1510_s5 = sld [smem:[#allocation3 + $0x80]]  ;;  %s1512_s27 = sld [smem:[#allocation3 + $0x81]] }
  0x71   :  { %v114_v23 = vadd.f32 %v112_v15, %v105_v13  ;;  %v115_v24 = vadd.f32 %v113_v16, %v106_v14  ;;  %v121_v25 = vmul.f32 %v120_v19, %v1434_v11  ;;  %v122_v26 = vmul.f32 %v120_v19, %v1436_v12  ;;  %v1508_v56 = vld [vmem:[#allocation6 + $0xb0] sm:$0xff]  ;;  %v1516_v61 = vld [vmem:[#allocation6 + $0xb8] sm:$0xff]  ;;  %v1518_v62 = vld [vmem:[#allocation6 + $0xc0] sm:$0xff]  ;;  %s1524_s15 = sld [smem:[#allocation3 + $0x82]]  ;;  %s1526_s16 = sld [smem:[#allocation3 + $0x83]] }
  0x72   :  { %1041 = vmatpush3.bf16.msra.mxu0 %v1124_v3  ;;  %v130_v27 = vmul.f32 %v129_v20, %v1447_v17  ;;  %v131_v28 = vmul.f32 %v129_v20, %v1449_v18  ;;  %v139_v35 = vmul.f32 %v138_v29, %v1453_v21  ;;  %v140_v36 = vmul.f32 %v138_v29, %v1455_v22  ;;  %v1530_v14 = vld [vmem:[#allocation6 + $0xc8] sm:$0xff]  ;;  %v1532_v15 = vld [vmem:[#allocation6 + $0xd0] sm:$0xff]  ;;  %s1544_s17 = sld [smem:[#allocation3 + $0x84]]  ;;  %s1546_s18 = sld [smem:[#allocation3 + $0x85]]  ;;  %vm1686_vm3 = vmpackc.low %vm504_vm2, %vm504_vm2 }
  0x73   :  { %1042 = vmatprep.subr.bf16.mxu0 %v1286_v1  ;;  %v123_v33 = vadd.f32 %v121_v25, %v114_v23  ;;  %v124_v34 = vadd.f32 %v122_v26, %v115_v24  ;;  %v156_v40 = vstv %s1430_s29  ;;  %v165_v42 = vstv %s1432_s30  ;;  %v1537_v23 = vld [vmem:[#allocation6 + $0xd8] sm:$0xff]  ;;  %v1540_v25 = vld [vmem:[#allocation6 + $0xe0] sm:$0xff]  ;;  %s1558_s19 = sld [smem:[#allocation3 + $0x86]]  ;;  %s1562_s20 = sld [smem:[#allocation3 + $0x87]] }
  0x74   :  { %v148_v47 = vmul.f32 %v147_v32, %v1466_v30  ;;  %v149_v48 = vmul.f32 %v147_v32, %v1468_v31  ;;  %v157_v52 = vmul.f32 %v156_v40, %v1477_v37  ;;  %v174_v53 = vstv %s1438_s8  ;;  %s1570_s21 = sld [smem:[#allocation3 + $0x88]]  ;;  %s1578_s22 = sld [smem:[#allocation3 + $0x89]] }
  0x75   :  { %v132_v45 = vadd.f32 %v130_v27, %v123_v33  ;;  %v133_v46 = vadd.f32 %v131_v28, %v124_v34  ;;  %v183_v54 = vstv %s1440_s9  ;;  %v158_v59 = vmul.f32 %v156_v40, %v1479_v38  ;;  %s1584_s0 = sld [smem:[#allocation3 + $0x8a]]  ;;  %s1594_s4 = sld [smem:[#allocation3 + $0x8b]] }
  0x76   :  { %1043 = vmatpush3.bf16.msra.mxu0 %v1125_v8  ;;  %v166_v60 = vmul.f32 %v165_v42, %v1481_v39  ;;  %v167_v63 = vmul.f32 %v165_v42, %v1484_v41  ;;  %v175_v0 = vmul.f32 %v174_v53, %v1487_v43  ;;  %v192_v2 = vstv %s1457_s10  ;;  %s1598_s23 = sld [smem:[#allocation3 + $0x8c]]  ;;  %s1606_s6 = sld [smem:[#allocation3 + $0x8d]] }
  0x77   :  { %v141_v57 = vadd.f32 %v139_v35, %v132_v45  ;;  %v142_v58 = vadd.f32 %v140_v36, %v133_v46  ;;  %v201_v3 = vstv %s1459_s11  ;;  %v176_v10 = vmul.f32 %v174_v53, %v1489_v44  ;;  %s1610_s3 = sld [smem:[#allocation3 + $0x8e]]  ;;  %s1620_s24 = sld [smem:[#allocation3 + $0x8f]] }
  0x78   :  { %v184_v13 = vmul.f32 %v183_v54, %v1495_v49  ;;  %v185_v16 = vmul.f32 %v183_v54, %v1497_v50  ;;  %v193_v19 = vmul.f32 %v192_v2, %v1499_v51  ;;  %v210_v20 = vstv %s1471_s12  ;;  %s1288_s25 = smov 120   ;;  %s1289_s26 = smov 112  }
  0x79   :  { %v150_v8 = vadd.f32 %v148_v47, %v141_v57  ;;  %v151_v9 = vadd.f32 %v149_v48, %v142_v58  ;;  %v219_v24 = vstv %s1473_s13  ;;  %v194_v28 = vmul.f32 %v192_v2, %v1506_v55 }
  0x7a   :  { %v202_v29 = vmul.f32 %v201_v3, %v1508_v56  ;;  %v203_v32 = vmul.f32 %v201_v3, %v1516_v61  ;;  %v211_v33 = vmul.f32 %v210_v20, %v1518_v62  ;;  %v212_v34 = vmul.f32 %v210_v20, %v1530_v14 }
  0x7b   :  { %v159_v26 = vadd.f32 %v157_v52, %v150_v8  ;;  %v160_v27 = vadd.f32 %v158_v59, %v151_v9  ;;  %v228_v35 = vstv %s1491_s2  ;;  %v220_v42 = vmul.f32 %v219_v24, %v1532_v15 }
  0x7c   :  { %v221_v45 = vmul.f32 %v219_v24, %v1537_v23  ;;  %v229_v46 = vmul.f32 %v228_v35, %v1540_v25  ;;  %v237_v47 = vstv %s1501_s14  ;;  %v243_v48 = vstv %s1510_s5 }
  0x7d   :  { %v168_v36 = vadd.f32 %v166_v60, %v159_v26  ;;  %v169_v40 = vadd.f32 %v167_v63, %v160_v27  ;;  %v247_v52 = vstv %s1512_s27  ;;  %v244_v57 = vmul.f32 %v243_v48, %v1418_v4  ;;  %v1572_v4 = vld [vmem:[#allocation6 + $0xe8] sm:$0xff] }
  0x7e   :  { %v245_v58 = vmul.f32 %v243_v48, %v1424_v5  ;;  %v248_v59 = vmul.f32 %v247_v52, %v1426_v6  ;;  %v249_v60 = vmul.f32 %v247_v52, %v1428_v7  ;;  %v253_v63 = vstv %s1524_s15 }
  0x7f   :  { %v177_v53 = vadd.f32 %v175_v0, %v168_v36  ;;  %v178_v54 = vadd.f32 %v176_v10, %v169_v40  ;;  %v259_v2 = vstv %s1526_s16  ;;  %v254_v9 = vmul.f32 %v253_v63, %v1434_v11  ;;  %v1580_v11 = vld [vmem:[#allocation6 + $0xf0] sm:$0xff]  ;;  %v1588_v40 = vld [vmem:[#allocation6 + $0xf8] sm:$0xff] }
  0x80   :  { %v255_v0 = vmul.f32 %v253_v63, %v1436_v12  ;;  %v250_v5 = vadd.f32 %v248_v59, %v244_v57  ;;  %v251_v10 = vadd.f32 %v249_v60, %v245_v58  ;;  %v260_v6 = vmul.f32 %v259_v2, %v1447_v17 }
  0x81   :  { %v186_v3 = vadd.f32 %v184_v13, %v177_v53  ;;  %v187_v8 = vadd.f32 %v185_v16, %v178_v54  ;;  %v261_v20 = vmul.f32 %v259_v2, %v1449_v18  ;;  %v265_v26 = vstv %s1544_s17 }
  0x82   :  { %v271_v27 = vstv %s1546_s18  ;;  %v256_v12 = vadd.f32 %v254_v9, %v250_v5  ;;  %v257_v13 = vadd.f32 %v255_v0, %v251_v10  ;;  %v266_v16 = vmul.f32 %v265_v26, %v1453_v21 }
  0x83   :  { %v195_v7 = vadd.f32 %v193_v19, %v186_v3  ;;  %v196_v24 = vadd.f32 %v194_v28, %v187_v8  ;;  %v267_v36 = vmul.f32 %v265_v26, %v1455_v22  ;;  %v230_v19 = vmul.f32 %v228_v35, %v1572_v4 }
  0x84   :  { %v272_v28 = vmul.f32 %v271_v27, %v1466_v30  ;;  %v262_v48 = vadd.f32 %v260_v6, %v256_v12  ;;  %v263_v52 = vadd.f32 %v261_v20, %v257_v13  ;;  %v273_v53 = vmul.f32 %v271_v27, %v1468_v31 }
  0x85   :  { %v204_v17 = vadd.f32 %v202_v29, %v195_v7  ;;  %v205_v18 = vadd.f32 %v203_v32, %v196_v24  ;;  %v277_v54 = vstv %s1558_s19  ;;  %v238_v22 = vmul.f32 %v237_v47, %v1580_v11 }
  0x86   :  { %v283_v58 = vstv %s1562_s20  ;;  %v268_v29 = vadd.f32 %v266_v16, %v262_v48  ;;  %v269_v32 = vadd.f32 %v267_v36, %v263_v52  ;;  %v278_v30 = vmul.f32 %v277_v54, %v1477_v37 }
  0x87   :  { %v213_v57 = vadd.f32 %v211_v33, %v204_v17  ;;  %v214_v21 = vadd.f32 %v212_v34, %v205_v18  ;;  %v279_v35 = vmul.f32 %v277_v54, %v1479_v38  ;;  %v239_v33 = vmul.f32 %v237_v47, %v1588_v40 }
  0x88   :  { %v289_v34 = vstv %s1570_s21  ;;  %v274_v60 = vadd.f32 %v272_v28, %v268_v29  ;;  %v275_v63 = vadd.f32 %v273_v53, %v269_v32  ;;  %v284_v2 = vmul.f32 %v283_v58, %v1481_v39 }
  0x89   :  { %v222_v59 = vadd.f32 %v220_v42, %v213_v57  ;;  %v223_v31 = vadd.f32 %v221_v45, %v214_v21  ;;  %v285_v3 = vmul.f32 %v283_v58, %v1484_v41  ;;  %v290_v37 = vmul.f32 %v289_v34, %v1487_v43 }
  0x8a   :  { %v295_v38 = vstv %s1578_s22  ;;  %v280_v42 = vadd.f32 %v278_v30, %v274_v60  ;;  %v281_v0 = vadd.f32 %v279_v35, %v275_v63  ;;  %v291_v45 = vmul.f32 %v289_v34, %v1489_v44 }
  0x8b   :  { %v231_v8 = vadd.f32 %v229_v46, %v222_v59  ;;  %v232_v9 = vadd.f32 %v230_v19, %v223_v31  ;;  %v301_v47 = vstv %s1584_s0  ;;  %v296_v41 = vmul.f32 %v295_v38, %v1495_v49 }
  0x8c   :  { %v286_v39 = vadd.f32 %v284_v2, %v280_v42  ;;  %v287_v5 = vadd.f32 %v285_v3, %v281_v0  ;;  %v297_v43 = vmul.f32 %v295_v38, %v1497_v50  ;;  %v302_v6 = vmul.f32 %v301_v47, %v1499_v51 }
  0x8d   :  { %v1614_v46 = vadd.f32 %v238_v22, %v231_v8  ;;  %v1616_v10 = vadd.f32 %v239_v33, %v232_v9  ;;  %v307_v20 = vstv %s1594_s4  ;;  %v303_v24 = vmul.f32 %v301_v47, %v1506_v55 }
  0x8e   :  { %v292_v44 = vadd.f32 %v290_v37, %v286_v39  ;;  %v293_v7 = vadd.f32 %v291_v45, %v287_v5  ;;  %v313_v26 = vstv %s1598_s23  ;;  %v308_v50 = vmul.f32 %v307_v20, %v1508_v56 }
  0x8f   :  { %v309_v12 = vmul.f32 %v307_v20, %v1516_v61  ;;  %v314_v13 = vmul.f32 %v313_v26, %v1518_v62  ;;  %v319_v16 = vstv %s1606_s6  ;;  %v337_v51 = vsel %vm336_vm1, %v1614_v46, 0.0 }
  0x90   :  { %v298_v27 = vadd.f32 %v296_v41, %v292_v44  ;;  %v299_v49 = vadd.f32 %v297_v43, %v293_v7  ;;  %v338_v36 = vsel %vm336_vm1, %v1616_v10, 0.0  ;;  %v315_v55 = vmul.f32 %v313_v26, %v1530_v14 }
  0x91   :  { %v339_v19 = vadd.f32 %v338_v36, %v337_v51  ;;  %v325_v28 = vstv %s1610_s3  ;;  %v320_v56 = vmul.f32 %v319_v16, %v1532_v15  ;;  %v321_v61 = vmul.f32 %v319_v16, %v1537_v23 }
  0x92   :  { %v304_v17 = vadd.f32 %v302_v6, %v298_v27  ;;  %v305_v18 = vadd.f32 %v303_v24, %v299_v49  ;;  %v331_v62 = vstv %s1620_s24  ;;  %v326_v21 = vmul.f32 %v325_v28, %v1540_v25 }
  0x93   :  { %v340_v53 = vrot.slane %v339_v19, 4  ;;  %v327_v22 = vmul.f32 %v325_v28, %v1572_v4  ;;  %v332_v14 = vmul.f32 %v331_v62, %v1580_v11  ;;  %v333_v32 = vmul.f32 %v331_v62, %v1588_v40  ;;  %v387_v62 = vld [vmem:[#allocation7] sm:$0x1] }
  0x94   :  { %v310_v48 = vadd.f32 %v308_v50, %v304_v17  ;;  %v311_v52 = vadd.f32 %v309_v12, %v305_v18 }
  0x95   :  { %v341_v30 = vadd.f32 %v340_v53, %v339_v19 }
  0x96   :  { %v316_v54 = vadd.f32 %v314_v13, %v310_v48  ;;  %v317_v57 = vadd.f32 %v315_v55, %v311_v52 }
  0x97   :  { %v342_v31 = vrot.slane %v341_v30, 2 }
  0x98   :  { %v322_v58 = vadd.f32 %v320_v56, %v316_v54  ;;  %v323_v29 = vadd.f32 %v321_v61, %v317_v57  ;;  %v397_v56 = vlaneseq }
  0x99   :  { %v343_v34 = vadd.f32 %v342_v31, %v341_v30 }
  0x9a   :  { %v328_v35 = vadd.f32 %v326_v21, %v322_v58  ;;  %v329_v59 = vadd.f32 %v327_v22, %v323_v29  ;;  %v398_v61 = vshrl.u32 %v397_v56, 7  ;;  %v392_v21 = vld [vmem:[#allocation9] sm:$0x1] }
  0x9b   :  { %v344_v63 = vrot.slane %v343_v34, 1  ;;  %v1129_v56 = vld [vmem:[#allocation10 + $0x18] sm:$0xff]  }
  0x9c   :  { %v1641_v15 = vadd.f32 %v332_v14, %v328_v35  ;;  %v1643_v23 = vadd.f32 %v333_v32, %v329_v59  ;;  %v399_v53 = vsub.s32 0, %v398_v61 }
  0x9d   :  { %v345_v3 = vadd.f32 %v344_v63, %v343_v34 }
  0x9e   :  { %v347_v33 = vsel %vm336_vm1, %v1641_v15, 0.0  ;;  %v348_v25 = vsel %vm336_vm1, %v1643_v23, 0.0 }
  0x9f   :  { %v349_v4 = vadd.f32 %v348_v25, %v347_v33 }
  0xa1   :  { %v350_v60 = vrot.slane %v349_v4, 4 }
  0xa3   :  { %v351_v11 = vadd.f32 %v350_v60, %v349_v4 }
  0xa5   :  { %v352_v40 = vrot.slane %v351_v11, 2 }
  0xa7   :  { %v353_v2 = vadd.f32 %v352_v40, %v351_v11 }
  0xa9   :  { %v354_v8 = vrot.slane %v353_v2, 1 }
  0xab   :  { %v355_v9 = vadd.f32 %v354_v8, %v353_v2 }
  0xad   :  { %v356_v37 = vadd.f32 %v355_v9, %v345_v3 }
  0xaf   :  { %v358_v38 = vmul.f32 0.03125, %v356_v37 }
  0xb1   :  { %v359_v42 = vsub.f32 %v1614_v46, %v358_v38  ;;  %v360_v0 = vsub.f32 %v1616_v10, %v358_v38  ;;  %v373_v45 = vsub.f32 %v1641_v15, %v358_v38  ;;  %v374_v47 = vsub.f32 %v1643_v23, %v358_v38 }
  0xb3   :  { %v361_v39 = vmul.f32 %v359_v42, %v359_v42  ;;  %v362_v5 = vmul.f32 %v360_v0, %v360_v0  ;;  %v375_v41 = vmul.f32 %v373_v45, %v373_v45  ;;  %v376_v43 = vmul.f32 %v374_v47, %v374_v47 }
  0xb5   :  { %v363_v6 = vsel %vm336_vm1, %v361_v39, 0.0  ;;  %v364_v20 = vsel %vm336_vm1, %v362_v5, 0.0  ;;  %v377_v44 = vsel %vm336_vm1, %v375_v41, 0.0  ;;  %v378_v7 = vsel %vm336_vm1, %v376_v43, 0.0 }
  0xb6   :  { %v365_v24 = vadd.f32 %v364_v20, %v363_v6  ;;  %v379_v26 = vadd.f32 %v378_v7, %v377_v44 }
  0xb8   :  { %v366_v27 = vrot.slane %v365_v24, 4  ;;  %v380_v49 = vrot.slane %v379_v26, 4 }
  0xba   :  { %v367_v50 = vadd.f32 %v366_v27, %v365_v24  ;;  %v381_v12 = vadd.f32 %v380_v49, %v379_v26 }
  0xbc   :  { %v368_v13 = vrot.slane %v367_v50, 2  ;;  %v382_v16 = vrot.slane %v381_v12, 2 }
  0xbe   :  { %v369_v51 = vadd.f32 %v368_v13, %v367_v50  ;;  %v383_v36 = vadd.f32 %v382_v16, %v381_v12 }
  0xc0   :  { %v370_v17 = vrot.slane %v369_v51, 1  ;;  %v384_v18 = vrot.slane %v383_v36, 1 }
  0xc2   :  { %v371_v55 = vadd.f32 %v370_v17, %v369_v51  ;;  %v385_v19 = vadd.f32 %v384_v18, %v383_v36  ;;  %v1126_v36 = vld [vmem:[#allocation10] sm:$0xff]  }
  0xc4   :  { %v386_v28 = vadd.f32 %v385_v19, %v371_v55  ;;  %v1127_v19 = vld [vmem:[#allocation10 + $0x8] sm:$0xff]  }
  0xc6   :  { %v388_v48 = vmul.f32 0.03125, %v386_v28 }
  0xc8   :  { %v389_v52 = vadd.f32 1e-05, %v388_v48 }
  0xca   :  { %1130 = vrsqrt.f32 %v389_v52  ;;  %v1128_v52 = vld [vmem:[#allocation10 + $0x10] sm:$0xff]  }
  0xd4   :  { %v1131_v54 = vpop.eup %1130 }
  0xd5   :  { %v391_v57 = vmul.f32 %v1131_v54, %v387_v62  ;;  %v1730_v62 = vstv %s1779_s1 }
  0xd7   :  { %v393_v22 = vmul.f32 %v391_v57, %v358_v38  ;;  %v1657_v58 = vrot.slane %v391_v57, %v399_v53 }
  0xd9   :  { %v394_v29 = vsub.f32 %v392_v21, %v393_v22  ;;  %v402_v14 = vmul.f32 %v1657_v58, %v1614_v46  ;;  %v403_v32 = vmul.f32 %v1657_v58, %v1616_v10  ;;  %v1678_v10 = vld [vmem:[#allocation12] ss:$0 sm:$0xff]  ;;  %v677_v18 = vmul.f32 %v1657_v58, %v1641_v15 }
  0xda   :  { %v678_v55 = vmul.f32 %v1657_v58, %v1643_v23 }
  0xdb   :  { %v1663_v30 = vrot.slane %v394_v29, %v399_v53 }
  0xdd   :  { %v1666_v35 = vadd.f32 %v1663_v30, %v402_v14  ;;  %v1669_v59 = vadd.f32 %v1663_v30, %v403_v32  ;;  %v1713_v28 = vadd.f32 %v677_v18, %v1663_v30  ;;  %v1716_v48 = vadd.f32 %v678_v55, %v1663_v30 }
  0xdf   :  { %v412_v31 = vmax.f32 %v1666_v35, 0.0  ;;  %v413_v33 = vmax.f32 %v1669_v59, 0.0  ;;  %v681_v15 = vmax.f32 %v1713_v28, 0.0  ;;  %v682_v23 = vmax.f32 %v1716_v48, 0.0 }
  0xe1   :  { %v414_v46 = vpack.c.bf16 %v413_v33, %v412_v31  ;;  %v683_v61 = vpack.c.bf16 %v682_v23, %v681_v15 }
  0xe3   :  { %1045 = vmatmul.mubr.msk.bf16.vlgmr.msra.gmra.mrb[0].mxu0 %vm336_vm1, %v414_v46 }
 0x1b6   :  { %v491_v25 = vpop.f32.mrb[0].mxu0 }
 0x1b7   :  { %v492_v4 = vadd.f32 %v1678_v10, %v491_v25  ;;  %v1046_v34 = vpop.f32.mrb[1].mxu0 }
 0x1b8   :  { %v494_v60 = vpop.f32.mrb[2].mxu0 }
 0x1b9   :  { %v495_v11 = vadd.f32 %v1678_v10, %v494_v60  ;;  %v1047_v63 = vpop.f32.mrb[3].mxu0  ;;  %1052 = vmatprep.mubr.msk.f32.mxu1 %vm504_vm2, %v492_v4 }
 0x1bb   :  { %v1112_v40 = vpack.i.bf16 %v495_v11, %v492_v4  ;;  %v612_v26 = vpack.c.bf16 %v495_v11, %v492_v4 }
 0x1bd   :  { %1113 = vrot.lane.b32.xlu0 %v1112_v40, %s1288_s25 }
 0x22f   :  { %v1114_v2 = vpop.permute.xlu0 %1113 }
 0x230   :  { %v1116_v3 = vunpack.i.h.bf16 %v1114_v2  ;;  %v1115_v8 = vunpack.i.l.bf16 %v1114_v2 }
 0x232   :  { %v1086_v37 = vpack.c.bf16 %v1116_v3, %v1115_v8 }
 0x234   :  { %1088 = vmatprep.subr.msk.bf16.mxu1 %vm1686_vm3, %v1086_v37 }
 0x235   :  { %1091 = vmatpush3.bf16.xpose.msk.msra.mxu1 %vm1686_vm3, %v1086_v37 }
 0x236   :  { %1055 = vmatprep.subr.bf16.mxu1 %v1286_v1 }
 0x23c   :  { %1053 = vmatmul.mubr.msk.f32.vlgmr.msra.gmra.mrb[0].mxu1 %vm504_vm2, %v495_v11 }
 0x23d   :  { %1057 = vmatprep.mubr.msk.bf16.mxu1 %vm1287_vm0, %v1286_v1 }
 0x30f   :  { %v1054_v38 = vpop.f32.mrb[0].mxu1 }
 0x310   :  { %v579_v42 = vpop.f32.mrb[1].mxu1  ;;  %v592_v0 = vsel %vm588_vm4, %v1054_v38, -inf }
 0x311   :  { %593 = vmax.xlane.f32.xlu1 %v592_v0  ;;  %v589_v45 = vsel %vm588_vm4, %v579_v42, -inf }
 0x312   :  { %590 = vmax.xlane.f32.xlu0 %v589_v45 }
 0x39e   :  { %v594_v47 = vpop.xlane.xlu1 %593 }
 0x39f   :  { %v596_v39 = vsub.f32 %v1054_v38, %v594_v47  ;;  %v591_v5 = vpop.xlane.xlu0 %590 }
 0x3a0   :  { %v595_v41 = vsub.f32 %v579_v42, %v591_v5 }
 0x3a1   :  { %v599_v43 = vmul.f32 1.442695, %v596_v39 }
 0x3a2   :  { %v597_v6 = vmul.f32 1.442695, %v595_v41 }
 0x3a3   :  { %1132 = vpow2.f32 %v599_v43 }
 0x3a4   :  { %1134 = vpow2.f32 %v597_v6 }
 0x3ad   :  { %v1133_v20 = vpop.eup %1132 }
 0x3ae   :  { %v604_v44 = vsel %vm588_vm4, %v1133_v20, 0.0  ;;  %v1135_v7 = vpop.eup %1134 }
 0x3af   :  { %605 = vadd.xlane.f32.xlu1 %v604_v44  ;;  %v601_v24 = vsel %vm588_vm4, %v1135_v7, 0.0 }
 0x3b3   :  { %602 = vadd.xlane.f32.xlu1 %v601_v24 }
 0x3c4   :  { %614 = vrot.lane.b32.xlu1 %v612_v26, %s1289_s26 }
 0x43c   :  { %v606_v27 = vpop.xlane.xlu1 %605 }
 0x43d   :  { %1136 = vrcp.f32 %v606_v27 }
 0x440   :  { %v603_v49 = vpop.xlane.xlu1 %602 }
 0x441   :  { %1138 = vrcp.f32 %v603_v49 }
 0x444   :  { %v615_v50 = vpop.permute.xlu1 %614 }
 0x445   :  { %1056 = vmatpush3.bf16.msra.mxu1 %v615_v50 }
 0x446   :  { %1061 = vmatprep.subr.bf16.mxu1 %v1286_v1 }
 0x447   :  { %v1137_v12 = vpop.eup %1136 }
 0x448   :  { %v610_v16 = vmul.f32 %v1137_v12, %v1133_v20 }
 0x44b   :  { %v1139_v13 = vpop.eup %1138 }
 0x44c   :  { %v608_v51 = vmul.f32 %v1139_v13, %v1135_v7 }
 0x44e   :  { %v611_v17 = vpack.c.bf16 %v610_v16, %v608_v51 }
 0x450   :  { %1058 = vmatmul.mubr.msk.bf16.vlgmr.msra.gmra.mrb[4].mxu1 %vm588_vm4, %v611_v17 }
 0x451   :  { %1062 = vmatpush3.bf16.msra.mxu1 %v1126_v36  ;;  %1069 = vmatprep.mubr.msk.bf16.mxu1 %vm1287_vm0, %v1286_v1 }
 0x452   :  { %1063 = vmatprep.subr.bf16.mxu1 %v1286_v1 }
 0x455   :  { %1064 = vmatpush3.bf16.msra.mxu1 %v1127_v19 }
 0x456   :  { %1065 = vmatprep.subr.bf16.mxu1 %v1286_v1 }
 0x459   :  { %1066 = vmatpush3.bf16.msra.mxu1 %v1128_v52 }
 0x45a   :  { %1067 = vmatprep.subr.bf16.mxu1 %v1286_v1 }
 0x45d   :  { %1068 = vmatpush3.bf16.msra.mxu1 %v1129_v56 }
 0x460   :  { %1070 = vmatmul.mubr.msk.bf16.vlgmr.msra.gmra.mrb[8].mxu1 %vm336_vm1, %v683_v61 }
 0x523   :  { %v654_v53 = vpop.f32.mrb[4].mxu1 }
 0x524   :  { %v662_v54 = vmul.f32 %v1730_v62, %v654_v53  ;;  %v1059_v57 = vpop.f32.mrb[5].mxu1 }
 0x525   :  { %v657_v21 = vpop.f32.mrb[6].mxu1 }
 0x526   :  { %v664_v22 = vadd.f32 %v662_v54, %v412_v31  ;;  %v663_v58 = vmul.f32 %v1730_v62, %v657_v21  ;;  %v1060_v29 = vpop.f32.mrb[7].mxu1 }
 0x528   :  { %v1010_v14 = vpack.c.bf16 %v664_v22, %v664_v22  ;;  %v665_v32 = vadd.f32 %v663_v58, %v413_v33 }
 0x52a   :  { %675 = vst.msk [vmem:[%s1785_s7] sm:$0xf] %vm674_vm5, %v1010_v14  ;;  %v1011_v30 = vpack.c.bf16 %v665_v32, %v665_v32 }
 0x52c   :  { %676 = vst.msk [vmem:[%s1785_s7 + $0x4] sm:$0xf] %vm674_vm5, %v1011_v30 }
 0x533   :  { %v760_v35 = vpop.f32.mrb[8].mxu1 }
 0x534   :  { %v761_v31 = vadd.f32 %v1678_v10, %v760_v35  ;;  %v1071_v46 = vpop.f32.mrb[9].mxu1 }
 0x535   :  { %v763_v25 = vpop.f32.mrb[10].mxu1 }
 0x536   :  { %v764_v4 = vadd.f32 %v1678_v10, %v763_v25  ;;  %v1072_v59 = vpop.f32.mrb[11].mxu1  ;;  %1077 = vmatprep.mubr.msk.f32.mxu0 %vm504_vm2, %v761_v31 }
 0x538   :  { %v1117_v33 = vpack.i.bf16 %v764_v4, %v761_v31  ;;  %v879_v5 = vpack.c.bf16 %v764_v4, %v761_v31 }
 0x53a   :  { %1118 = vrot.lane.b32.xlu1 %v1117_v33, %s1288_s25 }
 0x5ac   :  { %v1119_v34 = vpop.permute.xlu1 %1118 }
 0x5ad   :  { %v1121_v60 = vunpack.i.h.bf16 %v1119_v34  ;;  %v1120_v11 = vunpack.i.l.bf16 %v1119_v34 }
 0x5af   :  { %v1092_v63 = vpack.c.bf16 %v1121_v60, %v1120_v11 }
 0x5b1   :  { %1094 = vmatprep.subr.msk.bf16.mxu0 %vm1686_vm3, %v1092_v63 }
 0x5b2   :  { %1097 = vmatpush3.bf16.xpose.msk.msra.mxu0 %vm1686_vm3, %v1092_v63 }
 0x5b3   :  { %1080 = vmatprep.subr.bf16.mxu0 %v1286_v1 }
 0x5b9   :  { %1078 = vmatmul.mubr.msk.f32.vlgmr.msra.gmra.mrb[4].mxu0 %vm504_vm2, %v764_v4 }
 0x5ba   :  { %1082 = vmatprep.mubr.msk.bf16.mxu0 %vm1287_vm0, %v1286_v1 }
 0x68c   :  { %v1079_v10 = vpop.f32.mrb[4].mxu0 }
 0x68d   :  { %v847_v40 = vpop.f32.mrb[5].mxu0  ;;  %v859_v2 = vsel %vm588_vm4, %v1079_v10, -inf }
 0x68e   :  { %860 = vmax.xlane.f32.xlu0 %v859_v2  ;;  %v856_v3 = vsel %vm588_vm4, %v847_v40, -inf }
 0x68f   :  { %857 = vmax.xlane.f32.xlu1 %v856_v3 }
 0x71b   :  { %v861_v8 = vpop.xlane.xlu0 %860 }
 0x71c   :  { %v863_v37 = vsub.f32 %v1079_v10, %v861_v8  ;;  %v858_v38 = vpop.xlane.xlu1 %857 }
 0x71d   :  { %v862_v9 = vsub.f32 %v847_v40, %v858_v38 }
 0x71e   :  { %v866_v42 = vmul.f32 1.442695, %v863_v37 }
 0x71f   :  { %v864_v0 = vmul.f32 1.442695, %v862_v9 }
 0x720   :  { %1140 = vpow2.f32 %v866_v42 }
 0x721   :  { %1142 = vpow2.f32 %v864_v0 }
 0x72a   :  { %v1141_v45 = vpop.eup %1140 }
 0x72b   :  { %v871_v47 = vsel %vm588_vm4, %v1141_v45, 0.0  ;;  %v1143_v1 = vpop.eup %1142 }
 0x72c   :  { %872 = vadd.xlane.f32.xlu0 %v871_v47  ;;  %v868_v39 = vsel %vm588_vm4, %v1143_v1, 0.0 }
 0x730   :  { %869 = vadd.xlane.f32.xlu0 %v868_v39 }
 0x746   :  { %881 = vrot.lane.b32.xlu0 %v879_v5, %s1289_s26 }
 0x7b9   :  { %v873_v41 = vpop.xlane.xlu0 %872 }
 0x7ba   :  { %1144 = vrcp.f32 %v873_v41 }
 0x7bd   :  { %v870_v43 = vpop.xlane.xlu0 %869 }
 0x7be   :  { %1146 = vrcp.f32 %v870_v43 }
 0x7c1   :  { %v882_v6 = vpop.permute.xlu0 %881 }
 0x7c2   :  { %1081 = vmatpush3.bf16.msra.mxu0 %v882_v6 }
 0x7c4   :  { %v1145_v20 = vpop.eup %1144 }
 0x7c5   :  { %v877_v7 = vmul.f32 %v1145_v20, %v1141_v45 }
 0x7c8   :  { %v1147_v44 = vpop.eup %1146 }
 0x7c9   :  { %v875_v24 = vmul.f32 %v1147_v44, %v1143_v1 }
 0x7cb   :  { %v878_v26 = vpack.c.bf16 %v877_v7, %v875_v24 }
 0x7cd   :  { %1083 = vmatmul.mubr.msk.bf16.vlgmr.msra.gmra.mrb[8].mxu0 %vm588_vm4, %v878_v26 }
 0x8a0   :  { %v921_v27 = vpop.f32.mrb[8].mxu0 }
 0x8a1   :  { %v928_v49 = vmul.f32 %v921_v27, %v1730_v62  ;;  %v1084_v50 = vpop.f32.mrb[9].mxu0 }
 0x8a2   :  { %v924_v12 = vpop.f32.mrb[10].mxu0 }
 0x8a3   :  { %v930_v13 = vadd.f32 %v928_v49, %v681_v15  ;;  %v929_v16 = vmul.f32 %v924_v12, %v1730_v62  ;;  %v1085_v51 = vpop.f32.mrb[11].mxu0 }
 0x8a5   :  { %v1012_v36 = vpack.c.bf16 %v930_v13, %v930_v13  ;;  %v931_v17 = vadd.f32 %v929_v16, %v682_v23 }
 0x8a7   :  { %1008 = vst.msk [vmem:[%s1785_s7 + $0x8] sm:$0xf] %vm674_vm5, %v1012_v36  ;;  %v1013_v18 = vpack.c.bf16 %v931_v17, %v931_v17 }
 0x8a9   :  { %1009 = vst.msk [vmem:[%s1785_s7 + $0xc] sm:$0xf] %vm674_vm5, %v1013_v18 }
 0x8aa   :  { %947 = vsyncpa [#allocation4], 1 }
 0x8ab   :  { %948 = vsyncpa [#allocation8], 1 }
 0x8ac   :  { %949 = vsyncpa [#allocation11], 1 }
 0x8ad   :  { %950 = vsyncpa [#allocation5], 1 }

// kernel: generator_forward.6
= control target key start
LH: loop header
LB: loop body
LE: loop exit
PB: predicated region body
PF: predicated region fallthrough
CT: control target
= control target key end

     0   :  { %9 = vsyncpa [#allocation3], 0  ;;  %s1576_s15 = smov [#allocation2]   ;;  %s2037_s0 = inlined_call_operand.vmem [shape: bf16[768,32], index: 0, kind: input, shape index: {}]   ;;  %s2038_s1 = inlined_call_operand.hbm [shape: bf16[4,32,256], index: 1, kind: input, shape index: {}]   ;;  %s2039_s2 = inlined_call_operand.vmem [shape: f32[32,1], index: 2, kind: input, shape index: {}]   ;;  %s2040_s3 = inlined_call_operand.vmem [shape: f32[32,1], index: 3, kind: input, shape index: {}]   ;;  %s2041_s4 = inlined_call_operand.vmem [shape: bf16[4,32,32], index: 4, kind: output, shape index: {}]  }
   0x1   :  { %s17_s16 = sshll.u32 %s1576_s15, 4  ;;  %s1552_s19 = scalar_lea.hbm %s2038_s1, 2048  ;;  %s18_s16 = int_to_ptr.vmem [resolvable:$true] %s17_s16 }
   0x2   :  { %p1553_p0 = scmp.ne.s32.totalorder %s2038_s1, %s1552_s19  ;;  %p1556_p1 = scmp.lt.u32.totalorder %s1552_s19, %s2038_s1 }
   0x4   :  { %p1558_p2 = pnand %p1556_p1, %p1553_p0 }
   0x6   :  { %1561 = shalt.err (!%p1558_p2)
}
   0x7   :  { %s1562_s24 = scalar_lea.vmem %s18_s16, 2048  ;;  %p1567_p4 = scmp.lt.s32.totalorder %s18_s16, %s18_s16 }
   0x8   :  { %p1563_p3 = scmp.ne.s32.totalorder %s18_s16, %s1562_s24  ;;  %p1568_p5 = scmp.lt.s32.totalorder %s1562_s24, %s1562_s24 }
   0xa   :  { %p1569_p6 = por %p1568_p5, %p1567_p4 }
   0xc   :  { %p1570_p7 = pnand %p1569_p6, %p1563_p3 }
   0xe   :  { %1573 = shalt.err (!%p1570_p7)
}
   0xf   :  { %s1577_s25 = smov 128   ;;  %s1578_s26 = smov 8  }
  0x10   :  { %23 = dma.hbm_to_vmem [thread:$0]  %s2038_s1, 2048, %s18_s16, [#allocation3], %s1577_s25, %s1577_s25, %s1578_s26  }
  0x11   :  { %1574 = dma.done.wait [#allocation3], 2048  }
  0x12   :  { %1575 = vsyncadd [#allocation3], 4294965248  ;;  %v1456_v0 = vld [vmem:[%s2037_s0 + $0x40] sm:$0xff]   ;;  %v1460_v4 = vld [vmem:[%s2037_s0 + $0x48] sm:$0xff]   ;;  %vm233_vm0 = vcmask 261120   ;;  %vm1105_vm1 = vcmask 257024  }
  0x13   :  { %v1457_v1 = vld [vmem:[%s2037_s0] sm:$0xff]   ;;  %1338 = vmatprep.subr.bf16.mxu0 %v1456_v0  ;;  %v1461_v5 = vld [vmem:[%s2037_s0 + $0x8] sm:$0xff]   ;;  %v1464_v8 = vld [vmem:[%s2037_s0 + $0x50] sm:$0xff]  }
  0x14   :  { %v1458_v2 = vld [vmem:[%s2037_s0 + $0x80] sm:$0xff]   ;;  %1339 = vmatpush3.bf16.msra.mxu0 %v1457_v1  ;;  %v1462_v6 = vld [vmem:[%s2037_s0 + $0x88] sm:$0xff]   ;;  %v1465_v9 = vld [vmem:[%s2037_s0 + $0x10] sm:$0xff]  }
  0x15   :  { %v1459_v3 = vld [vmem:[%s2037_s0 + $0x40] sm:$0xff]   ;;  %1366 = vmatprep.subr.bf16.mxu1 %v1458_v2  ;;  %1340 = vmatprep.subr.bf16.mxu0 %v1460_v4  ;;  %v1463_v7 = vld [vmem:[%s2037_s0 + $0x48] sm:$0xff]   ;;  %v1466_v10 = vld [vmem:[%s2037_s0 + $0x90] sm:$0xff]  }
  0x16   :  { %1367 = vmatpush3.bf16.msra.mxu1 %v1459_v3  ;;  %v1467_v11 = vld [vmem:[%s2037_s0 + $0x50] sm:$0xff]   ;;  %v1468_v12 = vld [vmem:[%s2037_s0 + $0x58] sm:$0xff]   ;;  %v1472_v16 = vld [vmem:[%s2037_s0 + $0x60] sm:$0xff]  }
  0x17   :  { %1368 = vmatprep.subr.bf16.mxu1 %v1462_v6  ;;  %v1469_v13 = vld [vmem:[%s2037_s0 + $0x18] sm:$0xff]   ;;  %v1473_v17 = vld [vmem:[%s2037_s0 + $0x20] sm:$0xff]   ;;  %v1476_v20 = vld [vmem:[%s2037_s0 + $0x68] sm:$0xff]  }
  0x18   :  { %1341 = vmatpush3.bf16.msra.mxu0 %v1461_v5  ;;  %v1470_v14 = vld [vmem:[%s2037_s0 + $0x98] sm:$0xff]   ;;  %v1474_v18 = vld [vmem:[%s2037_s0 + $0xa0] sm:$0xff]   ;;  %v1477_v21 = vld [vmem:[%s2037_s0 + $0x28] sm:$0xff]  }
  0x19   :  { %1342 = vmatprep.subr.bf16.mxu0 %v1464_v8  ;;  %v1471_v15 = vld [vmem:[%s2037_s0 + $0x58] sm:$0xff]   ;;  %v1475_v19 = vld [vmem:[%s2037_s0 + $0x60] sm:$0xff]   ;;  %v1478_v22 = vld [vmem:[%s2037_s0 + $0xa8] sm:$0xff]  }
  0x1a   :  { %1369 = vmatpush3.bf16.msra.mxu1 %v1463_v7  ;;  %v1479_v23 = vld [vmem:[%s2037_s0 + $0x68] sm:$0xff]   ;;  %v1480_v24 = vld [vmem:[%s2037_s0 + $0x70] sm:$0xff]   ;;  %v1484_v28 = vld [vmem:[%s2037_s0 + $0x78] sm:$0xff]  }
  0x1b   :  { %1370 = vmatprep.subr.bf16.mxu1 %v1466_v10  ;;  %v1481_v25 = vld [vmem:[%s2037_s0 + $0x30] sm:$0xff]   ;;  %v1485_v29 = vld [vmem:[%s2037_s0 + $0x38] sm:$0xff]   ;;  %v1488_v32 = vld [vmem:[#allocation2] ss:$8 sps:$4 sm:$0xff]  }
  0x1c   :  { %1343 = vmatpush3.bf16.msra.mxu0 %v1465_v9  ;;  %v1482_v26 = vld [vmem:[%s2037_s0 + $0xb0] sm:$0xff]   ;;  %v1486_v30 = vld [vmem:[%s2037_s0 + $0xb8] sm:$0xff]   ;;  %v1490_v33 = vld [vmem:[#allocation2 + $0x4] ss:$8 sps:$4 sm:$0xff]  }
  0x1d   :  { %1344 = vmatprep.subr.bf16.mxu0 %v1468_v12  ;;  %v1483_v27 = vld [vmem:[%s2037_s0 + $0x70] sm:$0xff]   ;;  %v1487_v31 = vld [vmem:[%s2037_s0 + $0x78] sm:$0xff]   ;;  %v1491_v34 = vld [vmem:[%s2037_s0 + $0x100] sm:$0xff]   ;;  %216 = vmatprep.mubr.bf16.mxu0 %v1490_v33 }
  0x1e   :  { %1371 = vmatpush3.bf16.msra.mxu1 %v1467_v11  ;;  %v1492_v35 = vld [vmem:[#allocation2 + $0x20] ss:$8 sps:$4 sm:$0xff]   ;;  %v1494_v36 = vld [vmem:[#allocation2 + $0x24] ss:$8 sps:$4 sm:$0xff]   ;;  %v1502_v44 = vld [vmem:[%s2037_s0 + $0x110] sm:$0xff]  }
  0x1f   :  { %1372 = vmatprep.subr.bf16.mxu1 %v1470_v14  ;;  %v1495_v37 = vld [vmem:[%s2037_s0 + $0xc0] sm:$0xff]   ;;  %435 = vmatprep.mubr.bf16.mxu1 %v1494_v36  ;;  %v1498_v40 = vld [vmem:[%s2037_s0 + $0x108] sm:$0xff]   ;;  %v1503_v45 = vld [vmem:[%s2037_s0 + $0xd0] sm:$0xff]  }
  0x20   :  { %1345 = vmatpush3.bf16.msra.mxu0 %v1469_v13  ;;  %v1496_v38 = vld [vmem:[%s2037_s0 + $0x140] sm:$0xff]   ;;  %v1499_v41 = vld [vmem:[%s2037_s0 + $0xc8] sm:$0xff]   ;;  %v1504_v46 = vld [vmem:[%s2037_s0 + $0x150] sm:$0xff]  }
  0x21   :  { %1346 = vmatprep.subr.bf16.mxu0 %v1472_v16  ;;  %v1497_v39 = vld [vmem:[%s2037_s0 + $0x100] sm:$0xff]   ;;  %v1500_v42 = vld [vmem:[%s2037_s0 + $0x148] sm:$0xff]   ;;  %v1505_v47 = vld [vmem:[%s2037_s0 + $0x110] sm:$0xff]  }
  0x22   :  { %1373 = vmatpush3.bf16.msra.mxu1 %v1471_v15  ;;  %v1501_v43 = vld [vmem:[%s2037_s0 + $0x108] sm:$0xff]   ;;  %v1506_v48 = vld [vmem:[%s2037_s0 + $0x118] sm:$0xff]   ;;  %v1513_v54 = vld [vmem:[%s2037_s0 + $0x120] sm:$0xff]  }
  0x23   :  { %1374 = vmatprep.subr.bf16.mxu1 %v1474_v18  ;;  %v1507_v49 = vld [vmem:[%s2037_s0 + $0xd8] sm:$0xff]   ;;  %v1514_v55 = vld [vmem:[%s2037_s0 + $0xe0] sm:$0xff]   ;;  %v1519_v59 = vld [vmem:[%s2037_s0 + $0x128] sm:$0xff]  }
  0x24   :  { %1347 = vmatpush3.bf16.msra.mxu0 %v1473_v17  ;;  %v1508_v50 = vld [vmem:[%s2037_s0 + $0x158] sm:$0xff]   ;;  %v1515_v56 = vld [vmem:[%s2037_s0 + $0x160] sm:$0xff]   ;;  %v1521_v61 = vld [vmem:[%s2037_s0 + $0xe8] sm:$0xff]  }
  0x25   :  { %1348 = vmatprep.subr.bf16.mxu0 %v1476_v20  ;;  %v1509_v51 = vld [vmem:[#allocation2 + $0x14] ss:$8 sps:$4 sm:$0xff]   ;;  %v1512_v53 = vld [vmem:[#allocation2 + $0x10] ss:$8 sps:$4 sm:$0xff]   ;;  %v1516_v57 = vld [vmem:[%s2037_s0 + $0x120] sm:$0xff]  }
  0x26   :  { %1375 = vmatpush3.bf16.msra.mxu1 %v1475_v19  ;;  %v1511_v52 = vld [vmem:[%s2037_s0 + $0x118] sm:$0xff]   ;;  %v1522_v62 = vld [vmem:[%s2037_s0 + $0x168] sm:$0xff]   ;;  %v1524_v0 = vld [vmem:[%s2037_s0 + $0x130] sm:$0xff]  }
  0x27   :  { %1376 = vmatprep.subr.bf16.mxu1 %v1478_v22  ;;  %v1517_v58 = vld [vmem:[#allocation2 + $0x34] ss:$8 sps:$4 sm:$0xff]   ;;  %v1520_v60 = vld [vmem:[#allocation2 + $0x30] ss:$8 sps:$4 sm:$0xff]   ;;  %v1523_v63 = vld [vmem:[%s2037_s0 + $0x128] sm:$0xff]  }
  0x28   :  { %1349 = vmatpush3.bf16.msra.mxu0 %v1477_v21  ;;  %v1525_v1 = vld [vmem:[%s2037_s0 + $0xf0] sm:$0xff]   ;;  %v1528_v4 = vld [vmem:[%s2037_s0 + $0x138] sm:$0xff]   ;;  %v1532_v8 = vld [vmem:[#allocation2 + $0x40] ss:$8 sps:$4 sm:$0xff]  }
  0x29   :  { %1350 = vmatprep.subr.bf16.mxu0 %v1480_v24  ;;  %v1526_v2 = vld [vmem:[%s2037_s0 + $0x170] sm:$0xff]   ;;  %v1529_v5 = vld [vmem:[%s2037_s0 + $0xf8] sm:$0xff]   ;;  %v1534_v9 = vld [vmem:[#allocation2 + $0x44] ss:$8 sps:$4 sm:$0xff]  }
  0x2a   :  { %1377 = vmatpush3.bf16.msra.mxu1 %v1479_v23  ;;  %v1527_v3 = vld [vmem:[%s2037_s0 + $0x130] sm:$0xff]   ;;  %v1530_v6 = vld [vmem:[%s2037_s0 + $0x178] sm:$0xff]   ;;  %v1535_v10 = vld [vmem:[#allocation2 + $0x60] ss:$8 sps:$4 sm:$0xff]  }
  0x2b   :  { %1378 = vmatprep.subr.bf16.mxu1 %v1482_v26  ;;  %v1531_v7 = vld [vmem:[%s2037_s0 + $0x138] sm:$0xff]   ;;  %v1537_v11 = vld [vmem:[#allocation2 + $0x64] ss:$8 sps:$4 sm:$0xff]  }
  0x2c   :  { %1351 = vmatpush3.bf16.msra.mxu0 %v1481_v25  ;;  %v1538_v12 = vld [vmem:[#allocation2 + $0x54] ss:$8 sps:$4 sm:$0xff]   ;;  %v1540_v14 = vld [vmem:[#allocation2 + $0x50] ss:$8 sps:$4 sm:$0xff]  }
  0x2d   :  { %1352 = vmatprep.subr.bf16.mxu0 %v1484_v28  ;;  %v1541_v13 = vld [vmem:[#allocation2 + $0x74] ss:$8 sps:$4 sm:$0xff]   ;;  %v1543_v15 = vld [vmem:[#allocation2 + $0x70] ss:$8 sps:$4 sm:$0xff]  }
  0x2e   :  { %1379 = vmatpush3.bf16.msra.mxu1 %v1483_v27 }
  0x2f   :  { %1380 = vmatprep.subr.bf16.mxu1 %v1486_v30 }
  0x30   :  { %1353 = vmatpush3.bf16.msra.mxu0 %v1485_v29 }
  0x31   :  { %1394 = vmatprep.subr.bf16.mxu0 %v1491_v34 }
  0x32   :  { %1381 = vmatpush3.bf16.msra.mxu1 %v1487_v31 }
  0x33   :  { %217 = vmatmul.mubr.bf16.vlgmr.msra.gmra.mrb[0].mxu0 %v1488_v32  ;;  %1422 = vmatprep.subr.bf16.mxu1 %v1496_v38 }
  0x34   :  { %1395 = vmatpush3.bf16.msra.mxu0 %v1495_v37  ;;  %224 = vmatprep.mubr.bf16.mxu0 %v1509_v51 }
  0x35   :  { %436 = vmatmul.mubr.bf16.vlgmr.msra.gmra.mrb[0].mxu1 %v1492_v35  ;;  %1396 = vmatprep.subr.bf16.mxu0 %v1498_v40 }
  0x36   :  { %1423 = vmatpush3.bf16.msra.mxu1 %v1497_v39  ;;  %443 = vmatprep.mubr.bf16.mxu1 %v1517_v58 }
  0x37   :  { %1424 = vmatprep.subr.bf16.mxu1 %v1500_v42 }
  0x38   :  { %1397 = vmatpush3.bf16.msra.mxu0 %v1499_v41 }
  0x39   :  { %1398 = vmatprep.subr.bf16.mxu0 %v1502_v44 }
  0x3a   :  { %1425 = vmatpush3.bf16.msra.mxu1 %v1501_v43 }
  0x3b   :  { %1426 = vmatprep.subr.bf16.mxu1 %v1504_v46  ;;  %225 = vmatmul.mubr.bf16.gmra.mrb[4].mxu0 %v1512_v53 }
  0x3c   :  { %1399 = vmatpush3.bf16.msra.mxu0 %v1503_v45  ;;  %653 = vmatprep.mubr.bf16.mxu0 %v1534_v9 }
  0x3d   :  { %1400 = vmatprep.subr.bf16.mxu0 %v1506_v48  ;;  %444 = vmatmul.mubr.bf16.gmra.mrb[4].mxu1 %v1520_v60 }
  0x3e   :  { %1427 = vmatpush3.bf16.msra.mxu1 %v1505_v47  ;;  %871 = vmatprep.mubr.bf16.mxu1 %v1537_v11 }
  0x3f   :  { %1428 = vmatprep.subr.bf16.mxu1 %v1508_v50 }
  0x40   :  { %1401 = vmatpush3.bf16.msra.mxu0 %v1507_v49 }
  0x41   :  { %1402 = vmatprep.subr.bf16.mxu0 %v1513_v54 }
  0x42   :  { %1429 = vmatpush3.bf16.msra.mxu1 %v1511_v52 }
  0x43   :  { %1430 = vmatprep.subr.bf16.mxu1 %v1515_v56 }
  0x44   :  { %1403 = vmatpush3.bf16.msra.mxu0 %v1514_v55 }
  0x45   :  { %1404 = vmatprep.subr.bf16.mxu0 %v1519_v59 }
  0x46   :  { %1431 = vmatpush3.bf16.msra.mxu1 %v1516_v57 }
  0x47   :  { %1432 = vmatprep.subr.bf16.mxu1 %v1522_v62 }
  0x48   :  { %1405 = vmatpush3.bf16.msra.mxu0 %v1521_v61 }
  0x49   :  { %1406 = vmatprep.subr.bf16.mxu0 %v1524_v0 }
  0x4a   :  { %1433 = vmatpush3.bf16.msra.mxu1 %v1523_v63 }
  0x4b   :  { %1434 = vmatprep.subr.bf16.mxu1 %v1526_v2 }
  0x4c   :  { %1407 = vmatpush3.bf16.msra.mxu0 %v1525_v1 }
  0x4d   :  { %1408 = vmatprep.subr.bf16.mxu0 %v1528_v4 }
  0x4e   :  { %1435 = vmatpush3.bf16.msra.mxu1 %v1527_v3 }
  0x4f   :  { %1436 = vmatprep.subr.bf16.mxu1 %v1530_v6 }
  0x50   :  { %1409 = vmatpush3.bf16.msra.mxu0 %v1529_v5 }
  0x52   :  { %1437 = vmatpush3.bf16.msra.mxu1 %v1531_v7 }
  0x53   :  { %654 = vmatmul.mubr.bf16.vlgmr.msra.gmra.mrb[8].mxu0 %v1532_v8 }
  0x54   :  { %661 = vmatprep.mubr.bf16.mxu0 %v1538_v12 }
  0x55   :  { %872 = vmatmul.mubr.bf16.vlgmr.msra.gmra.mrb[8].mxu1 %v1535_v10 }
  0x56   :  { %879 = vmatprep.mubr.bf16.mxu1 %v1541_v13 }
  0x5b   :  { %662 = vmatmul.mubr.bf16.gmra.mrb[12].mxu0 %v1540_v14 }
  0x5d   :  { %880 = vmatmul.mubr.bf16.gmra.mrb[12].mxu1 %v1543_v15 }
 0x106   :  { %v1354_v16 = vpop.f32.mrb[0].mxu0 }
 0x107   :  { %v1355_v17 = vpop.f32.mrb[1].mxu0 }
 0x108   :  { %v1809_v18 = vadd.f32 %v1355_v17, %v1354_v16  ;;  %v1357_v19 = vpop.f32.mrb[2].mxu0  ;;  %v1382_v20 = vpop.f32.mrb[0].mxu1 }
 0x109   :  { %v1358_v21 = vpop.f32.mrb[3].mxu0  ;;  %v1383_v22 = vpop.f32.mrb[1].mxu1 }
 0x10a   :  { %v1811_v23 = vadd.f32 %v1358_v21, %v1357_v19  ;;  %v1813_v24 = vadd.f32 %v1383_v22, %v1382_v20  ;;  %v1385_v25 = vpop.f32.mrb[2].mxu1  ;;  %v234_v26 = vsel %vm233_vm0, %v1809_v18, 0.0 }
 0x10b   :  { %v1386_v27 = vpop.f32.mrb[3].mxu1  ;;  %235 = vadd.xlane.f32.xlu0 %v234_v26 }
 0x10c   :  { %v1817_v28 = vadd.f32 %v1386_v27, %v1385_v25  ;;  %v452_v29 = vsel %vm233_vm0, %v1813_v24, 0.0  ;;  %v237_v31 = vsel %vm233_vm0, %v1811_v23, 0.0 }
 0x10e   :  { %v455_v30 = vsel %vm233_vm0, %v1817_v28, 0.0  ;;  %v1360_v32 = vpop.f32.mrb[4].mxu0 }
 0x10f   :  { %456 = vadd.xlane.f32.xlu1 %v455_v30  ;;  %453 = vadd.xlane.f32.xlu0 %v452_v29  ;;  %v1361_v33 = vpop.f32.mrb[5].mxu0 }
 0x110   :  { %v1825_v34 = vadd.f32 %v1361_v33, %v1360_v32  ;;  %v1363_v35 = vpop.f32.mrb[6].mxu0  ;;  %v1388_v40 = vpop.f32.mrb[4].mxu1 }
 0x111   :  { %v1364_v36 = vpop.f32.mrb[7].mxu0  ;;  %v1389_v41 = vpop.f32.mrb[5].mxu1 }
 0x112   :  { %v1827_v37 = vadd.f32 %v1364_v36, %v1363_v35  ;;  %v240_v38 = vsel %vm233_vm0, %v1825_v34, 0.0  ;;  %v1833_v42 = vadd.f32 %v1389_v41, %v1388_v40  ;;  %v1391_v43 = vpop.f32.mrb[6].mxu1 }
 0x113   :  { %238 = vadd.xlane.f32.xlu0 %v237_v31  ;;  %241 = vadd.xlane.f32.xlu1 %v240_v38  ;;  %v1392_v44 = vpop.f32.mrb[7].mxu1 }
 0x114   :  { %v243_v39 = vsel %vm233_vm0, %v1827_v37, 0.0  ;;  %v1835_v45 = vadd.f32 %v1392_v44, %v1391_v43  ;;  %v458_v46 = vsel %vm233_vm0, %v1833_v42, 0.0 }
 0x116   :  { %v461_v47 = vsel %vm233_vm0, %v1835_v45, 0.0 }
 0x117   :  { %244 = vadd.xlane.f32.xlu1 %v243_v39  ;;  %459 = vadd.xlane.f32.xlu0 %v458_v46 }
 0x11b   :  { %462 = vadd.xlane.f32.xlu1 %v461_v47 }
 0x126   :  { %v1410_v48 = vpop.f32.mrb[8].mxu0 }
 0x127   :  { %v1411_v49 = vpop.f32.mrb[9].mxu0 }
 0x128   :  { %v1438_v50 = vpop.f32.mrb[8].mxu1  ;;  %v1841_v51 = vadd.f32 %v1411_v49, %v1410_v48  ;;  %v1413_v52 = vpop.f32.mrb[10].mxu0 }
 0x129   :  { %v1439_v53 = vpop.f32.mrb[9].mxu1  ;;  %v1414_v55 = vpop.f32.mrb[11].mxu0 }
 0x12a   :  { %v1843_v54 = vadd.f32 %v1439_v53, %v1438_v50  ;;  %v1441_v56 = vpop.f32.mrb[10].mxu1  ;;  %v1845_v57 = vadd.f32 %v1414_v55, %v1413_v52  ;;  %v670_v59 = vsel %vm233_vm0, %v1841_v51, 0.0 }
 0x12b   :  { %v1442_v58 = vpop.f32.mrb[11].mxu1  ;;  %671 = vadd.xlane.f32.xlu0 %v670_v59 }
 0x12c   :  { %v1849_v60 = vadd.f32 %v1442_v58, %v1441_v56  ;;  %v673_v61 = vsel %vm233_vm0, %v1845_v57, 0.0  ;;  %v888_v62 = vsel %vm233_vm0, %v1843_v54, 0.0 }
 0x12d   :  { %674 = vadd.xlane.f32.xlu1 %v673_v61 }
 0x12e   :  { %v1416_v63 = vpop.f32.mrb[12].mxu0  ;;  %v891_v4 = vsel %vm233_vm0, %v1849_v60, 0.0 }
 0x12f   :  { %v1417_v0 = vpop.f32.mrb[13].mxu0  ;;  %889 = vadd.xlane.f32.xlu0 %v888_v62 }
 0x130   :  { %v1444_v1 = vpop.f32.mrb[12].mxu1  ;;  %v1855_v2 = vadd.f32 %v1417_v0, %v1416_v63  ;;  %v1419_v3 = vpop.f32.mrb[14].mxu0 }
 0x131   :  { %v1445_v5 = vpop.f32.mrb[13].mxu1  ;;  %v1420_v6 = vpop.f32.mrb[15].mxu0  ;;  %892 = vadd.xlane.f32.xlu1 %v891_v4 }
 0x132   :  { %v1859_v7 = vadd.f32 %v1445_v5, %v1444_v1  ;;  %v1447_v8 = vpop.f32.mrb[14].mxu1  ;;  %v1861_v9 = vadd.f32 %v1420_v6, %v1419_v3  ;;  %v676_v10 = vsel %vm233_vm0, %v1855_v2, 0.0 }
 0x133   :  { %v1448_v11 = vpop.f32.mrb[15].mxu1  ;;  %677 = vadd.xlane.f32.xlu0 %v676_v10 }
 0x134   :  { %v1865_v12 = vadd.f32 %v1448_v11, %v1447_v8  ;;  %v679_v13 = vsel %vm233_vm0, %v1861_v9, 0.0  ;;  %v894_v14 = vsel %vm233_vm0, %v1859_v7, 0.0 }
 0x135   :  { %680 = vadd.xlane.f32.xlu1 %v679_v13 }
 0x136   :  { %v897_v15 = vsel %vm233_vm0, %v1865_v12, 0.0 }
 0x137   :  { %895 = vadd.xlane.f32.xlu0 %v894_v14 }
 0x139   :  { %898 = vadd.xlane.f32.xlu1 %v897_v15 }
 0x198   :  { %v236_v16 = vpop.xlane.xlu0 %235 }
 0x19c   :  { %v457_v17 = vpop.xlane.xlu1 %456  ;;  %v454_v19 = vpop.xlane.xlu0 %453 }
 0x19d   :  { %v464_v29 = vadd.f32 %v454_v19, %v236_v16 }
 0x1a0   :  { %v242_v20 = vpop.xlane.xlu1 %241  ;;  %v239_v21 = vpop.xlane.xlu0 %238 }
 0x1a1   :  { %v465_v31 = vadd.f32 %v457_v17, %v239_v21 }
 0x1a4   :  { %v245_v22 = vpop.xlane.xlu1 %244  ;;  %v460_v25 = vpop.xlane.xlu0 %459 }
 0x1a5   :  { %v466_v43 = vadd.f32 %v460_v25, %v242_v20 }
 0x1a8   :  { %v463_v26 = vpop.xlane.xlu1 %462 }
 0x1a9   :  { %v467_v48 = vadd.f32 %v463_v26, %v245_v22 }
 0x1b8   :  { %v672_v27 = vpop.xlane.xlu0 %671 }
 0x1b9   :  { %v682_v32 = vadd.f32 %v672_v27, %v464_v29 }
 0x1ba   :  { %v675_v30 = vpop.xlane.xlu1 %674 }
 0x1bb   :  { %v683_v35 = vadd.f32 %v675_v30, %v465_v31 }
 0x1bc   :  { %v890_v33 = vpop.xlane.xlu0 %889 }
 0x1bd   :  { %v900_v36 = vadd.f32 %v890_v33, %v682_v32 }
 0x1be   :  { %v893_v38 = vpop.xlane.xlu1 %892 }
 0x1bf   :  { %v1873_v39 = vmul.f32 0.0078125, %v900_v36  ;;  %v901_v40 = vadd.f32 %v893_v38, %v683_v35 }
 0x1c0   :  { %v678_v41 = vpop.xlane.xlu0 %677 }
 0x1c1   :  { %v1875_v44 = vmul.f32 0.0078125, %v901_v40  ;;  %v909_v46 = vsub.f32 %v1809_v18, %v1873_v39  ;;  %v933_v47 = vsub.f32 %v1813_v24, %v1873_v39  ;;  %v684_v50 = vadd.f32 %v678_v41, %v466_v43 }
 0x1c2   :  { %v681_v49 = vpop.xlane.xlu1 %680  ;;  %v957_v59 = vsub.f32 %v1841_v51, %v1873_v39  ;;  %v981_v13 = vsub.f32 %v1843_v54, %v1873_v39 }
 0x1c3   :  { %v913_v52 = vmul.f32 %v909_v46, %v909_v46  ;;  %v910_v53 = vsub.f32 %v1811_v23, %v1875_v44  ;;  %v685_v55 = vadd.f32 %v681_v49, %v467_v48  ;;  %v934_v58 = vsub.f32 %v1817_v28, %v1875_v44 }
 0x1c4   :  { %v896_v56 = vpop.xlane.xlu0 %895  ;;  %v937_v0 = vmul.f32 %v933_v47, %v933_v47  ;;  %v958_v6 = vsub.f32 %v1845_v57, %v1875_v44  ;;  %v961_v11 = vmul.f32 %v957_v59, %v957_v59  ;;  %v982_v17 = vsub.f32 %v1849_v60, %v1875_v44 }
 0x1c5   :  { %v902_v61 = vadd.f32 %v896_v56, %v684_v50  ;;  %v917_v62 = vsel %vm233_vm0, %v913_v52, 0.0  ;;  %v914_v63 = vmul.f32 %v910_v53, %v910_v53  ;;  %v938_v5 = vmul.f32 %v934_v58, %v934_v58 }
 0x1c6   :  { %v899_v1 = vpop.xlane.xlu1 %898  ;;  %918 = vadd.xlane.f32.xlu0 %v917_v62  ;;  %v941_v10 = vsel %vm233_vm0, %v937_v0, 0.0  ;;  %v962_v16 = vmul.f32 %v958_v6, %v958_v6  ;;  %v965_v19 = vsel %vm233_vm0, %v961_v11, 0.0  ;;  %v985_v20 = vmul.f32 %v981_v13, %v981_v13 }
 0x1c7   :  { %v903_v3 = vadd.f32 %v899_v1, %v685_v55  ;;  %v920_v4 = vsel %vm233_vm0, %v914_v63, 0.0  ;;  %v1891_v8 = vmul.f32 0.0078125, %v902_v61  ;;  %v944_v15 = vsel %vm233_vm0, %v938_v5, 0.0 }
 0x1c8   :  { %921 = vadd.xlane.f32.xlu1 %v920_v4  ;;  %v968_v22 = vsel %vm233_vm0, %v962_v16, 0.0  ;;  %v986_v25 = vmul.f32 %v982_v17, %v982_v17  ;;  %v989_v27 = vsel %vm233_vm0, %v985_v20, 0.0  ;;  %v1579_v62 = vmov 0  }
 0x1c9   :  { %v1896_v14 = vmul.f32 0.0078125, %v903_v3  ;;  %v911_v21 = vsub.f32 %v1825_v34, %v1891_v8  ;;  %v935_v30 = vsub.f32 %v1833_v42, %v1891_v8  ;;  %v959_v38 = vsub.f32 %v1855_v2, %v1891_v8  ;;  %1454 = vset.pattern.permute.xlu0 %v1579_v62  ;;  %1455 = vset.pattern.permute.xlu1 %v1579_v62 }
 0x1ca   :  { %942 = vadd.xlane.f32.xlu0 %v941_v10  ;;  %v992_v31 = vsel %vm233_vm0, %v986_v25, 0.0  ;;  %v983_v48 = vsub.f32 %v1859_v7, %v1891_v8 }
 0x1cb   :  { %v912_v26 = vsub.f32 %v1827_v37, %v1896_v14  ;;  %v915_v29 = vmul.f32 %v911_v21, %v911_v21  ;;  %v936_v33 = vsub.f32 %v1835_v45, %v1896_v14  ;;  %v939_v36 = vmul.f32 %v935_v30, %v935_v30 }
 0x1cc   :  { %945 = vadd.xlane.f32.xlu1 %v944_v15  ;;  %v960_v43 = vsub.f32 %v1861_v9, %v1896_v14  ;;  %v963_v47 = vmul.f32 %v959_v38, %v959_v38  ;;  %v984_v52 = vsub.f32 %v1865_v12, %v1896_v14  ;;  %v987_v55 = vmul.f32 %v983_v48, %v983_v48  ;;  %v1005_v38 = vld [vmem:[%s2039_s2] sm:$0xff] }
 0x1cd   :  { %v916_v32 = vmul.f32 %v912_v26, %v912_v26  ;;  %v923_v35 = vsel %vm233_vm0, %v915_v29, 0.0  ;;  %v940_v41 = vmul.f32 %v936_v33, %v936_v33  ;;  %v947_v46 = vsel %vm233_vm0, %v939_v36, 0.0 }
 0x1ce   :  { %966 = vadd.xlane.f32.xlu0 %v965_v19  ;;  %v964_v50 = vmul.f32 %v960_v43, %v960_v43  ;;  %v971_v53 = vsel %vm233_vm0, %v963_v47, 0.0  ;;  %v988_v58 = vmul.f32 %v984_v52, %v984_v52  ;;  %v995_v59 = vsel %vm233_vm0, %v987_v55, 0.0  ;;  %v1006_v47 = vld [vmem:[%s2039_s2 + $0x8] sm:$0xff] }
 0x1cf   :  { %v926_v40 = vsel %vm233_vm0, %v916_v32, 0.0  ;;  %v950_v49 = vsel %vm233_vm0, %v940_v41, 0.0 }
 0x1d0   :  { %969 = vadd.xlane.f32.xlu1 %v968_v22  ;;  %v974_v56 = vsel %vm233_vm0, %v964_v50, 0.0  ;;  %v998_v61 = vsel %vm233_vm0, %v988_v58, 0.0 }
 0x1d2   :  { %990 = vadd.xlane.f32.xlu0 %v989_v27 }
 0x1d4   :  { %993 = vadd.xlane.f32.xlu1 %v992_v31 }
 0x1d6   :  { %924 = vadd.xlane.f32.xlu0 %v923_v35 }
 0x1d8   :  { %927 = vadd.xlane.f32.xlu1 %v926_v40 }
 0x1da   :  { %948 = vadd.xlane.f32.xlu0 %v947_v46 }
 0x1dc   :  { %951 = vadd.xlane.f32.xlu1 %v950_v49 }
 0x1de   :  { %972 = vadd.xlane.f32.xlu0 %v971_v53 }
 0x1e0   :  { %975 = vadd.xlane.f32.xlu1 %v974_v56 }
 0x1e2   :  { %996 = vadd.xlane.f32.xlu0 %v995_v59 }
 0x1e4   :  { %999 = vadd.xlane.f32.xlu1 %v998_v61  ;;  %v1025_v61 = vld [vmem:[%s2040_s3] sm:$0xff] }
 0x253   :  { %v919_v63 = vpop.xlane.xlu0 %918 }
 0x255   :  { %v922_v0 = vpop.xlane.xlu1 %921 }
 0x257   :  { %v943_v1 = vpop.xlane.xlu0 %942 }
 0x258   :  { %v953_v5 = vadd.f32 %v943_v1, %v919_v63  ;;  %v1026_v1 = vld [vmem:[%s2040_s3 + $0x8] sm:$0xff] }
 0x259   :  { %v946_v3 = vpop.xlane.xlu1 %945 }
 0x25a   :  { %v954_v10 = vadd.f32 %v946_v3, %v922_v0 }
 0x25b   :  { %v967_v4 = vpop.xlane.xlu0 %966 }
 0x25c   :  { %v977_v11 = vadd.f32 %v967_v4, %v953_v5 }
 0x25d   :  { %v970_v6 = vpop.xlane.xlu1 %969 }
 0x25e   :  { %v978_v15 = vadd.f32 %v970_v6, %v954_v10  ;;  %v1008_v10 = vld [vmem:[%s2039_s2 + $0x18] sm:$0xff] }
 0x25f   :  { %v991_v13 = vpop.xlane.xlu0 %990 }
 0x260   :  { %v1001_v16 = vadd.f32 %v991_v13, %v977_v11  ;;  %v1027_v13 = vld [vmem:[%s2040_s3 + $0x10] sm:$0xff] }
 0x261   :  { %v994_v17 = vpop.xlane.xlu1 %993 }
 0x262   :  { %v1009_v19 = vmul.f32 0.0078125, %v1001_v16  ;;  %v1002_v20 = vadd.f32 %v994_v17, %v978_v15  ;;  %v1028_v17 = vld [vmem:[%s2040_s3 + $0x18] sm:$0xff] }
 0x263   :  { %v925_v21 = vpop.xlane.xlu0 %924 }
 0x264   :  { %v1013_v22 = vadd.f32 1e-05, %v1009_v19  ;;  %v1010_v25 = vmul.f32 0.0078125, %v1002_v20 }
 0x265   :  { %v928_v26 = vpop.xlane.xlu1 %927 }
 0x266   :  { %1544 = vrsqrt.f32 %v1013_v22  ;;  %v1014_v27 = vadd.f32 1e-05, %v1010_v25 }
 0x267   :  { %v949_v29 = vpop.xlane.xlu0 %948 }
 0x268   :  { %1546 = vrsqrt.f32 %v1014_v27  ;;  %v955_v32 = vadd.f32 %v949_v29, %v925_v21 }
 0x269   :  { %v952_v30 = vpop.xlane.xlu1 %951 }
 0x26a   :  { %v956_v35 = vadd.f32 %v952_v30, %v928_v26 }
 0x26b   :  { %v973_v31 = vpop.xlane.xlu0 %972 }
 0x26c   :  { %v979_v36 = vadd.f32 %v973_v31, %v955_v32 }
 0x26d   :  { %v976_v33 = vpop.xlane.xlu1 %975 }
 0x26e   :  { %v980_v43 = vadd.f32 %v976_v33, %v956_v35 }
 0x26f   :  { %v997_v40 = vpop.xlane.xlu0 %996 }
 0x270   :  { %v1545_v41 = vpop.eup %1544  ;;  %v1003_v46 = vadd.f32 %v997_v40, %v979_v36 }
 0x271   :  { %v1000_v48 = vpop.xlane.xlu1 %999  ;;  %v1021_v49 = vmul.f32 %v1545_v41, %v1005_v38 }
 0x272   :  { %v1547_v50 = vpop.eup %1546  ;;  %v1011_v52 = vmul.f32 0.0078125, %v1003_v46  ;;  %v1004_v53 = vadd.f32 %v1000_v48, %v980_v43 }
 0x273   :  { %1039 = vperm.xlu0 %1454, %v1021_v49   ;;  %v1022_v55 = vmul.f32 %v1547_v50, %v1006_v47  ;;  %v1029_v56 = vmul.f32 %v1021_v49, %v1873_v39  ;;  %v1007_v39 = vld [vmem:[%s2039_s2 + $0x10] sm:$0xff] }
 0x274   :  { %v1015_v58 = vadd.f32 1e-05, %v1011_v52  ;;  %v1012_v59 = vmul.f32 0.0078125, %v1004_v53 }
 0x275   :  { %1044 = vperm.xlu1 %1455, %v1022_v55   ;;  %v1033_v63 = vsub.f32 %v1025_v61, %v1029_v56  ;;  %v1030_v0 = vmul.f32 %v1022_v55, %v1875_v44 }
 0x276   :  { %1548 = vrsqrt.f32 %v1015_v58  ;;  %v1016_v62 = vadd.f32 1e-05, %v1012_v59 }
 0x277   :  { %v1034_v3 = vsub.f32 %v1026_v1, %v1030_v0 }
 0x278   :  { %1550 = vrsqrt.f32 %v1016_v62 }
 0x279   :  { %1063 = vperm.xlu1 %1455, %v1033_v63  }
 0x27d   :  { %1068 = vperm.xlu1 %1455, %v1034_v3  }
 0x280   :  { %v1549_v4 = vpop.eup %1548 }
 0x281   :  { %v1023_v5 = vmul.f32 %v1549_v4, %v1007_v39 }
 0x282   :  { %v1551_v6 = vpop.eup %1550 }
 0x283   :  { %1049 = vperm.xlu1 %1455, %v1023_v5   ;;  %v1024_v44 = vmul.f32 %v1551_v6, %v1008_v10  ;;  %v1031_v11 = vmul.f32 %v1023_v5, %v1891_v8 }
 0x285   :  { %v1035_v15 = vsub.f32 %v1027_v13, %v1031_v11  ;;  %v1032_v16 = vmul.f32 %v1024_v44, %v1896_v14 }
 0x287   :  { %1054 = vperm.xlu1 %1455, %v1024_v44   ;;  %v1036_v19 = vsub.f32 %v1028_v17, %v1032_v16 }
 0x28b   :  { %1073 = vperm.xlu1 %1455, %v1035_v15  }
 0x28f   :  { %1078 = vperm.xlu1 %1455, %v1036_v19  }
 0x2f2   :  { %v1040_v20 = vpop.permute.xlu0 %1039 }
 0x2f3   :  { %v1057_v22 = vmul.f32 %v1809_v18, %v1040_v20  ;;  %v1110_v8 = vmul.f32 %v1813_v24, %v1040_v20  ;;  %v1143_v25 = vmul.f32 %v1841_v51, %v1040_v20  ;;  %v1176_v26 = vmul.f32 %v1843_v54, %v1040_v20 }
 0x2f4   :  { %v1045_v21 = vpop.permute.xlu1 %1044 }
 0x2f5   :  { %v1058_v38 = vmul.f32 %v1811_v23, %v1045_v21  ;;  %v1111_v18 = vmul.f32 %v1817_v28, %v1045_v21  ;;  %v1144_v24 = vmul.f32 %v1845_v57, %v1045_v21  ;;  %v1177_v51 = vmul.f32 %v1849_v60, %v1045_v21 }
 0x2f8   :  { %v1064_v27 = vpop.permute.xlu1 %1063 }
 0x2f9   :  { %v1081_v29 = vadd.f32 %v1064_v27, %v1057_v22  ;;  %v1114_v14 = vadd.f32 %v1110_v8, %v1064_v27  ;;  %v1147_v30 = vadd.f32 %v1143_v25, %v1064_v27  ;;  %v1180_v31 = vadd.f32 %v1176_v26, %v1064_v27 }
 0x2fb   :  { %v1085_v32 = vmax.f32 %v1081_v29, 0.0  ;;  %v1118_v33 = vmax.f32 %v1114_v14, 0.0  ;;  %v1151_v35 = vmax.f32 %v1147_v30, 0.0  ;;  %v1184_v36 = vmax.f32 %v1180_v31, 0.0 }
 0x2fc   :  { %v1069_v40 = vpop.permute.xlu1 %1068 }
 0x2fd   :  { %v1322_v54 = vpack.c.bf16 %v1085_v32, %v1085_v32  ;;  %v1326_v41 = vpack.c.bf16 %v1118_v33, %v1118_v33  ;;  %v1330_v43 = vpack.c.bf16 %v1151_v35, %v1151_v35  ;;  %v1334_v46 = vpack.c.bf16 %v1184_v36, %v1184_v36 }
 0x2fe   :  { %v1082_v47 = vadd.f32 %v1069_v40, %v1058_v38  ;;  %v1115_v48 = vadd.f32 %v1111_v18, %v1069_v40  ;;  %v1148_v49 = vadd.f32 %v1144_v24, %v1069_v40  ;;  %v1181_v50 = vadd.f32 %v1177_v51, %v1069_v40 }
 0x2ff   :  { %1106 = vst.msk [vmem:[%s2041_s4] sm:$0xf] %vm1105_vm1, %v1322_v54  ;;  %1302 = vst.msk [vmem:[%s2041_s4 + $0x10] sm:$0xf] %vm1105_vm1, %v1326_v41 }
 0x300   :  { %1310 = vst.msk [vmem:[%s2041_s4 + $0x20] sm:$0xf] %vm1105_vm1, %v1330_v43  ;;  %1318 = vst.msk [vmem:[%s2041_s4 + $0x30] sm:$0xf] %vm1105_vm1, %v1334_v46  ;;  %v1086_v23 = vmax.f32 %v1082_v47, 0.0  ;;  %v1119_v28 = vmax.f32 %v1115_v48, 0.0 }
 0x301   :  { %v1152_v57 = vmax.f32 %v1148_v49, 0.0  ;;  %v1185_v60 = vmax.f32 %v1181_v50, 0.0 }
 0x302   :  { %v1323_v52 = vpack.c.bf16 %v1086_v23, %v1086_v23  ;;  %v1327_v53 = vpack.c.bf16 %v1119_v28, %v1119_v28  ;;  %v1050_v58 = vpop.permute.xlu1 %1049 }
 0x303   :  { %v1331_v55 = vpack.c.bf16 %v1152_v57, %v1152_v57  ;;  %v1335_v56 = vpack.c.bf16 %v1185_v60, %v1185_v60  ;;  %v1059_v61 = vmul.f32 %v1825_v34, %v1050_v58  ;;  %v1112_v62 = vmul.f32 %v1833_v42, %v1050_v58 }
 0x304   :  { %1107 = vst.msk [vmem:[%s2041_s4 + $0x4] sm:$0xf] %vm1105_vm1, %v1323_v52  ;;  %1303 = vst.msk [vmem:[%s2041_s4 + $0x14] sm:$0xf] %vm1105_vm1, %v1327_v53  ;;  %v1145_v63 = vmul.f32 %v1855_v2, %v1050_v58  ;;  %v1178_v0 = vmul.f32 %v1859_v7, %v1050_v58 }
 0x305   :  { %1311 = vst.msk [vmem:[%s2041_s4 + $0x24] sm:$0xf] %vm1105_vm1, %v1331_v55  ;;  %1319 = vst.msk [vmem:[%s2041_s4 + $0x34] sm:$0xf] %vm1105_vm1, %v1335_v56 }
 0x306   :  { %v1055_v59 = vpop.permute.xlu1 %1054 }
 0x307   :  { %v1060_v13 = vmul.f32 %v1827_v37, %v1055_v59  ;;  %v1113_v15 = vmul.f32 %v1835_v45, %v1055_v59  ;;  %v1146_v34 = vmul.f32 %v1861_v9, %v1055_v59  ;;  %v1179_v42 = vmul.f32 %v1865_v12, %v1055_v59 }
 0x30a   :  { %v1074_v1 = vpop.permute.xlu1 %1073 }
 0x30b   :  { %v1083_v3 = vadd.f32 %v1074_v1, %v1059_v61  ;;  %v1116_v39 = vadd.f32 %v1112_v62, %v1074_v1  ;;  %v1149_v4 = vadd.f32 %v1145_v63, %v1074_v1  ;;  %v1182_v5 = vadd.f32 %v1178_v0, %v1074_v1 }
 0x30d   :  { %v1087_v6 = vmax.f32 %v1083_v3, 0.0  ;;  %v1120_v10 = vmax.f32 %v1116_v39, 0.0  ;;  %v1153_v44 = vmax.f32 %v1149_v4, 0.0  ;;  %v1186_v11 = vmax.f32 %v1182_v5, 0.0 }
 0x30e   :  { %v1079_v2 = vpop.permute.xlu1 %1078 }
 0x30f   :  { %v1324_v16 = vpack.c.bf16 %v1087_v6, %v1087_v6  ;;  %v1328_v7 = vpack.c.bf16 %v1120_v10, %v1120_v10  ;;  %v1332_v17 = vpack.c.bf16 %v1153_v44, %v1153_v44  ;;  %v1336_v19 = vpack.c.bf16 %v1186_v11, %v1186_v11 }
 0x310   :  { %v1084_v20 = vadd.f32 %v1079_v2, %v1060_v13  ;;  %v1117_v21 = vadd.f32 %v1113_v15, %v1079_v2  ;;  %v1150_v22 = vadd.f32 %v1146_v34, %v1079_v2  ;;  %v1183_v8 = vadd.f32 %v1179_v42, %v1079_v2 }
 0x311   :  { %1108 = vst.msk [vmem:[%s2041_s4 + $0x8] sm:$0xf] %vm1105_vm1, %v1324_v16  ;;  %1304 = vst.msk [vmem:[%s2041_s4 + $0x18] sm:$0xf] %vm1105_vm1, %v1328_v7 }
 0x312   :  { %1312 = vst.msk [vmem:[%s2041_s4 + $0x28] sm:$0xf] %vm1105_vm1, %v1332_v17  ;;  %1320 = vst.msk [vmem:[%s2041_s4 + $0x38] sm:$0xf] %vm1105_vm1, %v1336_v19  ;;  %v1088_v37 = vmax.f32 %v1084_v20, 0.0  ;;  %v1121_v45 = vmax.f32 %v1117_v21, 0.0 }
 0x313   :  { %v1154_v9 = vmax.f32 %v1150_v22, 0.0  ;;  %v1187_v12 = vmax.f32 %v1183_v8, 0.0 }
 0x314   :  { %v1325_v25 = vpack.c.bf16 %v1088_v37, %v1088_v37  ;;  %v1329_v26 = vpack.c.bf16 %v1121_v45, %v1121_v45 }
 0x315   :  { %v1333_v27 = vpack.c.bf16 %v1154_v9, %v1154_v9  ;;  %v1337_v29 = vpack.c.bf16 %v1187_v12, %v1187_v12 }
 0x316   :  { %1109 = vst.msk [vmem:[%s2041_s4 + $0xc] sm:$0xf] %vm1105_vm1, %v1325_v25  ;;  %1305 = vst.msk [vmem:[%s2041_s4 + $0x1c] sm:$0xf] %vm1105_vm1, %v1329_v26 }
 0x317   :  { %1313 = vst.msk [vmem:[%s2041_s4 + $0x2c] sm:$0xf] %vm1105_vm1, %v1333_v27  ;;  %1321 = vst.msk [vmem:[%s2041_s4 + $0x3c] sm:$0xf] %vm1105_vm1, %v1337_v29 }
 0x318   :  { %1213 = vsyncpa [#allocation3], 1 }

// kernel: generator_forward.7
= control target key start
LH: loop header
LB: loop body
LE: loop exit
PB: predicated region body
PF: predicated region fallthrough
CT: control target
= control target key end

     0   :  { %9 = vsyncpa [#allocation3], 0  ;;  %s931_s15 = smov [#allocation2]   ;;  %s1174_s0 = inlined_call_operand.vmem [shape: bf16[384,128], index: 0, kind: input, shape index: {}]   ;;  %s1175_s1 = inlined_call_operand.hbm [shape: bf16[4,16,128], index: 1, kind: input, shape index: {}]   ;;  %s1176_s2 = inlined_call_operand.vmem [shape: f32[16,1], index: 2, kind: input, shape index: {}]   ;;  %s1177_s3 = inlined_call_operand.vmem [shape: f32[16,1], index: 3, kind: input, shape index: {}]   ;;  %s1178_s4 = inlined_call_operand.vmem [shape: bf16[4,16,128], index: 4, kind: output, shape index: {}]  }
   0x1   :  { %s17_s16 = sshll.u32 %s931_s15, 4  ;;  %s907_s19 = scalar_lea.hbm %s1175_s1, 512  ;;  %s18_s16 = int_to_ptr.vmem [resolvable:$true] %s17_s16 }
   0x2   :  { %p908_p0 = scmp.ne.s32.totalorder %s1175_s1, %s907_s19  ;;  %p911_p1 = scmp.lt.u32.totalorder %s907_s19, %s1175_s1 }
   0x4   :  { %p913_p2 = pnand %p911_p1, %p908_p0 }
   0x6   :  { %916 = shalt.err (!%p913_p2)
}
   0x7   :  { %s917_s24 = scalar_lea.vmem %s18_s16, 512  ;;  %p922_p4 = scmp.lt.s32.totalorder %s18_s16, %s18_s16 }
   0x8   :  { %p918_p3 = scmp.ne.s32.totalorder %s18_s16, %s917_s24  ;;  %p923_p5 = scmp.lt.s32.totalorder %s917_s24, %s917_s24 }
   0xa   :  { %p924_p6 = por %p923_p5, %p922_p4 }
   0xc   :  { %p925_p7 = pnand %p924_p6, %p918_p3 }
   0xe   :  { %928 = shalt.err (!%p925_p7)
}
   0xf   :  { %s932_s25 = smov 64   ;;  %s933_s26 = smov 4  }
  0x10   :  { %23 = dma.hbm_to_vmem [thread:$0]  %s1175_s1, 512, %s18_s16, [#allocation3], %s932_s25, %s932_s25, %s933_s26  }
  0x11   :  { %929 = dma.done.wait [#allocation3], 512  }
  0x12   :  { %930 = vsyncadd [#allocation3], 4294966784  ;;  %v934_v0 = vmov 0.0   ;;  %vm935_vm0 = vmmov 0   ;;  %v867_v1 = vld [vmem:[%s1174_s0] sm:$0xff]   ;;  %v869_v3 = vld [vmem:[%s1174_s0 + $0x8] sm:$0xff]  }
  0x13   :  { %779 = vmatprep.subr.bf16.mxu0 %v934_v0  ;;  %799 = vmatprep.subr.bf16.mxu1 %v934_v0  ;;  %v868_v2 = vld [vmem:[%s1174_s0 + $0x20] sm:$0xff]   ;;  %v870_v4 = vld [vmem:[%s1174_s0 + $0x28] sm:$0xff]   ;;  %v871_v5 = vld [vmem:[%s1174_s0 + $0x10] sm:$0xff]  }
  0x14   :  { %795 = vmatprep.mubr.msk.bf16.mxu0 %vm935_vm0, %v934_v0  ;;  %815 = vmatprep.mubr.msk.bf16.mxu1 %vm935_vm0, %v934_v0  ;;  %v872_v6 = vld [vmem:[%s1174_s0 + $0x30] sm:$0xff]   ;;  %v873_v7 = vld [vmem:[%s1174_s0 + $0x18] sm:$0xff]   ;;  %v875_v9 = vld [vmem:[%s1174_s0 + $0x20] sm:$0xff]  }
  0x15   :  { %780 = vmatpush3.bf16.msra.mxu0 %v867_v1  ;;  %800 = vmatpush3.bf16.msra.mxu1 %v868_v2  ;;  %v874_v8 = vld [vmem:[%s1174_s0 + $0x38] sm:$0xff]   ;;  %v876_v10 = vld [vmem:[%s1174_s0 + $0x40] sm:$0xff]   ;;  %v877_v11 = vld [vmem:[%s1174_s0 + $0x28] sm:$0xff]  }
  0x16   :  { %781 = vmatprep.subr.bf16.mxu0 %v934_v0  ;;  %801 = vmatprep.subr.bf16.mxu1 %v934_v0  ;;  %v878_v12 = vld [vmem:[%s1174_s0 + $0x48] sm:$0xff]   ;;  %v879_v13 = vld [vmem:[%s1174_s0 + $0x30] sm:$0xff]   ;;  %v881_v15 = vld [vmem:[%s1174_s0 + $0x38] sm:$0xff]  }
  0x17   :  { %v880_v14 = vld [vmem:[%s1174_s0 + $0x50] sm:$0xff]   ;;  %v882_v16 = vld [vmem:[%s1174_s0 + $0x58] sm:$0xff]   ;;  %v883_v17 = vld [vmem:[#allocation2] sm:$0xff]  }
  0x18   :  { %v884_v18 = vld [vmem:[#allocation2 + $0x8] sm:$0xff]   ;;  %v885_v19 = vld [vmem:[%s1174_s0 + $0x60] sm:$0xff]   ;;  %v889_v23 = vld [vmem:[%s1174_s0 + $0x70] sm:$0xff]  }
  0x19   :  { %782 = vmatpush3.bf16.msra.mxu0 %v869_v3  ;;  %802 = vmatpush3.bf16.msra.mxu1 %v870_v4  ;;  %v886_v20 = vld [vmem:[%s1174_s0 + $0x80] sm:$0xff]   ;;  %v887_v21 = vld [vmem:[%s1174_s0 + $0x68] sm:$0xff]   ;;  %v890_v24 = vld [vmem:[%s1174_s0 + $0x90] sm:$0xff]  }
  0x1a   :  { %783 = vmatprep.subr.bf16.mxu0 %v934_v0  ;;  %803 = vmatprep.subr.bf16.mxu1 %v934_v0  ;;  %v888_v22 = vld [vmem:[%s1174_s0 + $0x88] sm:$0xff]   ;;  %v891_v25 = vld [vmem:[%s1174_s0 + $0x78] sm:$0xff]   ;;  %v893_v27 = vld [vmem:[%s1174_s0 + $0x80] sm:$0xff]  }
  0x1b   :  { %v892_v26 = vld [vmem:[%s1174_s0 + $0x98] sm:$0xff]   ;;  %v894_v28 = vld [vmem:[%s1174_s0 + $0xa0] sm:$0xff]   ;;  %v895_v29 = vld [vmem:[%s1174_s0 + $0x88] sm:$0xff]  }
  0x1c   :  { %v896_v30 = vld [vmem:[%s1174_s0 + $0xa8] sm:$0xff]   ;;  %v897_v31 = vld [vmem:[%s1174_s0 + $0x90] sm:$0xff]   ;;  %v899_v33 = vld [vmem:[%s1174_s0 + $0x98] sm:$0xff]  }
  0x1d   :  { %784 = vmatpush3.bf16.msra.mxu0 %v871_v5  ;;  %804 = vmatpush3.bf16.msra.mxu1 %v872_v6  ;;  %v898_v32 = vld [vmem:[%s1174_s0 + $0xb0] sm:$0xff]   ;;  %v900_v34 = vld [vmem:[%s1174_s0 + $0xb8] sm:$0xff]  }
  0x1e   :  { %785 = vmatprep.subr.bf16.mxu0 %v934_v0  ;;  %805 = vmatprep.subr.bf16.mxu1 %v934_v0  ;;  %v901_v35 = vld [vmem:[#allocation2 + $0x10] sm:$0xff]   ;;  %v902_v36 = vld [vmem:[#allocation2 + $0x18] sm:$0xff]  }
  0x21   :  { %786 = vmatpush3.bf16.msra.mxu0 %v873_v7  ;;  %806 = vmatpush3.bf16.msra.mxu1 %v874_v8 }
  0x22   :  { %787 = vmatprep.subr.bf16.mxu0 %v934_v0  ;;  %807 = vmatprep.subr.bf16.mxu1 %v934_v0 }
  0x25   :  { %788 = vmatpush3.bf16.msra.mxu0 %v875_v9  ;;  %808 = vmatpush3.bf16.msra.mxu1 %v876_v10 }
  0x26   :  { %789 = vmatprep.subr.bf16.mxu0 %v934_v0  ;;  %809 = vmatprep.subr.bf16.mxu1 %v934_v0 }
  0x29   :  { %790 = vmatpush3.bf16.msra.mxu0 %v877_v11  ;;  %810 = vmatpush3.bf16.msra.mxu1 %v878_v12 }
  0x2a   :  { %791 = vmatprep.subr.bf16.mxu0 %v934_v0  ;;  %811 = vmatprep.subr.bf16.mxu1 %v934_v0 }
  0x2d   :  { %792 = vmatpush3.bf16.msra.mxu0 %v879_v13  ;;  %812 = vmatpush3.bf16.msra.mxu1 %v880_v14 }
  0x2e   :  { %793 = vmatprep.subr.bf16.mxu0 %v934_v0  ;;  %813 = vmatprep.subr.bf16.mxu1 %v934_v0 }
  0x31   :  { %794 = vmatpush3.bf16.msra.mxu0 %v881_v15  ;;  %814 = vmatpush3.bf16.msra.mxu1 %v882_v16 }
  0x32   :  { %819 = vmatprep.subr.bf16.mxu0 %v934_v0  ;;  %839 = vmatprep.subr.bf16.mxu1 %v934_v0 }
  0x34   :  { %796 = vmatmul.mubr.bf16.vlgmr.msra.gmra.mrb[0].mxu0 %v883_v17  ;;  %816 = vmatmul.mubr.bf16.vlgmr.msra.gmra.mrb[0].mxu1 %v884_v18 }
  0x35   :  { %820 = vmatpush3.bf16.msra.mxu0 %v885_v19  ;;  %840 = vmatpush3.bf16.msra.mxu1 %v886_v20 }
  0x36   :  { %821 = vmatprep.subr.bf16.mxu0 %v934_v0  ;;  %841 = vmatprep.subr.bf16.mxu1 %v934_v0 }
  0x37   :  { %835 = vmatprep.mubr.msk.bf16.mxu0 %vm935_vm0, %v934_v0  ;;  %855 = vmatprep.mubr.msk.bf16.mxu1 %vm935_vm0, %v934_v0 }
  0x39   :  { %822 = vmatpush3.bf16.msra.mxu0 %v887_v21  ;;  %842 = vmatpush3.bf16.msra.mxu1 %v888_v22  ;;  %v936_v21 = vmov 0  }
  0x3a   :  { %823 = vmatprep.subr.bf16.mxu0 %v934_v0  ;;  %843 = vmatprep.subr.bf16.mxu1 %v934_v0 }
  0x3b   :  { %865 = vset.pattern.permute.xlu0 %v936_v21  ;;  %866 = vset.pattern.permute.xlu1 %v936_v21 }
  0x3d   :  { %824 = vmatpush3.bf16.msra.mxu0 %v889_v23  ;;  %844 = vmatpush3.bf16.msra.mxu1 %v890_v24 }
  0x3e   :  { %825 = vmatprep.subr.bf16.mxu0 %v934_v0  ;;  %845 = vmatprep.subr.bf16.mxu1 %v934_v0 }
  0x41   :  { %826 = vmatpush3.bf16.msra.mxu0 %v891_v25  ;;  %846 = vmatpush3.bf16.msra.mxu1 %v892_v26 }
  0x42   :  { %827 = vmatprep.subr.bf16.mxu0 %v934_v0  ;;  %847 = vmatprep.subr.bf16.mxu1 %v934_v0 }
  0x45   :  { %828 = vmatpush3.bf16.msra.mxu0 %v893_v27  ;;  %848 = vmatpush3.bf16.msra.mxu1 %v894_v28 }
  0x46   :  { %829 = vmatprep.subr.bf16.mxu0 %v934_v0  ;;  %849 = vmatprep.subr.bf16.mxu1 %v934_v0 }
  0x49   :  { %830 = vmatpush3.bf16.msra.mxu0 %v895_v29  ;;  %850 = vmatpush3.bf16.msra.mxu1 %v896_v30 }
  0x4a   :  { %831 = vmatprep.subr.bf16.mxu0 %v934_v0  ;;  %851 = vmatprep.subr.bf16.mxu1 %v934_v0 }
  0x4d   :  { %832 = vmatpush3.bf16.msra.mxu0 %v897_v31  ;;  %852 = vmatpush3.bf16.msra.mxu1 %v898_v32 }
  0x4e   :  { %833 = vmatprep.subr.bf16.mxu0 %v934_v0  ;;  %853 = vmatprep.subr.bf16.mxu1 %v934_v0 }
  0x51   :  { %834 = vmatpush3.bf16.msra.mxu0 %v899_v33  ;;  %854 = vmatpush3.bf16.msra.mxu1 %v900_v34 }
  0x54   :  { %836 = vmatmul.mubr.bf16.vlgmr.msra.gmra.mrb[4].mxu0 %v901_v35  ;;  %856 = vmatmul.mubr.bf16.vlgmr.msra.gmra.mrb[4].mxu1 %v902_v36 }
 0x107   :  { %v1110_v37 = vpop.f32.mrb[0].mxu0  ;;  %v1112_v38 = vpop.f32.mrb[0].mxu1 }
 0x108   :  { %145 = vadd.xlane.f32.xlu0 %v1110_v37  ;;  %v797_v39 = vpop.f32.mrb[1].mxu0  ;;  %265 = vadd.xlane.f32.xlu1 %v1112_v38  ;;  %v817_v41 = vpop.f32.mrb[1].mxu1 }
 0x109   :  { %v1116_v40 = vpop.f32.mrb[2].mxu0  ;;  %v1118_v43 = vpop.f32.mrb[2].mxu1 }
 0x10a   :  { %v798_v42 = vpop.f32.mrb[3].mxu0  ;;  %v818_v44 = vpop.f32.mrb[3].mxu1 }
 0x10b   :  { %v554_v44 = vld [vmem:[%s1176_s2] sm:$0xff] }
 0x10c   :  { %147 = vadd.xlane.f32.xlu0 %v1116_v40  ;;  %267 = vadd.xlane.f32.xlu1 %v1118_v43 }
 0x127   :  { %v1122_v45 = vpop.f32.mrb[4].mxu0  ;;  %v1124_v46 = vpop.f32.mrb[4].mxu1 }
 0x128   :  { %385 = vadd.xlane.f32.xlu0 %v1122_v45  ;;  %v837_v47 = vpop.f32.mrb[5].mxu0  ;;  %v857_v49 = vpop.f32.mrb[5].mxu1 }
 0x129   :  { %v1127_v48 = vpop.f32.mrb[6].mxu0  ;;  %v1129_v50 = vpop.f32.mrb[6].mxu1  ;;  %v555_v49 = vld [vmem:[%s1176_s2 + $0x8] sm:$0xff] }
 0x12a   :  { %387 = vadd.xlane.f32.xlu1 %v1127_v48  ;;  %v838_v51 = vpop.f32.mrb[7].mxu0  ;;  %v858_v52 = vpop.f32.mrb[7].mxu1 }
 0x12c   :  { %505 = vadd.xlane.f32.xlu0 %v1124_v46 }
 0x12e   :  { %507 = vadd.xlane.f32.xlu1 %v1129_v50 }
 0x195   :  { %v146_v53 = vpop.xlane.xlu0 %145  ;;  %v266_v54 = vpop.xlane.xlu1 %265 }
 0x196   :  { %v269_v58 = vadd.f32 %v266_v54, %v146_v53 }
 0x199   :  { %v148_v55 = vpop.xlane.xlu0 %147  ;;  %v268_v56 = vpop.xlane.xlu1 %267 }
 0x19a   :  { %v270_v60 = vadd.f32 %v268_v56, %v148_v55  ;;  %v564_v55 = vld [vmem:[%s1177_s3] sm:$0xff] }
 0x1b5   :  { %v386_v57 = vpop.xlane.xlu0 %385 }
 0x1b6   :  { %v389_v61 = vadd.f32 %v386_v57, %v269_v58  ;;  %v565_v58 = vld [vmem:[%s1177_s3 + $0x8] sm:$0xff] }
 0x1b7   :  { %v388_v59 = vpop.xlane.xlu1 %387 }
 0x1b8   :  { %v390_v63 = vadd.f32 %v388_v59, %v270_v60 }
 0x1b9   :  { %v506_v62 = vpop.xlane.xlu0 %505 }
 0x1ba   :  { %v509_v0 = vadd.f32 %v506_v62, %v389_v61 }
 0x1bb   :  { %v508_v1 = vpop.xlane.xlu1 %507 }
 0x1bc   :  { %v512_v2 = vmul.f32 0.001953125, %v509_v0  ;;  %v510_v3 = vadd.f32 %v508_v1, %v390_v63 }
 0x1be   :  { %v513_v4 = vmul.f32 0.001953125, %v510_v3  ;;  %v514_v5 = vsub.f32 %v1110_v37, %v512_v2  ;;  %v524_v8 = vsub.f32 %v1112_v38, %v512_v2  ;;  %v534_v12 = vsub.f32 %v1122_v45, %v512_v2 }
 0x1bf   :  { %v544_v16 = vsub.f32 %v1124_v46, %v512_v2 }
 0x1c0   :  { %v516_v6 = vmul.f32 %v514_v5, %v514_v5  ;;  %v515_v7 = vsub.f32 %v1116_v40, %v513_v4  ;;  %v525_v10 = vsub.f32 %v1118_v43, %v513_v4  ;;  %v526_v11 = vmul.f32 %v524_v8, %v524_v8 }
 0x1c1   :  { %v535_v14 = vsub.f32 %v1127_v48, %v513_v4  ;;  %v536_v15 = vmul.f32 %v534_v12, %v534_v12  ;;  %v545_v18 = vsub.f32 %v1129_v50, %v513_v4  ;;  %v546_v19 = vmul.f32 %v544_v16, %v544_v16 }
 0x1c2   :  { %518 = vadd.xlane.f32.xlu0 %v516_v6  ;;  %v517_v9 = vmul.f32 %v515_v7, %v515_v7  ;;  %v527_v13 = vmul.f32 %v525_v10, %v525_v10 }
 0x1c3   :  { %v537_v17 = vmul.f32 %v535_v14, %v535_v14  ;;  %v547_v20 = vmul.f32 %v545_v18, %v545_v18 }
 0x1c4   :  { %520 = vadd.xlane.f32.xlu1 %v517_v9 }
 0x1c6   :  { %528 = vadd.xlane.f32.xlu0 %v526_v11 }
 0x1c8   :  { %530 = vadd.xlane.f32.xlu1 %v527_v13 }
 0x1ca   :  { %538 = vadd.xlane.f32.xlu0 %v536_v15 }
 0x1cc   :  { %540 = vadd.xlane.f32.xlu1 %v537_v17 }
 0x1ce   :  { %548 = vadd.xlane.f32.xlu0 %v546_v19 }
 0x1d0   :  { %550 = vadd.xlane.f32.xlu1 %v547_v20 }
 0x24f   :  { %v519_v22 = vpop.xlane.xlu0 %518 }
 0x251   :  { %v521_v23 = vpop.xlane.xlu1 %520 }
 0x253   :  { %v529_v24 = vpop.xlane.xlu0 %528 }
 0x254   :  { %v532_v27 = vadd.f32 %v529_v24, %v519_v22 }
 0x255   :  { %v531_v25 = vpop.xlane.xlu1 %530 }
 0x256   :  { %v533_v29 = vadd.f32 %v531_v25, %v521_v23 }
 0x257   :  { %v539_v26 = vpop.xlane.xlu0 %538 }
 0x258   :  { %v542_v30 = vadd.f32 %v539_v26, %v532_v27 }
 0x259   :  { %v541_v28 = vpop.xlane.xlu1 %540 }
 0x25a   :  { %v543_v32 = vadd.f32 %v541_v28, %v533_v29 }
 0x25b   :  { %v549_v31 = vpop.xlane.xlu0 %548 }
 0x25c   :  { %v552_v33 = vadd.f32 %v549_v31, %v542_v30 }
 0x25d   :  { %v551_v34 = vpop.xlane.xlu1 %550 }
 0x25e   :  { %v556_v35 = vmul.f32 0.001953125, %v552_v33  ;;  %v553_v36 = vadd.f32 %v551_v34, %v543_v32 }
 0x260   :  { %v558_v39 = vadd.f32 1e-05, %v556_v35  ;;  %v557_v41 = vmul.f32 0.001953125, %v553_v36 }
 0x262   :  { %903 = vrsqrt.f32 %v558_v39  ;;  %v559_v42 = vadd.f32 1e-05, %v557_v41 }
 0x264   :  { %905 = vrsqrt.f32 %v559_v42 }
 0x26c   :  { %v904_v47 = vpop.eup %903 }
 0x26d   :  { %v562_v51 = vmul.f32 %v904_v47, %v554_v44 }
 0x26e   :  { %v906_v52 = vpop.eup %905 }
 0x26f   :  { %572 = vperm.xlu0 %865, %v562_v51   ;;  %v563_v53 = vmul.f32 %v906_v52, %v555_v49  ;;  %v566_v54 = vmul.f32 %v562_v51, %v512_v2 }
 0x271   :  { %577 = vperm.xlu1 %866, %v563_v53   ;;  %v568_v56 = vsub.f32 %v564_v55, %v566_v54  ;;  %v567_v57 = vmul.f32 %v563_v53, %v513_v4 }
 0x273   :  { %v569_v59 = vsub.f32 %v565_v58, %v567_v57 }
 0x275   :  { %584 = vperm.xlu1 %866, %v568_v56  }
 0x279   :  { %589 = vperm.xlu1 %866, %v569_v59  }
 0x2ee   :  { %v573_v61 = vpop.permute.xlu0 %572 }
 0x2ef   :  { %v580_v62 = vmul.f32 %v573_v61, %v1110_v37  ;;  %v606_v63 = vmul.f32 %v573_v61, %v1112_v38  ;;  %v623_v0 = vmul.f32 %v573_v61, %v1122_v45  ;;  %v640_v1 = vmul.f32 %v573_v61, %v1124_v46 }
 0x2f0   :  { %v578_v60 = vpop.permute.xlu1 %577 }
 0x2f1   :  { %v581_v7 = vmul.f32 %v578_v60, %v1116_v40  ;;  %v607_v8 = vmul.f32 %v578_v60, %v1118_v43  ;;  %v624_v9 = vmul.f32 %v578_v60, %v1127_v48  ;;  %v641_v10 = vmul.f32 %v578_v60, %v1129_v50 }
 0x2f4   :  { %v585_v2 = vpop.permute.xlu1 %584 }
 0x2f5   :  { %v592_v3 = vadd.f32 %v585_v2, %v580_v62  ;;  %v608_v4 = vadd.f32 %v606_v63, %v585_v2  ;;  %v625_v5 = vadd.f32 %v623_v0, %v585_v2  ;;  %v642_v6 = vadd.f32 %v640_v1, %v585_v2 }
 0x2f7   :  { %v594_v13 = vmax.f32 %v592_v3, 0.0  ;;  %v610_v46 = vmax.f32 %v608_v4, 0.0  ;;  %v627_v14 = vmax.f32 %v625_v5, 0.0  ;;  %v644_v15 = vmax.f32 %v642_v6, 0.0 }
 0x2f8   :  { %v590_v37 = vpop.permute.xlu1 %589 }
 0x2f9   :  { %v593_v11 = vadd.f32 %v590_v37, %v581_v7  ;;  %v609_v38 = vadd.f32 %v607_v8, %v590_v37  ;;  %v626_v12 = vadd.f32 %v624_v9, %v590_v37  ;;  %v643_v45 = vadd.f32 %v641_v10, %v590_v37 }
 0x2fb   :  { %v595_v16 = vmax.f32 %v593_v11, 0.0  ;;  %v611_v17 = vmax.f32 %v609_v38, 0.0  ;;  %v628_v18 = vmax.f32 %v626_v12, 0.0  ;;  %v645_v19 = vmax.f32 %v643_v45, 0.0 }
 0x2fd   :  { %v723_v40 = vpack.c.bf16 %v595_v16, %v594_v13  ;;  %v728_v20 = vpack.c.bf16 %v611_v17, %v610_v46  ;;  %v733_v43 = vpack.c.bf16 %v628_v18, %v627_v14  ;;  %v738_v21 = vpack.c.bf16 %v645_v19, %v644_v15 }
 0x2ff   :  { %724 = vst [vmem:[%s1178_s4] sm:$0xff] %v723_v40   ;;  %740 = vst [vmem:[%s1178_s4 + $0x8] sm:$0xff] %v728_v20  }
 0x300   :  { %741 = vst [vmem:[%s1178_s4 + $0x10] sm:$0xff] %v733_v43   ;;  %742 = vst [vmem:[%s1178_s4 + $0x18] sm:$0xff] %v738_v21  }
 0x301   :  { %661 = vsyncpa [#allocation3], 1 }

// kernel: generator_forward.8
= control target key start
LH: loop header
LB: loop body
LE: loop exit
PB: predicated region body
PF: predicated region fallthrough
CT: control target
= control target key end

     0   :  { %v1151_v1 = vmov 0   ;;  %vm115_vm0 = vcmask 523264   ;;  %s1480_s0 = inlined_call_operand.vmem [shape: bf16[192,512], index: 0, kind: input, shape index: {}]   ;;  %s1481_s1 = inlined_call_operand.vmem [shape: bf16[4,8,64], index: 1, kind: input, shape index: {}]   ;;  %s1482_s2 = inlined_call_operand.vmem [shape: f32[8,1], index: 2, kind: input, shape index: {}]   ;;  %s1483_s3 = inlined_call_operand.vmem [shape: f32[8,1], index: 3, kind: input, shape index: {}]   ;;  %s1484_s4 = inlined_call_operand.vmem [shape: bf16[4,8,512], index: 4, kind: output, shape index: {}]  }
   0x1   :  { %v1077_v0 = vld [vmem:[%s1480_s0 + $0x4] ss:$16 sps:$4 sm:$0xff]   ;;  %151 = vmatprep.mubr.bf16.mxu0 %v1151_v1  ;;  %192 = vmatprep.mubr.bf16.mxu1 %v1151_v1  ;;  %v1079_v2 = vld [vmem:[%s1480_s0 + $0xc] ss:$16 sps:$4 sm:$0xff]   ;;  %v1081_v3 = vld [vmem:[%s1480_s0] ss:$16 sps:$4 sm:$0xff]  }
   0x2   :  { %1075 = vset.pattern.permute.xlu0 %v1151_v1  ;;  %1076 = vset.pattern.permute.xlu1 %v1151_v1  ;;  %v1082_v4 = vld [vmem:[%s1480_s0 + $0x8] ss:$16 sps:$4 sm:$0xff]   ;;  %v1083_v5 = vld [vmem:[%s1480_s0 + $0x24] ss:$16 sps:$4 sm:$0xff]   ;;  %v1085_v6 = vld [vmem:[%s1480_s0 + $0x2c] ss:$16 sps:$4 sm:$0xff]  }
   0x3   :  { %119 = vmatprep.subr.bf16.mxu0 %v1077_v0  ;;  %160 = vmatprep.subr.bf16.mxu1 %v1079_v2  ;;  %v1087_v7 = vld [vmem:[%s1480_s0 + $0x20] ss:$16 sps:$4 sm:$0xff]   ;;  %v1088_v8 = vld [vmem:[%s1480_s0 + $0x28] ss:$16 sps:$4 sm:$0xff]   ;;  %v1089_v9 = vld [vmem:[%s1480_s0 + $0x44] ss:$16 sps:$4 sm:$0xff]  }
   0x4   :  { %120 = vmatpush1.bf16.msra.mxu0 %v1081_v3  ;;  %161 = vmatpush1.bf16.msra.mxu1 %v1082_v4  ;;  %v1091_v10 = vld [vmem:[%s1480_s0 + $0x4c] ss:$16 sps:$4 sm:$0xff]   ;;  %v1093_v11 = vld [vmem:[%s1480_s0 + $0x40] ss:$16 sps:$4 sm:$0xff]   ;;  %v1094_v12 = vld [vmem:[%s1480_s0 + $0x48] ss:$16 sps:$4 sm:$0xff]  }
   0x5   :  { %121 = vmatprep.subr.bf16.mxu0 %v1083_v5  ;;  %162 = vmatprep.subr.bf16.mxu1 %v1085_v6  ;;  %v1095_v13 = vld [vmem:[%s1480_s0 + $0x64] ss:$16 sps:$4 sm:$0xff]   ;;  %v1097_v14 = vld [vmem:[%s1480_s0 + $0x6c] ss:$16 sps:$4 sm:$0xff]   ;;  %v1099_v15 = vld [vmem:[%s1480_s0 + $0x60] ss:$16 sps:$4 sm:$0xff]  }
   0x6   :  { %v1100_v16 = vld [vmem:[%s1480_s0 + $0x68] ss:$16 sps:$4 sm:$0xff]   ;;  %v34_v17 = vld [vmem:[%s1481_s1] sm:$0xf]  ;;  %v1103_v18 = vld [vmem:[%s1480_s0 + $0x84] ss:$16 sps:$4 sm:$0xff]  }
   0x7   :  { %v1106_v19 = vld [vmem:[%s1480_s0 + $0x8c] ss:$16 sps:$4 sm:$0xff]   ;;  %v1101_v20 = vld [vmem:[%s1480_s0 + $0x80] ss:$16 sps:$4 sm:$0xff]   ;;  %v1104_v21 = vld [vmem:[%s1480_s0 + $0x88] ss:$16 sps:$4 sm:$0xff]  }
   0x8   :  { %122 = vmatpush1.bf16.msra.mxu0 %v1087_v7  ;;  %163 = vmatpush1.bf16.msra.mxu1 %v1088_v8  ;;  %v1109_v22 = vld [vmem:[%s1480_s0 + $0xa4] ss:$16 sps:$4 sm:$0xff]   ;;  %v1112_v23 = vld [vmem:[%s1480_s0 + $0xac] ss:$16 sps:$4 sm:$0xff]   ;;  %v1107_v24 = vld [vmem:[%s1480_s0 + $0xa0] ss:$16 sps:$4 sm:$0xff]  }
   0x9   :  { %123 = vmatprep.subr.bf16.mxu0 %v1089_v9  ;;  %164 = vmatprep.subr.bf16.mxu1 %v1091_v10  ;;  %v1110_v25 = vld [vmem:[%s1480_s0 + $0xa8] ss:$16 sps:$4 sm:$0xff]   ;;  %v1115_v26 = vld [vmem:[%s1480_s0 + $0xc4] ss:$16 sps:$4 sm:$0xff]   ;;  %v1118_v27 = vld [vmem:[%s1480_s0 + $0xcc] ss:$16 sps:$4 sm:$0xff]  }
   0xa   :  { %v995_v28 = vld [vmem:[%s1481_s1 + $0x4] sm:$0xf]  ;;  %v1113_v29 = vld [vmem:[%s1480_s0 + $0xc0] ss:$16 sps:$4 sm:$0xff]   ;;  %v1116_v30 = vld [vmem:[%s1480_s0 + $0xc8] ss:$16 sps:$4 sm:$0xff]  }
   0xb   :  { %v1121_v31 = vld [vmem:[%s1480_s0 + $0xe4] ss:$16 sps:$4 sm:$0xff]   ;;  %v1124_v32 = vld [vmem:[%s1480_s0 + $0xec] ss:$16 sps:$4 sm:$0xff]   ;;  %v1119_v33 = vld [vmem:[%s1480_s0 + $0xe0] ss:$16 sps:$4 sm:$0xff]  }
   0xc   :  { %124 = vmatpush1.bf16.msra.mxu0 %v1093_v11  ;;  %165 = vmatpush1.bf16.msra.mxu1 %v1094_v12  ;;  %v1122_v34 = vld [vmem:[%s1480_s0 + $0xe8] ss:$16 sps:$4 sm:$0xff]   ;;  %v1127_v35 = vld [vmem:[%s1480_s0 + $0x104] ss:$16 sps:$4 sm:$0xff]   ;;  %v1130_v36 = vld [vmem:[%s1480_s0 + $0x10c] ss:$16 sps:$4 sm:$0xff]  }
   0xd   :  { %125 = vmatprep.subr.bf16.mxu0 %v1095_v13  ;;  %166 = vmatprep.subr.bf16.mxu1 %v1097_v14  ;;  %v1125_v37 = vld [vmem:[%s1480_s0 + $0x100] ss:$16 sps:$4 sm:$0xff]   ;;  %v1128_v38 = vld [vmem:[%s1480_s0 + $0x108] ss:$16 sps:$4 sm:$0xff]   ;;  %v1133_v39 = vld [vmem:[%s1480_s0 + $0x124] ss:$16 sps:$4 sm:$0xff]  }
   0xe   :  { %v1136_v40 = vld [vmem:[%s1480_s0 + $0x12c] ss:$16 sps:$4 sm:$0xff]   ;;  %v1131_v41 = vld [vmem:[%s1480_s0 + $0x120] ss:$16 sps:$4 sm:$0xff]   ;;  %v1134_v42 = vld [vmem:[%s1480_s0 + $0x128] ss:$16 sps:$4 sm:$0xff]  }
   0xf   :  { %v1014_v43 = vld [vmem:[%s1481_s1 + $0x8] sm:$0xf]  ;;  %v1139_v44 = vld [vmem:[%s1480_s0 + $0x144] ss:$16 sps:$4 sm:$0xff]   ;;  %v1142_v45 = vld [vmem:[%s1480_s0 + $0x14c] ss:$16 sps:$4 sm:$0xff]  }
  0x10   :  { %126 = vmatpush1.bf16.msra.mxu0 %v1099_v15  ;;  %167 = vmatpush1.bf16.msra.mxu1 %v1100_v16  ;;  %v1137_v46 = vld [vmem:[%s1480_s0 + $0x140] ss:$16 sps:$4 sm:$0xff]   ;;  %v1140_v47 = vld [vmem:[%s1480_s0 + $0x148] ss:$16 sps:$4 sm:$0xff]   ;;  %v1145_v48 = vld [vmem:[%s1480_s0 + $0x164] ss:$16 sps:$4 sm:$0xff]  }
  0x11   :  { %308 = vmatprep.subr.bf16.mxu0 %v1089_v9  ;;  %349 = vmatprep.subr.bf16.mxu1 %v1091_v10  ;;  %v1148_v49 = vld [vmem:[%s1480_s0 + $0x16c] ss:$16 sps:$4 sm:$0xff]   ;;  %v1143_v50 = vld [vmem:[%s1480_s0 + $0x160] ss:$16 sps:$4 sm:$0xff]   ;;  %v1146_v51 = vld [vmem:[%s1480_s0 + $0x168] ss:$16 sps:$4 sm:$0xff]  }
  0x12   :  { %v1033_v52 = vld [vmem:[%s1481_s1 + $0xc] sm:$0xf] }
  0x13   :  { %993 = vmatmul.mubr.msk.bf16.vlgmr.msra.gmra.mrb[0].mxu0 %vm115_vm0, %v34_v17  ;;  %994 = vmatmul.mubr.msk.bf16.vlgmr.msra.gmra.mrb[0].mxu1 %vm115_vm0, %v34_v17 }
  0x14   :  { %309 = vmatpush1.bf16.msra.mxu0 %v1093_v11  ;;  %350 = vmatpush1.bf16.msra.mxu1 %v1094_v12 }
  0x15   :  { %310 = vmatprep.subr.bf16.mxu0 %v1095_v13  ;;  %351 = vmatprep.subr.bf16.mxu1 %v1097_v14 }
  0x16   :  { %340 = vmatprep.mubr.bf16.mxu0 %v1151_v1  ;;  %381 = vmatprep.mubr.bf16.mxu1 %v1151_v1 }
  0x18   :  { %311 = vmatpush1.bf16.msra.mxu0 %v1099_v15  ;;  %352 = vmatpush1.bf16.msra.mxu1 %v1100_v16 }
  0x19   :  { %312 = vmatprep.subr.bf16.mxu0 %v1103_v18  ;;  %353 = vmatprep.subr.bf16.mxu1 %v1106_v19 }
  0x1c   :  { %313 = vmatpush1.bf16.msra.mxu0 %v1101_v20  ;;  %354 = vmatpush1.bf16.msra.mxu1 %v1104_v21 }
  0x1d   :  { %314 = vmatprep.subr.bf16.mxu0 %v1109_v22  ;;  %355 = vmatprep.subr.bf16.mxu1 %v1112_v23 }
  0x20   :  { %315 = vmatpush1.bf16.msra.mxu0 %v1107_v24  ;;  %356 = vmatpush1.bf16.msra.mxu1 %v1110_v25 }
  0x21   :  { %497 = vmatprep.subr.bf16.mxu0 %v1115_v26  ;;  %538 = vmatprep.subr.bf16.mxu1 %v1118_v27 }
  0x23   :  { %1012 = vmatmul.mubr.msk.bf16.vlgmr.msra.gmra.mrb[4].mxu0 %vm115_vm0, %v995_v28  ;;  %1013 = vmatmul.mubr.msk.bf16.vlgmr.msra.gmra.mrb[4].mxu1 %vm115_vm0, %v995_v28 }
  0x24   :  { %498 = vmatpush1.bf16.msra.mxu0 %v1113_v29  ;;  %539 = vmatpush1.bf16.msra.mxu1 %v1116_v30 }
  0x25   :  { %499 = vmatprep.subr.bf16.mxu0 %v1121_v31  ;;  %540 = vmatprep.subr.bf16.mxu1 %v1124_v32 }
  0x26   :  { %529 = vmatprep.mubr.bf16.mxu0 %v1151_v1  ;;  %570 = vmatprep.mubr.bf16.mxu1 %v1151_v1 }
  0x28   :  { %500 = vmatpush1.bf16.msra.mxu0 %v1119_v33  ;;  %541 = vmatpush1.bf16.msra.mxu1 %v1122_v34 }
  0x29   :  { %501 = vmatprep.subr.bf16.mxu0 %v1127_v35  ;;  %542 = vmatprep.subr.bf16.mxu1 %v1130_v36 }
  0x2c   :  { %502 = vmatpush1.bf16.msra.mxu0 %v1125_v37  ;;  %543 = vmatpush1.bf16.msra.mxu1 %v1128_v38 }
  0x2d   :  { %503 = vmatprep.subr.bf16.mxu0 %v1133_v39  ;;  %544 = vmatprep.subr.bf16.mxu1 %v1136_v40 }
  0x30   :  { %504 = vmatpush1.bf16.msra.mxu0 %v1131_v41  ;;  %545 = vmatpush1.bf16.msra.mxu1 %v1134_v42 }
  0x31   :  { %686 = vmatprep.subr.bf16.mxu0 %v1127_v35  ;;  %727 = vmatprep.subr.bf16.mxu1 %v1130_v36 }
  0x33   :  { %1031 = vmatmul.mubr.msk.bf16.vlgmr.msra.gmra.mrb[8].mxu0 %vm115_vm0, %v1014_v43  ;;  %1032 = vmatmul.mubr.msk.bf16.vlgmr.msra.gmra.mrb[8].mxu1 %vm115_vm0, %v1014_v43 }
  0x34   :  { %687 = vmatpush1.bf16.msra.mxu0 %v1125_v37  ;;  %728 = vmatpush1.bf16.msra.mxu1 %v1128_v38 }
  0x35   :  { %688 = vmatprep.subr.bf16.mxu0 %v1133_v39  ;;  %729 = vmatprep.subr.bf16.mxu1 %v1136_v40 }
  0x36   :  { %718 = vmatprep.mubr.bf16.mxu0 %v1151_v1  ;;  %759 = vmatprep.mubr.bf16.mxu1 %v1151_v1 }
  0x38   :  { %689 = vmatpush1.bf16.msra.mxu0 %v1131_v41  ;;  %730 = vmatpush1.bf16.msra.mxu1 %v1134_v42 }
  0x39   :  { %690 = vmatprep.subr.bf16.mxu0 %v1139_v44  ;;  %731 = vmatprep.subr.bf16.mxu1 %v1142_v45 }
  0x3c   :  { %691 = vmatpush1.bf16.msra.mxu0 %v1137_v46  ;;  %732 = vmatpush1.bf16.msra.mxu1 %v1140_v47 }
  0x3d   :  { %692 = vmatprep.subr.bf16.mxu0 %v1145_v48  ;;  %733 = vmatprep.subr.bf16.mxu1 %v1148_v49 }
  0x40   :  { %693 = vmatpush1.bf16.msra.mxu0 %v1143_v50  ;;  %734 = vmatpush1.bf16.msra.mxu1 %v1146_v51 }
  0x43   :  { %1050 = vmatmul.mubr.msk.bf16.vlgmr.msra.gmra.mrb[12].mxu0 %vm115_vm0, %v1033_v52  ;;  %1051 = vmatmul.mubr.msk.bf16.vlgmr.msra.gmra.mrb[12].mxu1 %vm115_vm0, %v1033_v52 }
  0xe6   :  { %v1351_v53 = vpop.f32.mrb[0].mxu0  ;;  %v1353_v54 = vpop.f32.mrb[0].mxu1 }
  0xe7   :  { %v1355_v55 = vpop.f32.mrb[1].mxu0  ;;  %v1357_v56 = vpop.f32.mrb[1].mxu1 }
  0xe8   :  { %v201_v57 = vadd.f32 %v1355_v55, %v1351_v53  ;;  %v157_v58 = vpop.f32.mrb[2].mxu0  ;;  %v198_v59 = vpop.f32.mrb[2].mxu1 }
  0xe9   :  { %v158_v60 = vpop.f32.mrb[3].mxu0  ;;  %v199_v61 = vpop.f32.mrb[3].mxu1 }
  0xea   :  { %v202_v62 = vadd.f32 %v201_v57, %v1353_v54 }
  0xec   :  { %v203_v63 = vadd.f32 %v202_v62, %v1357_v56 }
  0xee   :  { %204 = vadd.xlane.f32.xlu0 %v203_v63 }
  0xf6   :  { %v1363_v0 = vpop.f32.mrb[4].mxu0  ;;  %v1365_v1 = vpop.f32.mrb[4].mxu1 }
  0xf7   :  { %v1367_v2 = vpop.f32.mrb[5].mxu0  ;;  %v1369_v3 = vpop.f32.mrb[5].mxu1 }
  0xf8   :  { %v390_v4 = vadd.f32 %v1367_v2, %v1363_v0  ;;  %v346_v5 = vpop.f32.mrb[6].mxu0  ;;  %v387_v6 = vpop.f32.mrb[6].mxu1 }
  0xf9   :  { %v347_v7 = vpop.f32.mrb[7].mxu0  ;;  %v388_v8 = vpop.f32.mrb[7].mxu1 }
  0xfa   :  { %v391_v9 = vadd.f32 %v390_v4, %v1365_v1 }
  0xfc   :  { %v392_v10 = vadd.f32 %v391_v9, %v1369_v3 }
  0xfe   :  { %393 = vadd.xlane.f32.xlu0 %v392_v10 }
 0x106   :  { %v1375_v11 = vpop.f32.mrb[8].mxu0  ;;  %v1377_v12 = vpop.f32.mrb[8].mxu1 }
 0x107   :  { %v1379_v13 = vpop.f32.mrb[9].mxu0  ;;  %v1381_v14 = vpop.f32.mrb[9].mxu1 }
 0x108   :  { %v579_v15 = vadd.f32 %v1379_v13, %v1375_v11  ;;  %v535_v16 = vpop.f32.mrb[10].mxu0  ;;  %v576_v17 = vpop.f32.mrb[10].mxu1 }
 0x109   :  { %v536_v18 = vpop.f32.mrb[11].mxu0  ;;  %v577_v19 = vpop.f32.mrb[11].mxu1 }
 0x10a   :  { %v580_v20 = vadd.f32 %v579_v15, %v1377_v12 }
 0x10c   :  { %v581_v21 = vadd.f32 %v580_v20, %v1381_v14 }
 0x10e   :  { %582 = vadd.xlane.f32.xlu1 %v581_v21 }
 0x116   :  { %v1387_v22 = vpop.f32.mrb[12].mxu0  ;;  %v1389_v23 = vpop.f32.mrb[12].mxu1 }
 0x117   :  { %v1391_v24 = vpop.f32.mrb[13].mxu0  ;;  %v1393_v25 = vpop.f32.mrb[13].mxu1 }
 0x118   :  { %v768_v26 = vadd.f32 %v1391_v24, %v1387_v22  ;;  %v724_v27 = vpop.f32.mrb[14].mxu0  ;;  %v765_v28 = vpop.f32.mrb[14].mxu1 }
 0x119   :  { %v725_v29 = vpop.f32.mrb[15].mxu0  ;;  %v766_v30 = vpop.f32.mrb[15].mxu1 }
 0x11a   :  { %v769_v31 = vadd.f32 %v768_v26, %v1389_v23 }
 0x11c   :  { %v770_v32 = vadd.f32 %v769_v31, %v1393_v25 }
 0x11e   :  { %771 = vadd.xlane.f32.xlu1 %v770_v32 }
 0x17b   :  { %v205_v33 = vpop.xlane.xlu0 %204 }
 0x18b   :  { %v394_v34 = vpop.xlane.xlu0 %393 }
 0x18c   :  { %v395_v36 = vadd.f32 %v394_v34, %v205_v33 }
 0x19b   :  { %v583_v35 = vpop.xlane.xlu1 %582 }
 0x19c   :  { %v584_v37 = vadd.f32 %v583_v35, %v395_v36 }
 0x1ab   :  { %v772_v38 = vpop.xlane.xlu1 %771 }
 0x1ac   :  { %v773_v39 = vadd.f32 %v772_v38, %v584_v37 }
 0x1ae   :  { %v1399_v40 = vmul.f32 0.00048828125, %v773_v39 }
 0x1b0   :  { %v790_v41 = vsub.f32 %v1363_v0, %v1399_v40  ;;  %v791_v42 = vsub.f32 %v1367_v2, %v1399_v40  ;;  %v792_v43 = vsub.f32 %v1365_v1, %v1399_v40  ;;  %v793_v44 = vsub.f32 %v1369_v3, %v1399_v40 }
 0x1b1   :  { %v776_v45 = vsub.f32 %v1351_v53, %v1399_v40  ;;  %v777_v46 = vsub.f32 %v1355_v55, %v1399_v40  ;;  %v778_v47 = vsub.f32 %v1353_v54, %v1399_v40  ;;  %v779_v48 = vsub.f32 %v1357_v56, %v1399_v40 }
 0x1b2   :  { %v794_v49 = vmul.f32 %v790_v41, %v790_v41  ;;  %v795_v50 = vmul.f32 %v791_v42, %v791_v42  ;;  %v796_v51 = vmul.f32 %v792_v43, %v792_v43  ;;  %v797_v52 = vmul.f32 %v793_v44, %v793_v44 }
 0x1b3   :  { %v780_v57 = vmul.f32 %v776_v45, %v776_v45  ;;  %v781_v58 = vmul.f32 %v777_v46, %v777_v46  ;;  %v782_v59 = vmul.f32 %v778_v47, %v778_v47  ;;  %v818_v61 = vsub.f32 %v1387_v22, %v1399_v40  ;;  %v832_v47 = vld [vmem:[%s1482_s2] sm:$0xff] }
 0x1b4   :  { %v798_v60 = vadd.f32 %v795_v50, %v794_v49  ;;  %v819_v62 = vsub.f32 %v1391_v24, %v1399_v40  ;;  %v820_v63 = vsub.f32 %v1389_v23, %v1399_v40  ;;  %v783_v4 = vmul.f32 %v779_v48, %v779_v48  ;;  %v837_v50 = vld [vmem:[%s1483_s3] sm:$0xff] }
 0x1b5   :  { %v784_v5 = vadd.f32 %v781_v58, %v780_v57  ;;  %v804_v6 = vsub.f32 %v1375_v11, %v1399_v40  ;;  %v805_v7 = vsub.f32 %v1379_v13, %v1399_v40  ;;  %v821_v9 = vsub.f32 %v1393_v25, %v1399_v40 }
 0x1b6   :  { %v799_v8 = vadd.f32 %v798_v60, %v796_v51  ;;  %v822_v10 = vmul.f32 %v818_v61, %v818_v61  ;;  %v823_v15 = vmul.f32 %v819_v62, %v819_v62  ;;  %v824_v17 = vmul.f32 %v820_v63, %v820_v63 }
 0x1b7   :  { %v785_v16 = vadd.f32 %v784_v5, %v782_v59  ;;  %v806_v18 = vsub.f32 %v1377_v12, %v1399_v40  ;;  %v807_v19 = vsub.f32 %v1381_v14, %v1399_v40  ;;  %v808_v26 = vmul.f32 %v804_v6, %v804_v6 }
 0x1b8   :  { %v800_v20 = vadd.f32 %v799_v8, %v797_v52  ;;  %v826_v21 = vadd.f32 %v823_v15, %v822_v10  ;;  %v809_v27 = vmul.f32 %v805_v7, %v805_v7  ;;  %v825_v29 = vmul.f32 %v821_v9, %v821_v9 }
 0x1b9   :  { %v786_v28 = vadd.f32 %v785_v16, %v783_v4  ;;  %v810_v31 = vmul.f32 %v806_v18, %v806_v18  ;;  %v811_v34 = vmul.f32 %v807_v19, %v807_v19 }
 0x1ba   :  { %801 = vadd.xlane.f32.xlu1 %v800_v20  ;;  %v827_v30 = vadd.f32 %v826_v21, %v824_v17  ;;  %v812_v32 = vadd.f32 %v809_v27, %v808_v26 }
 0x1bb   :  { %787 = vadd.xlane.f32.xlu0 %v786_v28 }
 0x1bc   :  { %v828_v33 = vadd.f32 %v827_v30, %v825_v29  ;;  %v813_v35 = vadd.f32 %v812_v32, %v810_v31 }
 0x1be   :  { %829 = vadd.xlane.f32.xlu1 %v828_v33  ;;  %v814_v36 = vadd.f32 %v813_v35, %v811_v34 }
 0x1c0   :  { %815 = vadd.xlane.f32.xlu0 %v814_v36 }
 0x247   :  { %v802_v38 = vpop.xlane.xlu1 %801 }
 0x248   :  { %v788_v37 = vpop.xlane.xlu0 %787 }
 0x249   :  { %v803_v39 = vadd.f32 %v802_v38, %v788_v37 }
 0x24b   :  { %v830_v43 = vpop.xlane.xlu1 %829 }
 0x24d   :  { %v816_v41 = vpop.xlane.xlu0 %815 }
 0x24e   :  { %v817_v42 = vadd.f32 %v816_v41, %v803_v39 }
 0x250   :  { %v831_v44 = vadd.f32 %v830_v43, %v817_v42 }
 0x252   :  { %v833_v45 = vmul.f32 0.00048828125, %v831_v44 }
 0x254   :  { %v834_v46 = vadd.f32 1e-05, %v833_v45 }
 0x256   :  { %1149 = vrsqrt.f32 %v834_v46 }
 0x260   :  { %v1150_v48 = vpop.eup %1149 }
 0x261   :  { %v836_v49 = vmul.f32 %v1150_v48, %v832_v47 }
 0x263   :  { %842 = vperm.xlu0 %1075, %v836_v49   ;;  %v838_v51 = vmul.f32 %v836_v49, %v1399_v40 }
 0x265   :  { %v839_v52 = vsub.f32 %v837_v50, %v838_v51 }
 0x267   :  { %851 = vperm.xlu1 %1076, %v839_v52  }
 0x2e2   :  { %v843_v57 = vpop.permute.xlu0 %842 }
 0x2e3   :  { %v845_v58 = vmul.f32 %v843_v57, %v1351_v53  ;;  %v846_v59 = vmul.f32 %v843_v57, %v1355_v55  ;;  %v847_v60 = vmul.f32 %v843_v57, %v1353_v54  ;;  %v848_v61 = vmul.f32 %v843_v57, %v1357_v56 }
 0x2e4   :  { %v880_v62 = vmul.f32 %v843_v57, %v1363_v0  ;;  %v881_v63 = vmul.f32 %v843_v57, %v1367_v2  ;;  %v882_v4 = vmul.f32 %v843_v57, %v1365_v1  ;;  %v883_v5 = vmul.f32 %v843_v57, %v1369_v3 }
 0x2e5   :  { %v911_v40 = vmul.f32 %v843_v57, %v1375_v11  ;;  %v912_v6 = vmul.f32 %v843_v57, %v1379_v13  ;;  %v913_v53 = vmul.f32 %v843_v57, %v1377_v12  ;;  %v914_v55 = vmul.f32 %v843_v57, %v1381_v14 }
 0x2e6   :  { %v942_v54 = vmul.f32 %v843_v57, %v1387_v22  ;;  %v943_v56 = vmul.f32 %v843_v57, %v1391_v24  ;;  %v944_v0 = vmul.f32 %v843_v57, %v1389_v23  ;;  %v945_v2 = vmul.f32 %v843_v57, %v1393_v25  ;;  %v852_v7 = vpop.permute.xlu1 %851 }
 0x2e7   :  { %v854_v1 = vadd.f32 %v852_v7, %v845_v58  ;;  %v855_v8 = vadd.f32 %v852_v7, %v846_v59  ;;  %v856_v3 = vadd.f32 %v852_v7, %v847_v60  ;;  %v857_v9 = vadd.f32 %v852_v7, %v848_v61 }
 0x2e8   :  { %v884_v11 = vadd.f32 %v880_v62, %v852_v7  ;;  %v885_v10 = vadd.f32 %v881_v63, %v852_v7  ;;  %v886_v13 = vadd.f32 %v882_v4, %v852_v7  ;;  %v887_v15 = vadd.f32 %v883_v5, %v852_v7 }
 0x2e9   :  { %v858_v12 = vmax.f32 %v854_v1, 0.0  ;;  %v859_v16 = vmax.f32 %v855_v8, 0.0  ;;  %v860_v14 = vmax.f32 %v856_v3, 0.0  ;;  %v861_v17 = vmax.f32 %v857_v9, 0.0 }
 0x2ea   :  { %v888_v22 = vmax.f32 %v884_v11, 0.0  ;;  %v889_v18 = vmax.f32 %v885_v10, 0.0  ;;  %v890_v24 = vmax.f32 %v886_v13, 0.0  ;;  %v891_v19 = vmax.f32 %v887_v15, 0.0 }
 0x2eb   :  { %v1066_v23 = vpack.c.bf16 %v859_v16, %v858_v12  ;;  %v1067_v20 = vpack.c.bf16 %v861_v17, %v860_v14  ;;  %v915_v25 = vadd.f32 %v911_v40, %v852_v7  ;;  %v916_v21 = vadd.f32 %v912_v6, %v852_v7 }
 0x2ec   :  { %v1068_v26 = vpack.c.bf16 %v889_v18, %v888_v22  ;;  %v1069_v27 = vpack.c.bf16 %v891_v19, %v890_v24  ;;  %v917_v28 = vadd.f32 %v913_v53, %v852_v7  ;;  %v918_v29 = vadd.f32 %v914_v55, %v852_v7 }
 0x2ed   :  { %878 = vst [vmem:[%s1484_s4] sm:$0xff] %v1066_v23  ;;  %879 = vst [vmem:[%s1484_s4 + $0x8] sm:$0xff] %v1067_v20  ;;  %v919_v30 = vmax.f32 %v915_v25, 0.0  ;;  %v920_v31 = vmax.f32 %v916_v21, 0.0  ;;  %v946_v32 = vadd.f32 %v942_v54, %v852_v7  ;;  %v947_v33 = vadd.f32 %v943_v56, %v852_v7 }
 0x2ee   :  { %1056 = vst [vmem:[%s1484_s4 + $0x10] sm:$0xff] %v1068_v26  ;;  %1057 = vst [vmem:[%s1484_s4 + $0x18] sm:$0xff] %v1069_v27  ;;  %v921_v34 = vmax.f32 %v917_v28, 0.0  ;;  %v922_v35 = vmax.f32 %v918_v29, 0.0  ;;  %v948_v36 = vadd.f32 %v944_v0, %v852_v7  ;;  %v949_v37 = vadd.f32 %v945_v2, %v852_v7 }
 0x2ef   :  { %v1070_v38 = vpack.c.bf16 %v920_v31, %v919_v30  ;;  %v950_v39 = vmax.f32 %v946_v32, 0.0  ;;  %v951_v41 = vmax.f32 %v947_v33, 0.0 }
 0x2f0   :  { %v1071_v42 = vpack.c.bf16 %v922_v35, %v921_v34  ;;  %v952_v43 = vmax.f32 %v948_v36, 0.0  ;;  %v953_v44 = vmax.f32 %v949_v37, 0.0 }
 0x2f1   :  { %1060 = vst [vmem:[%s1484_s4 + $0x20] sm:$0xff] %v1070_v38  ;;  %v1072_v45 = vpack.c.bf16 %v951_v41, %v950_v39 }
 0x2f2   :  { %1061 = vst [vmem:[%s1484_s4 + $0x28] sm:$0xff] %v1071_v42  ;;  %v1073_v46 = vpack.c.bf16 %v953_v44, %v952_v43 }
 0x2f3   :  { %1064 = vst [vmem:[%s1484_s4 + $0x30] sm:$0xff] %v1072_v45 }
 0x2f4   :  { %1065 = vst [vmem:[%s1484_s4 + $0x38] sm:$0xff] %v1073_v46 }

// kernel: generator_forward.9
= control target key start
LH: loop header
LB: loop body
LE: loop exit
PB: predicated region body
PF: predicated region fallthrough
CT: control target
= control target key end

     0   :  { %v2659_v3 = vmov 0   ;;  %vm205_vm0 = vcmask 261120   ;;  %s3293_s0 = inlined_call_operand.vmem [shape: bf16[96,2048], index: 0, kind: input, shape index: {}]   ;;  %s3294_s1 = inlined_call_operand.vmem [shape: bf16[4,3,32], index: 1, kind: input, shape index: {}]   ;;  %s3295_s2 = inlined_call_operand.vmem [shape: f32[4,3,2048], index: 2, kind: output, shape index: {}]  }
   0x1   :  { %v12_v0 = vld [vmem:[%s3293_s0] sm:$0xff]  ;;  %v13_v2 = vld [vmem:[%s3293_s0 + $0x8] sm:$0xff]  ;;  %241 = vmatprep.mubr.bf16.mxu0 %v2659_v3  ;;  %282 = vmatprep.mubr.bf16.mxu1 %v2659_v3  ;;  %v14_v15 = vld [vmem:[%s3293_s0 + $0x10] sm:$0xff] }
   0x2   :  { %v20_v1 = vld [vmem:[%s3293_s0 + $0x40] sm:$0xff]  ;;  %v21_v5 = vld [vmem:[%s3293_s0 + $0x48] sm:$0xff]  ;;  %v22_v16 = vld [vmem:[%s3293_s0 + $0x50] sm:$0xff] }
   0x3   :  { %v2344_v4 = vcombine.high %v12_v0, %v20_v1  ;;  %v2343_v6 = vcombine.low %v12_v0, %v20_v1  ;;  %v28_v7 = vld [vmem:[%s3293_s0 + $0x80] sm:$0xff]  ;;  %v2346_v9 = vcombine.high %v13_v2, %v21_v5  ;;  %v2345_v10 = vcombine.low %v13_v2, %v21_v5  ;;  %v29_v12 = vld [vmem:[%s3293_s0 + $0x88] sm:$0xff]  ;;  %v15_v17 = vld [vmem:[%s3293_s0 + $0x18] sm:$0xff] }
   0x4   :  { %v36_v8 = vld [vmem:[%s3293_s0 + $0xc0] sm:$0xff]  ;;  %v37_v13 = vld [vmem:[%s3293_s0 + $0xc8] sm:$0xff]  ;;  %v23_v19 = vld [vmem:[%s3293_s0 + $0x58] sm:$0xff]  ;;  %v2348_v21 = vcombine.high %v14_v15, %v22_v16  ;;  %v2347_v28 = vcombine.low %v14_v15, %v22_v16 }
   0x5   :  { %v2695_v11 = vcombine.high %v28_v7, %v36_v8  ;;  %209 = vmatprep.subr.bf16.mxu0 %v2344_v4  ;;  %v2703_v14 = vcombine.high %v29_v12, %v37_v13  ;;  %250 = vmatprep.subr.bf16.mxu1 %v2346_v9  ;;  %v2714_v18 = vcombine.low %v28_v7, %v36_v8  ;;  %v30_v23 = vld [vmem:[%s3293_s0 + $0x90] sm:$0xff]  ;;  %v31_v25 = vld [vmem:[%s3293_s0 + $0x98] sm:$0xff]  ;;  %v2739_v27 = vld [vmem:[%s3294_s1] sm:$0x3] }
   0x6   :  { %210 = vmatpush1.bf16.msra.mxu0 %v2343_v6  ;;  %251 = vmatpush1.bf16.msra.mxu1 %v2345_v10  ;;  %v2720_v20 = vcombine.low %v29_v12, %v37_v13  ;;  %v2350_v22 = vcombine.high %v15_v17, %v23_v19  ;;  %v38_v24 = vld [vmem:[%s3293_s0 + $0xd0] sm:$0xff]  ;;  %v39_v26 = vld [vmem:[%s3293_s0 + $0xd8] sm:$0xff]  ;;  %v2349_v29 = vcombine.low %v15_v17, %v23_v19  ;;  %v16_v32 = vld [vmem:[%s3293_s0 + $0x20] sm:$0xff] }
   0x7   :  { %211 = vmatprep.subr.bf16.mxu0 %v2695_v11  ;;  %252 = vmatprep.subr.bf16.mxu1 %v2703_v14  ;;  %v2742_v30 = vcombine.high %v30_v23, %v38_v24  ;;  %v2744_v31 = vcombine.high %v31_v25, %v39_v26  ;;  %v24_v33 = vld [vmem:[%s3293_s0 + $0x60] sm:$0xff]  ;;  %v17_v34 = vld [vmem:[%s3293_s0 + $0x28] sm:$0xff]  ;;  %v2762_v36 = vcombine.low %v30_v23, %v38_v24  ;;  %v18_v48 = vld [vmem:[%s3293_s0 + $0x30] sm:$0xff] }
   0x8   :  { %v25_v35 = vld [vmem:[%s3293_s0 + $0x68] sm:$0xff]  ;;  %v2765_v37 = vcombine.low %v31_v25, %v39_v26  ;;  %v2352_v38 = vcombine.high %v16_v32, %v24_v33  ;;  %v32_v40 = vld [vmem:[%s3293_s0 + $0xa0] sm:$0xff]  ;;  %v2351_v44 = vcombine.low %v16_v32, %v24_v33  ;;  %v26_v49 = vld [vmem:[%s3293_s0 + $0x70] sm:$0xff] }
   0x9   :  { %v2354_v39 = vcombine.high %v17_v34, %v25_v35  ;;  %v40_v41 = vld [vmem:[%s3293_s0 + $0xe0] sm:$0xff]  ;;  %v33_v42 = vld [vmem:[%s3293_s0 + $0xa8] sm:$0xff]  ;;  %v2353_v45 = vcombine.low %v17_v34, %v25_v35  ;;  %v19_v50 = vld [vmem:[%s3293_s0 + $0x38] sm:$0xff]  ;;  %v2356_v54 = vcombine.high %v18_v48, %v26_v49  ;;  %v2355_v60 = vcombine.low %v18_v48, %v26_v49 }
   0xa   :  { %212 = vmatpush1.bf16.msra.mxu0 %v2714_v18  ;;  %253 = vmatpush1.bf16.msra.mxu1 %v2720_v20  ;;  %v41_v43 = vld [vmem:[%s3293_s0 + $0xe8] sm:$0xff]  ;;  %v2784_v46 = vcombine.high %v32_v40, %v40_v41  ;;  %v27_v51 = vld [vmem:[%s3293_s0 + $0x78] sm:$0xff]  ;;  %v2804_v52 = vcombine.low %v32_v40, %v40_v41  ;;  %v34_v56 = vld [vmem:[%s3293_s0 + $0xb0] sm:$0xff] }
   0xb   :  { %291 = vmatprep.subr.bf16.mxu0 %v2348_v21  ;;  %332 = vmatprep.subr.bf16.mxu1 %v2350_v22  ;;  %v2786_v47 = vcombine.high %v33_v42, %v41_v43  ;;  %v2807_v53 = vcombine.low %v33_v42, %v41_v43  ;;  %v2358_v55 = vcombine.high %v19_v50, %v27_v51  ;;  %v42_v57 = vld [vmem:[%s3293_s0 + $0xf0] sm:$0xff]  ;;  %v35_v58 = vld [vmem:[%s3293_s0 + $0xb8] sm:$0xff]  ;;  %v609_v2 = vld [vmem:[%s3293_s0 + $0x100] sm:$0xff] }
   0xc   :  { %v43_v59 = vld [vmem:[%s3293_s0 + $0xf8] sm:$0xff]  ;;  %v2357_v61 = vcombine.low %v19_v50, %v27_v51  ;;  %v2826_v62 = vcombine.high %v34_v56, %v42_v57  ;;  %v2834_v0 = vcombine.low %v34_v56, %v42_v57  ;;  %v617_v4 = vld [vmem:[%s3293_s0 + $0x140] sm:$0xff]  ;;  %v610_v5 = vld [vmem:[%s3293_s0 + $0x108] sm:$0xff] }
   0xd   :  { %2375 = vmatmul.mubr.msk.bf16.vlgmr.msra.gmra.mrb[0].mxu0 %vm205_vm0, %v2739_v27  ;;  %2376 = vmatmul.mubr.msk.bf16.vlgmr.msra.gmra.mrb[0].mxu1 %vm205_vm0, %v2739_v27  ;;  %v2828_v63 = vcombine.high %v35_v58, %v43_v59  ;;  %v2837_v1 = vcombine.low %v35_v58, %v43_v59  ;;  %v618_v6 = vld [vmem:[%s3293_s0 + $0x148] sm:$0xff]  ;;  %v2401_v7 = vcombine.high %v609_v2, %v617_v4  ;;  %v619_v12 = vld [vmem:[%s3293_s0 + $0x150] sm:$0xff]  ;;  %v612_v13 = vld [vmem:[%s3293_s0 + $0x118] sm:$0xff] }
   0xe   :  { %292 = vmatpush1.bf16.msra.mxu0 %v2347_v28  ;;  %333 = vmatpush1.bf16.msra.mxu1 %v2349_v29  ;;  %v2403_v8 = vcombine.high %v610_v5, %v618_v6  ;;  %v2400_v9 = vcombine.low %v609_v2, %v617_v4  ;;  %v2402_v10 = vcombine.low %v610_v5, %v618_v6  ;;  %v2881_v15 = vld [vmem:[%s3294_s1 + $0x2] sm:$0x3]  ;;  %v614_v22 = vld [vmem:[%s3293_s0 + $0x128] sm:$0xff]  ;;  %v615_v28 = vld [vmem:[%s3293_s0 + $0x130] sm:$0xff] }
   0xf   :  { %293 = vmatprep.subr.bf16.mxu0 %v2742_v30  ;;  %334 = vmatprep.subr.bf16.mxu1 %v2744_v31  ;;  %v621_v21 = vld [vmem:[%s3293_s0 + $0x160] sm:$0xff]  ;;  %v622_v23 = vld [vmem:[%s3293_s0 + $0x168] sm:$0xff]  ;;  %v623_v29 = vld [vmem:[%s3293_s0 + $0x170] sm:$0xff] }
  0x10   :  { %323 = vmatprep.mubr.bf16.mxu0 %v2659_v3  ;;  %364 = vmatprep.mubr.bf16.mxu1 %v2659_v3  ;;  %v2411_v25 = vcombine.high %v614_v22, %v622_v23  ;;  %v2413_v32 = vcombine.high %v615_v28, %v623_v29  ;;  %v1175_v34 = vld [vmem:[%s3293_s0 + $0x180] sm:$0xff]  ;;  %v1177_v50 = vld [vmem:[%s3293_s0 + $0x190] sm:$0xff]  ;;  %v1180_v6 = vld [vmem:[%s3293_s0 + $0x1a8] sm:$0xff] }
  0x11   :  { %v1183_v35 = vld [vmem:[%s3293_s0 + $0x1c0] sm:$0xff]  ;;  %v1185_v51 = vld [vmem:[%s3293_s0 + $0x1d0] sm:$0xff] }
  0x12   :  { %294 = vmatpush1.bf16.msra.mxu0 %v2762_v36  ;;  %335 = vmatpush1.bf16.msra.mxu1 %v2765_v37  ;;  %v2434_v40 = vcombine.high %v1175_v34, %v1183_v35  ;;  %v1191_v42 = vld [vmem:[%s3293_s0 + $0x200] sm:$0xff]  ;;  %v2438_v56 = vcombine.high %v1177_v50, %v1185_v51  ;;  %v1193_v58 = vld [vmem:[%s3293_s0 + $0x210] sm:$0xff] }
  0x13   :  { %373 = vmatprep.subr.bf16.mxu0 %v2352_v38  ;;  %414 = vmatprep.subr.bf16.mxu1 %v2354_v39  ;;  %v2412_v38 = vcombine.low %v615_v28, %v623_v29  ;;  %v1199_v43 = vld [vmem:[%s3293_s0 + $0x240] sm:$0xff]  ;;  %v1201_v59 = vld [vmem:[%s3293_s0 + $0x250] sm:$0xff] }
  0x14   :  { %v2961_v48 = vcombine.high %v1191_v42, %v1199_v43  ;;  %v1179_v4 = vld [vmem:[%s3293_s0 + $0x1a0] sm:$0xff]  ;;  %v1197_v28 = vld [vmem:[%s3293_s0 + $0x230] sm:$0xff] }
  0x15   :  { %2377 = vmatmul.mubr.msk.bf16.vlgmr.msra.gmra.mrb[4].mxu0 %vm205_vm0, %v2739_v27  ;;  %2378 = vmatmul.mubr.msk.bf16.vlgmr.msra.gmra.mrb[4].mxu1 %vm205_vm0, %v2739_v27  ;;  %v1187_v5 = vld [vmem:[%s3293_s0 + $0x1e0] sm:$0xff]  ;;  %v1205_v29 = vld [vmem:[%s3293_s0 + $0x270] sm:$0xff] }
  0x16   :  { %374 = vmatpush1.bf16.msra.mxu0 %v2351_v44  ;;  %415 = vmatpush1.bf16.msra.mxu1 %v2353_v45  ;;  %v1192_v44 = vld [vmem:[%s3293_s0 + $0x208] sm:$0xff] }
  0x17   :  { %375 = vmatprep.subr.bf16.mxu0 %v2784_v46  ;;  %416 = vmatprep.subr.bf16.mxu1 %v2786_v47  ;;  %v1200_v45 = vld [vmem:[%s3293_s0 + $0x248] sm:$0xff] }
  0x18   :  { %405 = vmatprep.mubr.bf16.mxu0 %v2659_v3  ;;  %446 = vmatprep.mubr.bf16.mxu1 %v2659_v3  ;;  %v2963_v49 = vcombine.high %v1192_v44, %v1200_v45 }
  0x1a   :  { %376 = vmatpush1.bf16.msra.mxu0 %v2804_v52  ;;  %417 = vmatpush1.bf16.msra.mxu1 %v2807_v53 }
  0x1b   :  { %455 = vmatprep.subr.bf16.mxu0 %v2356_v54  ;;  %496 = vmatprep.subr.bf16.mxu1 %v2358_v55  ;;  %v2981_v54 = vcombine.low %v1191_v42, %v1199_v43  ;;  %v2984_v55 = vcombine.low %v1192_v44, %v1200_v45 }
  0x1d   :  { %2379 = vmatmul.mubr.msk.bf16.vlgmr.msra.gmra.mrb[8].mxu0 %vm205_vm0, %v2739_v27  ;;  %2380 = vmatmul.mubr.msk.bf16.vlgmr.msra.gmra.mrb[8].mxu1 %vm205_vm0, %v2739_v27 }
  0x1e   :  { %456 = vmatpush1.bf16.msra.mxu0 %v2355_v60  ;;  %497 = vmatpush1.bf16.msra.mxu1 %v2357_v61  ;;  %v1194_v60 = vld [vmem:[%s3293_s0 + $0x218] sm:$0xff] }
  0x1f   :  { %457 = vmatprep.subr.bf16.mxu0 %v2826_v62  ;;  %498 = vmatprep.subr.bf16.mxu1 %v2828_v63  ;;  %v1202_v61 = vld [vmem:[%s3293_s0 + $0x258] sm:$0xff] }
  0x20   :  { %487 = vmatprep.mubr.bf16.mxu0 %v2659_v3  ;;  %528 = vmatprep.mubr.bf16.mxu1 %v2659_v3  ;;  %v3010_v2 = vcombine.high %v1194_v60, %v1202_v61 }
  0x22   :  { %458 = vmatpush1.bf16.msra.mxu0 %v2834_v0  ;;  %499 = vmatpush1.bf16.msra.mxu1 %v2837_v1 }
  0x23   :  { %790 = vmatprep.subr.bf16.mxu0 %v2695_v11  ;;  %831 = vmatprep.subr.bf16.mxu1 %v2703_v14  ;;  %v611_v11 = vld [vmem:[%s3293_s0 + $0x110] sm:$0xff]  ;;  %v620_v14 = vld [vmem:[%s3293_s0 + $0x158] sm:$0xff] }
  0x24   :  { %v2405_v16 = vcombine.high %v611_v11, %v619_v12  ;;  %v2407_v17 = vcombine.high %v612_v13, %v620_v14  ;;  %v2406_v19 = vcombine.low %v612_v13, %v620_v14  ;;  %v1203_v13 = vld [vmem:[%s3293_s0 + $0x260] sm:$0xff]  ;;  %v1196_v14 = vld [vmem:[%s3293_s0 + $0x228] sm:$0xff] }
  0x25   :  { %2381 = vmatmul.mubr.msk.bf16.vlgmr.msra.gmra.mrb[12].mxu0 %vm205_vm0, %v2739_v27  ;;  %2382 = vmatmul.mubr.msk.bf16.vlgmr.msra.gmra.mrb[12].mxu1 %vm205_vm0, %v2739_v27  ;;  %v2410_v27 = vcombine.low %v614_v22, %v622_v23  ;;  %v1182_v22 = vld [vmem:[%s3293_s0 + $0x1b8] sm:$0xff] }
  0x26   :  { %791 = vmatpush1.bf16.msra.mxu0 %v2714_v18  ;;  %832 = vmatpush1.bf16.msra.mxu1 %v2720_v20  ;;  %v2404_v18 = vcombine.low %v611_v11, %v619_v12  ;;  %v613_v20 = vld [vmem:[%s3293_s0 + $0x120] sm:$0xff]  ;;  %v1190_v23 = vld [vmem:[%s3293_s0 + $0x1f8] sm:$0xff] }
  0x27   :  { %792 = vmatprep.subr.bf16.mxu0 %v2401_v7  ;;  %833 = vmatprep.subr.bf16.mxu1 %v2403_v8  ;;  %v2409_v24 = vcombine.high %v613_v20, %v621_v21  ;;  %v2408_v26 = vcombine.low %v613_v20, %v621_v21  ;;  %v1188_v7 = vld [vmem:[%s3293_s0 + $0x1e8] sm:$0xff]  ;;  %v3028_v8 = vcombine.low %v1193_v58, %v1201_v59  ;;  %v1195_v12 = vld [vmem:[%s3293_s0 + $0x220] sm:$0xff]  ;;  %v1181_v20 = vld [vmem:[%s3293_s0 + $0x1b0] sm:$0xff] }
  0x28   :  { %822 = vmatprep.mubr.bf16.mxu0 %v2659_v3  ;;  %863 = vmatprep.mubr.bf16.mxu1 %v2659_v3  ;;  %v2444_v11 = vcombine.high %v1180_v6, %v1188_v7  ;;  %v1189_v21 = vld [vmem:[%s3293_s0 + $0x1f0] sm:$0xff] }
  0x2a   :  { %793 = vmatpush1.bf16.msra.mxu0 %v2400_v9  ;;  %834 = vmatpush1.bf16.msra.mxu1 %v2402_v10  ;;  %v3031_v9 = vcombine.low %v1194_v60, %v1202_v61  ;;  %v2442_v10 = vcombine.high %v1179_v4, %v1187_v5 }
  0x2b   :  { %872 = vmatprep.subr.bf16.mxu0 %v2742_v30  ;;  %913 = vmatprep.subr.bf16.mxu1 %v2744_v31  ;;  %v616_v30 = vld [vmem:[%s3293_s0 + $0x138] sm:$0xff] }
  0x2c   :  { %v624_v31 = vld [vmem:[%s3293_s0 + $0x178] sm:$0xff] }
  0x2d   :  { %2416 = vmatmul.mubr.msk.bf16.vlgmr.msra.gmra.mrb[16].mxu0 %vm205_vm0, %v2881_v15  ;;  %2417 = vmatmul.mubr.msk.bf16.vlgmr.msra.gmra.mrb[16].mxu1 %vm205_vm0, %v2881_v15  ;;  %v2415_v33 = vcombine.high %v616_v30, %v624_v31  ;;  %v2414_v39 = vcombine.low %v616_v30, %v624_v31  ;;  %v1198_v30 = vld [vmem:[%s3293_s0 + $0x238] sm:$0xff] }
  0x2e   :  { %873 = vmatpush1.bf16.msra.mxu0 %v2762_v36  ;;  %914 = vmatpush1.bf16.msra.mxu1 %v2765_v37  ;;  %v1176_v36 = vld [vmem:[%s3293_s0 + $0x188] sm:$0xff]  ;;  %v1206_v31 = vld [vmem:[%s3293_s0 + $0x278] sm:$0xff] }
  0x2f   :  { %874 = vmatprep.subr.bf16.mxu0 %v2405_v16  ;;  %915 = vmatprep.subr.bf16.mxu1 %v2407_v17  ;;  %v1184_v37 = vld [vmem:[%s3293_s0 + $0x1c8] sm:$0xff]  ;;  %v2441_v16 = vcombine.low %v1179_v4, %v1187_v5  ;;  %v2443_v17 = vcombine.low %v1180_v6, %v1188_v7 }
  0x30   :  { %904 = vmatprep.mubr.bf16.mxu0 %v2659_v3  ;;  %945 = vmatprep.mubr.bf16.mxu1 %v2659_v3  ;;  %v2436_v41 = vcombine.high %v1176_v36, %v1184_v37 }
  0x32   :  { %875 = vmatpush1.bf16.msra.mxu0 %v2404_v18  ;;  %916 = vmatpush1.bf16.msra.mxu1 %v2406_v19  ;;  %v3050_v18 = vcombine.high %v1195_v12, %v1203_v13 }
  0x33   :  { %954 = vmatprep.subr.bf16.mxu0 %v2784_v46  ;;  %995 = vmatprep.subr.bf16.mxu1 %v2786_v47  ;;  %v2433_v46 = vcombine.low %v1175_v34, %v1183_v35  ;;  %v2435_v47 = vcombine.low %v1176_v36, %v1184_v37  ;;  %v3092_v34 = vcombine.high %v1197_v28, %v1205_v29 }
  0x34   :  { %v3094_v35 = vcombine.high %v1198_v30, %v1206_v31  ;;  %v3100_v36 = vcombine.low %v1197_v28, %v1205_v29  ;;  %v3103_v37 = vcombine.low %v1198_v30, %v1206_v31 }
  0x35   :  { %2418 = vmatmul.mubr.msk.bf16.vlgmr.msra.gmra.mrb[20].mxu0 %vm205_vm0, %v2881_v15  ;;  %2419 = vmatmul.mubr.msk.bf16.vlgmr.msra.gmra.mrb[20].mxu1 %vm205_vm0, %v2881_v15 }
  0x36   :  { %955 = vmatpush1.bf16.msra.mxu0 %v2804_v52  ;;  %996 = vmatpush1.bf16.msra.mxu1 %v2807_v53  ;;  %v1178_v52 = vld [vmem:[%s3293_s0 + $0x198] sm:$0xff] }
  0x37   :  { %956 = vmatprep.subr.bf16.mxu0 %v2409_v24  ;;  %997 = vmatprep.subr.bf16.mxu1 %v2411_v25  ;;  %v1186_v53 = vld [vmem:[%s3293_s0 + $0x1d8] sm:$0xff]  ;;  %v3070_v24 = vcombine.low %v1195_v12, %v1203_v13 }
  0x38   :  { %986 = vmatprep.mubr.bf16.mxu0 %v2659_v3  ;;  %1027 = vmatprep.mubr.bf16.mxu1 %v2659_v3  ;;  %v2440_v57 = vcombine.high %v1178_v52, %v1186_v53 }
  0x3a   :  { %957 = vmatpush1.bf16.msra.mxu0 %v2408_v26  ;;  %998 = vmatpush1.bf16.msra.mxu1 %v2410_v27  ;;  %v2446_v26 = vcombine.high %v1181_v20, %v1189_v21  ;;  %v2448_v27 = vcombine.high %v1182_v22, %v1190_v23 }
  0x3b   :  { %1036 = vmatprep.subr.bf16.mxu0 %v2826_v62  ;;  %1077 = vmatprep.subr.bf16.mxu1 %v2828_v63  ;;  %v3005_v62 = vld [vmem:[%s3294_s1 + $0x4] sm:$0x3]  ;;  %v2437_v63 = vcombine.low %v1177_v50, %v1185_v51  ;;  %v2481_v50 = vld [vmem:[%s3294_s1 + $0x6] sm:$0x3] }
  0x3d   :  { %2420 = vmatmul.mubr.msk.bf16.vlgmr.msra.gmra.mrb[24].mxu0 %vm205_vm0, %v2881_v15  ;;  %2421 = vmatmul.mubr.msk.bf16.vlgmr.msra.gmra.mrb[24].mxu1 %vm205_vm0, %v2881_v15 }
  0x3e   :  { %1037 = vmatpush1.bf16.msra.mxu0 %v2834_v0  ;;  %1078 = vmatpush1.bf16.msra.mxu1 %v2837_v1  ;;  %v2439_v0 = vcombine.low %v1178_v52, %v1186_v53  ;;  %v3008_v1 = vcombine.high %v1193_v58, %v1201_v59  ;;  %v1786_v58 = vld [vmem:[%s3293_s0 + $0x2e8] sm:$0xff] }
  0x3f   :  { %1038 = vmatprep.subr.bf16.mxu0 %v2413_v32  ;;  %1079 = vmatprep.subr.bf16.mxu1 %v2415_v33  ;;  %v2445_v32 = vcombine.low %v1181_v20, %v1189_v21  ;;  %v2447_v33 = vcombine.low %v1182_v22, %v1190_v23 }
  0x40   :  { %1068 = vmatprep.mubr.bf16.mxu0 %v2659_v3  ;;  %1109 = vmatprep.mubr.bf16.mxu1 %v2659_v3 }
  0x42   :  { %1039 = vmatpush1.bf16.msra.mxu0 %v2412_v38  ;;  %1080 = vmatpush1.bf16.msra.mxu1 %v2414_v39  ;;  %v1773_v38 = vld [vmem:[%s3293_s0 + $0x280] sm:$0xff] }
  0x43   :  { %1372 = vmatprep.subr.bf16.mxu0 %v2434_v40  ;;  %1413 = vmatprep.subr.bf16.mxu1 %v2436_v41  ;;  %v1781_v39 = vld [vmem:[%s3293_s0 + $0x2c0] sm:$0xff]  ;;  %v1774_v40 = vld [vmem:[%s3293_s0 + $0x288] sm:$0xff] }
  0x44   :  { %v1782_v41 = vld [vmem:[%s3293_s0 + $0x2c8] sm:$0xff]  ;;  %v2499_v42 = vcombine.high %v1773_v38, %v1781_v39  ;;  %v2498_v44 = vcombine.low %v1773_v38, %v1781_v39 }
  0x45   :  { %2422 = vmatmul.mubr.msk.bf16.vlgmr.msra.gmra.mrb[28].mxu0 %vm205_vm0, %v2881_v15  ;;  %2423 = vmatmul.mubr.msk.bf16.vlgmr.msra.gmra.mrb[28].mxu1 %vm205_vm0, %v2881_v15  ;;  %v1204_v15 = vld [vmem:[%s3293_s0 + $0x268] sm:$0xff]  ;;  %v2501_v43 = vcombine.high %v1774_v40, %v1782_v41  ;;  %v2500_v45 = vcombine.low %v1774_v40, %v1782_v41 }
  0x46   :  { %1373 = vmatpush1.bf16.msra.mxu0 %v2433_v46  ;;  %1414 = vmatpush1.bf16.msra.mxu1 %v2435_v47  ;;  %v3052_v19 = vcombine.high %v1196_v14, %v1204_v15  ;;  %v3073_v25 = vcombine.low %v1196_v14, %v1204_v15  ;;  %v1775_v46 = vld [vmem:[%s3293_s0 + $0x290] sm:$0xff] }
  0x47   :  { %1374 = vmatprep.subr.bf16.mxu0 %v2961_v48  ;;  %1415 = vmatprep.subr.bf16.mxu1 %v2963_v49  ;;  %v1783_v47 = vld [vmem:[%s3293_s0 + $0x2d0] sm:$0xff] }
  0x48   :  { %1404 = vmatprep.mubr.bf16.mxu0 %v2659_v3  ;;  %1445 = vmatprep.mubr.bf16.mxu1 %v2659_v3  ;;  %v2503_v51 = vcombine.high %v1775_v46, %v1783_v47  ;;  %v2502_v53 = vcombine.low %v1775_v46, %v1783_v47 }
  0x4a   :  { %1375 = vmatpush1.bf16.msra.mxu0 %v2981_v54  ;;  %1416 = vmatpush1.bf16.msra.mxu1 %v2984_v55 }
  0x4b   :  { %1454 = vmatprep.subr.bf16.mxu0 %v2438_v56  ;;  %1495 = vmatprep.subr.bf16.mxu1 %v2440_v57  ;;  %v1785_v56 = vld [vmem:[%s3293_s0 + $0x2e0] sm:$0xff]  ;;  %v1778_v57 = vld [vmem:[%s3293_s0 + $0x2a8] sm:$0xff] }
  0x4c   :  { %v2509_v60 = vcombine.high %v1778_v57, %v1786_v58 }
  0x4d   :  { %2465 = vmatmul.mubr.msk.bf16.vlgmr.msra.gmra.mrb[32].mxu0 %vm205_vm0, %v3005_v62  ;;  %2466 = vmatmul.mubr.msk.bf16.vlgmr.msra.gmra.mrb[32].mxu1 %vm205_vm0, %v3005_v62 }
  0x4e   :  { %1455 = vmatpush1.bf16.msra.mxu0 %v2437_v63  ;;  %1496 = vmatpush1.bf16.msra.mxu1 %v2439_v0  ;;  %v1779_v63 = vld [vmem:[%s3293_s0 + $0x2b0] sm:$0xff] }
  0x4f   :  { %1456 = vmatprep.subr.bf16.mxu0 %v3008_v1  ;;  %1497 = vmatprep.subr.bf16.mxu1 %v3010_v2  ;;  %v1787_v0 = vld [vmem:[%s3293_s0 + $0x2f0] sm:$0xff] }
  0x50   :  { %1486 = vmatprep.mubr.bf16.mxu0 %v2659_v3  ;;  %1527 = vmatprep.mubr.bf16.mxu1 %v2659_v3  ;;  %v2511_v4 = vcombine.high %v1779_v63, %v1787_v0  ;;  %v2510_v6 = vcombine.low %v1779_v63, %v1787_v0 }
  0x52   :  { %1457 = vmatpush1.bf16.msra.mxu0 %v3028_v8  ;;  %1498 = vmatpush1.bf16.msra.mxu1 %v3031_v9 }
  0x53   :  { %1536 = vmatprep.subr.bf16.mxu0 %v2442_v10  ;;  %1577 = vmatprep.subr.bf16.mxu1 %v2444_v11 }
  0x55   :  { %2467 = vmatmul.mubr.msk.bf16.vlgmr.msra.gmra.mrb[36].mxu0 %vm205_vm0, %v3005_v62  ;;  %2468 = vmatmul.mubr.msk.bf16.vlgmr.msra.gmra.mrb[36].mxu1 %vm205_vm0, %v3005_v62 }
  0x56   :  { %1537 = vmatpush1.bf16.msra.mxu0 %v2441_v16  ;;  %1578 = vmatpush1.bf16.msra.mxu1 %v2443_v17 }
  0x57   :  { %1538 = vmatprep.subr.bf16.mxu0 %v3050_v18  ;;  %1579 = vmatprep.subr.bf16.mxu1 %v3052_v19 }
  0x58   :  { %1568 = vmatprep.mubr.bf16.mxu0 %v2659_v3  ;;  %1609 = vmatprep.mubr.bf16.mxu1 %v2659_v3 }
  0x5a   :  { %1539 = vmatpush1.bf16.msra.mxu0 %v3070_v24  ;;  %1580 = vmatpush1.bf16.msra.mxu1 %v3073_v25 }
  0x5b   :  { %1618 = vmatprep.subr.bf16.mxu0 %v2446_v26  ;;  %1659 = vmatprep.subr.bf16.mxu1 %v2448_v27 }
  0x5d   :  { %2469 = vmatmul.mubr.msk.bf16.vlgmr.msra.gmra.mrb[40].mxu0 %vm205_vm0, %v3005_v62  ;;  %2470 = vmatmul.mubr.msk.bf16.vlgmr.msra.gmra.mrb[40].mxu1 %vm205_vm0, %v3005_v62 }
  0x5e   :  { %1619 = vmatpush1.bf16.msra.mxu0 %v2445_v32  ;;  %1660 = vmatpush1.bf16.msra.mxu1 %v2447_v33 }
  0x5f   :  { %1620 = vmatprep.subr.bf16.mxu0 %v3092_v34  ;;  %1661 = vmatprep.subr.bf16.mxu1 %v3094_v35 }
  0x60   :  { %1650 = vmatprep.mubr.bf16.mxu0 %v2659_v3  ;;  %1691 = vmatprep.mubr.bf16.mxu1 %v2659_v3 }
  0x62   :  { %1621 = vmatpush1.bf16.msra.mxu0 %v3100_v36  ;;  %1662 = vmatpush1.bf16.msra.mxu1 %v3103_v37 }
  0x63   :  { %1954 = vmatprep.subr.bf16.mxu0 %v2961_v48  ;;  %1995 = vmatprep.subr.bf16.mxu1 %v2963_v49  ;;  %v1776_v48 = vld [vmem:[%s3293_s0 + $0x298] sm:$0xff] }
  0x64   :  { %v1784_v49 = vld [vmem:[%s3293_s0 + $0x2d8] sm:$0xff] }
  0x65   :  { %2471 = vmatmul.mubr.msk.bf16.vlgmr.msra.gmra.mrb[44].mxu0 %vm205_vm0, %v3005_v62  ;;  %2472 = vmatmul.mubr.msk.bf16.vlgmr.msra.gmra.mrb[44].mxu1 %vm205_vm0, %v3005_v62  ;;  %v2505_v52 = vcombine.high %v1776_v48, %v1784_v49  ;;  %v2508_v62 = vcombine.low %v1778_v57, %v1786_v58 }
  0x66   :  { %1955 = vmatpush1.bf16.msra.mxu0 %v2981_v54  ;;  %1996 = vmatpush1.bf16.msra.mxu1 %v2984_v55  ;;  %v2504_v54 = vcombine.low %v1776_v48, %v1784_v49  ;;  %v1777_v55 = vld [vmem:[%s3293_s0 + $0x2a0] sm:$0xff] }
  0x67   :  { %1956 = vmatprep.subr.bf16.mxu0 %v2499_v42  ;;  %1997 = vmatprep.subr.bf16.mxu1 %v2501_v43  ;;  %v2507_v59 = vcombine.high %v1777_v55, %v1785_v56  ;;  %v2506_v61 = vcombine.low %v1777_v55, %v1785_v56 }
  0x68   :  { %1986 = vmatprep.mubr.bf16.mxu0 %v2659_v3  ;;  %2027 = vmatprep.mubr.bf16.mxu1 %v2659_v3 }
  0x6a   :  { %1957 = vmatpush1.bf16.msra.mxu0 %v2498_v44  ;;  %1998 = vmatpush1.bf16.msra.mxu1 %v2500_v45 }
  0x6b   :  { %2036 = vmatprep.subr.bf16.mxu0 %v3008_v1  ;;  %2077 = vmatprep.subr.bf16.mxu1 %v3010_v2  ;;  %v1780_v1 = vld [vmem:[%s3293_s0 + $0x2b8] sm:$0xff] }
  0x6c   :  { %v1788_v2 = vld [vmem:[%s3293_s0 + $0x2f8] sm:$0xff] }
  0x6d   :  { %2514 = vmatmul.mubr.msk.bf16.vlgmr.msra.gmra.mrb[48].mxu0 %vm205_vm0, %v2481_v50  ;;  %2515 = vmatmul.mubr.msk.bf16.vlgmr.msra.gmra.mrb[48].mxu1 %vm205_vm0, %v2481_v50  ;;  %v2513_v5 = vcombine.high %v1780_v1, %v1788_v2  ;;  %v2512_v7 = vcombine.low %v1780_v1, %v1788_v2 }
  0x6e   :  { %2037 = vmatpush1.bf16.msra.mxu0 %v3028_v8  ;;  %2078 = vmatpush1.bf16.msra.mxu1 %v3031_v9 }
  0x6f   :  { %2038 = vmatprep.subr.bf16.mxu0 %v2503_v51  ;;  %2079 = vmatprep.subr.bf16.mxu1 %v2505_v52 }
  0x70   :  { %2068 = vmatprep.mubr.bf16.mxu0 %v2659_v3  ;;  %2109 = vmatprep.mubr.bf16.mxu1 %v2659_v3 }
  0x72   :  { %2039 = vmatpush1.bf16.msra.mxu0 %v2502_v53  ;;  %2080 = vmatpush1.bf16.msra.mxu1 %v2504_v54 }
  0x73   :  { %2118 = vmatprep.subr.bf16.mxu0 %v3050_v18  ;;  %2159 = vmatprep.subr.bf16.mxu1 %v3052_v19 }
  0x75   :  { %2516 = vmatmul.mubr.msk.bf16.vlgmr.msra.gmra.mrb[52].mxu0 %vm205_vm0, %v2481_v50  ;;  %2517 = vmatmul.mubr.msk.bf16.vlgmr.msra.gmra.mrb[52].mxu1 %vm205_vm0, %v2481_v50 }
  0x76   :  { %2119 = vmatpush1.bf16.msra.mxu0 %v3070_v24  ;;  %2160 = vmatpush1.bf16.msra.mxu1 %v3073_v25 }
  0x77   :  { %2120 = vmatprep.subr.bf16.mxu0 %v2507_v59  ;;  %2161 = vmatprep.subr.bf16.mxu1 %v2509_v60 }
  0x78   :  { %2150 = vmatprep.mubr.bf16.mxu0 %v2659_v3  ;;  %2191 = vmatprep.mubr.bf16.mxu1 %v2659_v3 }
  0x7a   :  { %2121 = vmatpush1.bf16.msra.mxu0 %v2506_v61  ;;  %2162 = vmatpush1.bf16.msra.mxu1 %v2508_v62 }
  0x7b   :  { %2200 = vmatprep.subr.bf16.mxu0 %v3092_v34  ;;  %2241 = vmatprep.subr.bf16.mxu1 %v3094_v35 }
  0x7d   :  { %2518 = vmatmul.mubr.msk.bf16.vlgmr.msra.gmra.mrb[56].mxu0 %vm205_vm0, %v2481_v50  ;;  %2519 = vmatmul.mubr.msk.bf16.vlgmr.msra.gmra.mrb[56].mxu1 %vm205_vm0, %v2481_v50 }
  0x7e   :  { %2201 = vmatpush1.bf16.msra.mxu0 %v3100_v36  ;;  %2242 = vmatpush1.bf16.msra.mxu1 %v3103_v37 }
  0x7f   :  { %2202 = vmatprep.subr.bf16.mxu0 %v2511_v4  ;;  %2243 = vmatprep.subr.bf16.mxu1 %v2513_v5 }
  0x80   :  { %2232 = vmatprep.mubr.bf16.mxu0 %v2659_v3  ;;  %2273 = vmatprep.mubr.bf16.mxu1 %v2659_v3 }
  0x82   :  { %2203 = vmatpush1.bf16.msra.mxu0 %v2510_v6  ;;  %2244 = vmatpush1.bf16.msra.mxu1 %v2512_v7 }
  0x85   :  { %2520 = vmatmul.mubr.msk.bf16.vlgmr.msra.gmra.mrb[60].mxu0 %vm205_vm0, %v2481_v50  ;;  %2521 = vmatmul.mubr.msk.bf16.vlgmr.msra.gmra.mrb[60].mxu1 %vm205_vm0, %v2481_v50 }
  0xe0   :  { %v243_v8 = vpop.f32.mrb[0].mxu0  ;;  %v284_v9 = vpop.f32.mrb[0].mxu1 }
  0xe1   :  { %2531 = vtanh.f32 %v243_v8  ;;  %v245_v10 = vpop.f32.mrb[1].mxu0  ;;  %v286_v11 = vpop.f32.mrb[1].mxu1 }
  0xe2   :  { %2533 = vtanh.f32 %v284_v9  ;;  %v247_v12 = vpop.f32.mrb[2].mxu0  ;;  %v288_v13 = vpop.f32.mrb[2].mxu1 }
  0xe3   :  { %2535 = vtanh.f32 %v245_v10  ;;  %v248_v14 = vpop.f32.mrb[3].mxu0  ;;  %v289_v15 = vpop.f32.mrb[3].mxu1 }
  0xe4   :  { %2537 = vtanh.f32 %v286_v11 }
  0xe8   :  { %v325_v16 = vpop.f32.mrb[4].mxu0  ;;  %v366_v3 = vpop.f32.mrb[4].mxu1 }
  0xe9   :  { %2539 = vtanh.f32 %v325_v16  ;;  %v327_v17 = vpop.f32.mrb[5].mxu0  ;;  %v368_v18 = vpop.f32.mrb[5].mxu1 }
  0xea   :  { %2541 = vtanh.f32 %v366_v3  ;;  %v329_v19 = vpop.f32.mrb[6].mxu0  ;;  %v370_v21 = vpop.f32.mrb[6].mxu1 }
  0xeb   :  { %v2532_v20 = vpop.eup %2531  ;;  %2543 = vtanh.f32 %v327_v17  ;;  %v330_v22 = vpop.f32.mrb[7].mxu0 }
  0xec   :  { %v2534_v23 = vpop.eup %2533  ;;  %2545 = vtanh.f32 %v368_v18  ;;  %v371_v24 = vpop.f32.mrb[7].mxu1 }
  0xed   :  { %v2536_v25 = vpop.eup %2535 }
  0xee   :  { %v2538_v26 = vpop.eup %2537  ;;  %v569_v27 = vcombine.low %v2532_v20, %v2536_v25 }
  0xef   :  { %v570_v28 = vcombine.low %v2534_v23, %v2538_v26 }
  0xf0   :  { %585 = vst [vmem:[%s3295_s2] sm:$0x77] %v569_v27  ;;  %v407_v29 = vpop.f32.mrb[8].mxu0  ;;  %v448_v30 = vpop.f32.mrb[8].mxu1 }
  0xf1   :  { %586 = vst [vmem:[%s3295_s2 + $0x8] sm:$0x77] %v570_v28  ;;  %2547 = vtanh.f32 %v407_v29  ;;  %v409_v31 = vpop.f32.mrb[9].mxu0  ;;  %v450_v32 = vpop.f32.mrb[9].mxu1 }
  0xf2   :  { %2549 = vtanh.f32 %v448_v30  ;;  %v411_v33 = vpop.f32.mrb[10].mxu0  ;;  %v452_v35 = vpop.f32.mrb[10].mxu1 }
  0xf3   :  { %v2540_v34 = vpop.eup %2539  ;;  %2551 = vtanh.f32 %v409_v31  ;;  %v412_v36 = vpop.f32.mrb[11].mxu0 }
  0xf4   :  { %v2542_v37 = vpop.eup %2541  ;;  %2553 = vtanh.f32 %v450_v32  ;;  %v453_v38 = vpop.f32.mrb[11].mxu1 }
  0xf5   :  { %v2544_v39 = vpop.eup %2543 }
  0xf6   :  { %v2546_v40 = vpop.eup %2545  ;;  %v571_v41 = vcombine.low %v2540_v34, %v2544_v39 }
  0xf7   :  { %v572_v42 = vcombine.low %v2542_v37, %v2546_v40 }
  0xf8   :  { %587 = vst [vmem:[%s3295_s2 + $0x10] sm:$0x77] %v571_v41  ;;  %v489_v43 = vpop.f32.mrb[12].mxu0  ;;  %v530_v44 = vpop.f32.mrb[12].mxu1 }
  0xf9   :  { %588 = vst [vmem:[%s3295_s2 + $0x18] sm:$0x77] %v572_v42  ;;  %2555 = vtanh.f32 %v489_v43  ;;  %v491_v45 = vpop.f32.mrb[13].mxu0  ;;  %v532_v46 = vpop.f32.mrb[13].mxu1 }
  0xfa   :  { %2557 = vtanh.f32 %v530_v44  ;;  %v493_v47 = vpop.f32.mrb[14].mxu0  ;;  %v534_v49 = vpop.f32.mrb[14].mxu1 }
  0xfb   :  { %v2548_v48 = vpop.eup %2547  ;;  %2559 = vtanh.f32 %v491_v45  ;;  %v494_v50 = vpop.f32.mrb[15].mxu0 }
  0xfc   :  { %v2550_v51 = vpop.eup %2549  ;;  %2561 = vtanh.f32 %v532_v46  ;;  %v535_v52 = vpop.f32.mrb[15].mxu1 }
  0xfd   :  { %v2552_v53 = vpop.eup %2551 }
  0xfe   :  { %v2554_v54 = vpop.eup %2553  ;;  %v573_v55 = vcombine.low %v2548_v48, %v2552_v53 }
  0xff   :  { %v574_v56 = vcombine.low %v2550_v51, %v2554_v54 }
 0x100   :  { %589 = vst [vmem:[%s3295_s2 + $0x20] sm:$0x77] %v573_v55  ;;  %v824_v57 = vpop.f32.mrb[16].mxu0  ;;  %v865_v58 = vpop.f32.mrb[16].mxu1 }
 0x101   :  { %590 = vst [vmem:[%s3295_s2 + $0x28] sm:$0x77] %v574_v56  ;;  %2563 = vtanh.f32 %v824_v57  ;;  %v826_v59 = vpop.f32.mrb[17].mxu0  ;;  %v867_v60 = vpop.f32.mrb[17].mxu1 }
 0x102   :  { %2565 = vtanh.f32 %v865_v58  ;;  %v828_v61 = vpop.f32.mrb[18].mxu0  ;;  %v869_v63 = vpop.f32.mrb[18].mxu1 }
 0x103   :  { %v2556_v62 = vpop.eup %2555  ;;  %2567 = vtanh.f32 %v826_v59  ;;  %v829_v0 = vpop.f32.mrb[19].mxu0 }
 0x104   :  { %v2558_v1 = vpop.eup %2557  ;;  %2569 = vtanh.f32 %v867_v60  ;;  %v870_v2 = vpop.f32.mrb[19].mxu1 }
 0x105   :  { %v2560_v4 = vpop.eup %2559 }
 0x106   :  { %v2562_v5 = vpop.eup %2561  ;;  %v575_v6 = vcombine.low %v2556_v62, %v2560_v4 }
 0x107   :  { %v576_v7 = vcombine.low %v2558_v1, %v2562_v5 }
 0x108   :  { %591 = vst [vmem:[%s3295_s2 + $0x30] sm:$0x77] %v575_v6  ;;  %v906_v8 = vpop.f32.mrb[20].mxu0  ;;  %v947_v9 = vpop.f32.mrb[20].mxu1 }
 0x109   :  { %592 = vst [vmem:[%s3295_s2 + $0x38] sm:$0x77] %v576_v7  ;;  %2571 = vtanh.f32 %v906_v8  ;;  %v908_v10 = vpop.f32.mrb[21].mxu0  ;;  %v949_v11 = vpop.f32.mrb[21].mxu1 }
 0x10a   :  { %2573 = vtanh.f32 %v947_v9  ;;  %v910_v12 = vpop.f32.mrb[22].mxu0  ;;  %v951_v14 = vpop.f32.mrb[22].mxu1 }
 0x10b   :  { %v2564_v13 = vpop.eup %2563  ;;  %2575 = vtanh.f32 %v908_v10  ;;  %v911_v15 = vpop.f32.mrb[23].mxu0 }
 0x10c   :  { %v2566_v16 = vpop.eup %2565  ;;  %2577 = vtanh.f32 %v949_v11  ;;  %v952_v3 = vpop.f32.mrb[23].mxu1 }
 0x10d   :  { %v2568_v17 = vpop.eup %2567 }
 0x10e   :  { %v2570_v18 = vpop.eup %2569  ;;  %v1150_v19 = vcombine.low %v2564_v13, %v2568_v17 }
 0x10f   :  { %v1151_v20 = vcombine.low %v2566_v16, %v2570_v18 }
 0x110   :  { %2424 = vst [vmem:[%s3295_s2 + $0x40] sm:$0x77] %v1150_v19  ;;  %v988_v21 = vpop.f32.mrb[24].mxu0  ;;  %v1029_v22 = vpop.f32.mrb[24].mxu1 }
 0x111   :  { %2425 = vst [vmem:[%s3295_s2 + $0x48] sm:$0x77] %v1151_v20  ;;  %2579 = vtanh.f32 %v988_v21  ;;  %v990_v23 = vpop.f32.mrb[25].mxu0  ;;  %v1031_v24 = vpop.f32.mrb[25].mxu1 }
 0x112   :  { %2581 = vtanh.f32 %v1029_v22  ;;  %v992_v25 = vpop.f32.mrb[26].mxu0  ;;  %v1033_v27 = vpop.f32.mrb[26].mxu1 }
 0x113   :  { %v2572_v26 = vpop.eup %2571  ;;  %2583 = vtanh.f32 %v990_v23  ;;  %v993_v28 = vpop.f32.mrb[27].mxu0 }
 0x114   :  { %v2574_v29 = vpop.eup %2573  ;;  %2585 = vtanh.f32 %v1031_v24  ;;  %v1034_v30 = vpop.f32.mrb[27].mxu1 }
 0x115   :  { %v2576_v31 = vpop.eup %2575 }
 0x116   :  { %v2578_v32 = vpop.eup %2577  ;;  %v1152_v33 = vcombine.low %v2572_v26, %v2576_v31 }
 0x117   :  { %v1153_v34 = vcombine.low %v2574_v29, %v2578_v32 }
 0x118   :  { %2426 = vst [vmem:[%s3295_s2 + $0x50] sm:$0x77] %v1152_v33  ;;  %v1070_v35 = vpop.f32.mrb[28].mxu0  ;;  %v1111_v36 = vpop.f32.mrb[28].mxu1 }
 0x119   :  { %2427 = vst [vmem:[%s3295_s2 + $0x58] sm:$0x77] %v1153_v34  ;;  %2587 = vtanh.f32 %v1070_v35  ;;  %v1072_v37 = vpop.f32.mrb[29].mxu0  ;;  %v1113_v38 = vpop.f32.mrb[29].mxu1 }
 0x11a   :  { %2589 = vtanh.f32 %v1111_v36  ;;  %v1074_v39 = vpop.f32.mrb[30].mxu0  ;;  %v1115_v41 = vpop.f32.mrb[30].mxu1 }
 0x11b   :  { %v2580_v40 = vpop.eup %2579  ;;  %2591 = vtanh.f32 %v1072_v37  ;;  %v1075_v42 = vpop.f32.mrb[31].mxu0 }
 0x11c   :  { %v2582_v43 = vpop.eup %2581  ;;  %2593 = vtanh.f32 %v1113_v38  ;;  %v1116_v44 = vpop.f32.mrb[31].mxu1 }
 0x11d   :  { %v2584_v45 = vpop.eup %2583 }
 0x11e   :  { %v2586_v46 = vpop.eup %2585  ;;  %v1154_v47 = vcombine.low %v2580_v40, %v2584_v45 }
 0x11f   :  { %v1155_v48 = vcombine.low %v2582_v43, %v2586_v46 }
 0x120   :  { %2428 = vst [vmem:[%s3295_s2 + $0x60] sm:$0x77] %v1154_v47  ;;  %v1406_v49 = vpop.f32.mrb[32].mxu0  ;;  %v1447_v50 = vpop.f32.mrb[32].mxu1 }
 0x121   :  { %2429 = vst [vmem:[%s3295_s2 + $0x68] sm:$0x77] %v1155_v48  ;;  %2595 = vtanh.f32 %v1406_v49  ;;  %v1408_v51 = vpop.f32.mrb[33].mxu0  ;;  %v1449_v52 = vpop.f32.mrb[33].mxu1 }
 0x122   :  { %2597 = vtanh.f32 %v1447_v50  ;;  %v1410_v53 = vpop.f32.mrb[34].mxu0  ;;  %v1451_v55 = vpop.f32.mrb[34].mxu1 }
 0x123   :  { %v2588_v54 = vpop.eup %2587  ;;  %2599 = vtanh.f32 %v1408_v51  ;;  %v1411_v56 = vpop.f32.mrb[35].mxu0 }
 0x124   :  { %v2590_v57 = vpop.eup %2589  ;;  %2601 = vtanh.f32 %v1449_v52  ;;  %v1452_v58 = vpop.f32.mrb[35].mxu1 }
 0x125   :  { %v2592_v59 = vpop.eup %2591 }
 0x126   :  { %v2594_v60 = vpop.eup %2593  ;;  %v1156_v61 = vcombine.low %v2588_v54, %v2592_v59 }
 0x127   :  { %v1157_v62 = vcombine.low %v2590_v57, %v2594_v60 }
 0x128   :  { %2430 = vst [vmem:[%s3295_s2 + $0x70] sm:$0x77] %v1156_v61  ;;  %v1488_v63 = vpop.f32.mrb[36].mxu0  ;;  %v1529_v0 = vpop.f32.mrb[36].mxu1 }
 0x129   :  { %2431 = vst [vmem:[%s3295_s2 + $0x78] sm:$0x77] %v1157_v62  ;;  %2603 = vtanh.f32 %v1488_v63  ;;  %v1490_v1 = vpop.f32.mrb[37].mxu0  ;;  %v1531_v2 = vpop.f32.mrb[37].mxu1 }
 0x12a   :  { %2605 = vtanh.f32 %v1529_v0  ;;  %v1492_v4 = vpop.f32.mrb[38].mxu0  ;;  %v1533_v6 = vpop.f32.mrb[38].mxu1 }
 0x12b   :  { %v2596_v5 = vpop.eup %2595  ;;  %2607 = vtanh.f32 %v1490_v1  ;;  %v1493_v7 = vpop.f32.mrb[39].mxu0 }
 0x12c   :  { %v2598_v8 = vpop.eup %2597  ;;  %2609 = vtanh.f32 %v1531_v2  ;;  %v1534_v9 = vpop.f32.mrb[39].mxu1 }
 0x12d   :  { %v2600_v10 = vpop.eup %2599 }
 0x12e   :  { %v2602_v11 = vpop.eup %2601  ;;  %v1732_v12 = vcombine.low %v2596_v5, %v2600_v10 }
 0x12f   :  { %v1733_v13 = vcombine.low %v2598_v8, %v2602_v11 }
 0x130   :  { %2473 = vst [vmem:[%s3295_s2 + $0x80] sm:$0x77] %v1732_v12  ;;  %v1570_v14 = vpop.f32.mrb[40].mxu0  ;;  %v1611_v15 = vpop.f32.mrb[40].mxu1 }
 0x131   :  { %2474 = vst [vmem:[%s3295_s2 + $0x88] sm:$0x77] %v1733_v13  ;;  %2611 = vtanh.f32 %v1570_v14  ;;  %v1572_v16 = vpop.f32.mrb[41].mxu0  ;;  %v1613_v3 = vpop.f32.mrb[41].mxu1 }
 0x132   :  { %2613 = vtanh.f32 %v1611_v15  ;;  %v1574_v17 = vpop.f32.mrb[42].mxu0  ;;  %v1615_v19 = vpop.f32.mrb[42].mxu1 }
 0x133   :  { %v2604_v18 = vpop.eup %2603  ;;  %2615 = vtanh.f32 %v1572_v16  ;;  %v1575_v20 = vpop.f32.mrb[43].mxu0 }
 0x134   :  { %v2606_v21 = vpop.eup %2605  ;;  %2617 = vtanh.f32 %v1613_v3  ;;  %v1616_v22 = vpop.f32.mrb[43].mxu1 }
 0x135   :  { %v2608_v23 = vpop.eup %2607 }
 0x136   :  { %v2610_v24 = vpop.eup %2609  ;;  %v1734_v25 = vcombine.low %v2604_v18, %v2608_v23 }
 0x137   :  { %v1735_v26 = vcombine.low %v2606_v21, %v2610_v24 }
 0x138   :  { %2475 = vst [vmem:[%s3295_s2 + $0x90] sm:$0x77] %v1734_v25  ;;  %v1652_v27 = vpop.f32.mrb[44].mxu0  ;;  %v1693_v28 = vpop.f32.mrb[44].mxu1 }
 0x139   :  { %2476 = vst [vmem:[%s3295_s2 + $0x98] sm:$0x77] %v1735_v26  ;;  %2619 = vtanh.f32 %v1652_v27  ;;  %v1654_v29 = vpop.f32.mrb[45].mxu0  ;;  %v1695_v30 = vpop.f32.mrb[45].mxu1 }
 0x13a   :  { %2621 = vtanh.f32 %v1693_v28  ;;  %v1656_v31 = vpop.f32.mrb[46].mxu0  ;;  %v1697_v33 = vpop.f32.mrb[46].mxu1 }
 0x13b   :  { %v2612_v32 = vpop.eup %2611  ;;  %2623 = vtanh.f32 %v1654_v29  ;;  %v1657_v34 = vpop.f32.mrb[47].mxu0 }
 0x13c   :  { %v2614_v35 = vpop.eup %2613  ;;  %2625 = vtanh.f32 %v1695_v30  ;;  %v1698_v36 = vpop.f32.mrb[47].mxu1 }
 0x13d   :  { %v2616_v37 = vpop.eup %2615 }
 0x13e   :  { %v2618_v38 = vpop.eup %2617  ;;  %v1736_v39 = vcombine.low %v2612_v32, %v2616_v37 }
 0x13f   :  { %v1737_v40 = vcombine.low %v2614_v35, %v2618_v38 }
 0x140   :  { %2477 = vst [vmem:[%s3295_s2 + $0xa0] sm:$0x77] %v1736_v39  ;;  %v1988_v41 = vpop.f32.mrb[48].mxu0  ;;  %v2029_v42 = vpop.f32.mrb[48].mxu1 }
 0x141   :  { %2478 = vst [vmem:[%s3295_s2 + $0xa8] sm:$0x77] %v1737_v40  ;;  %2627 = vtanh.f32 %v1988_v41  ;;  %v1990_v43 = vpop.f32.mrb[49].mxu0  ;;  %v2031_v44 = vpop.f32.mrb[49].mxu1 }
 0x142   :  { %2629 = vtanh.f32 %v2029_v42  ;;  %v1992_v45 = vpop.f32.mrb[50].mxu0  ;;  %v2033_v47 = vpop.f32.mrb[50].mxu1 }
 0x143   :  { %v2620_v46 = vpop.eup %2619  ;;  %2631 = vtanh.f32 %v1990_v43  ;;  %v1993_v48 = vpop.f32.mrb[51].mxu0 }
 0x144   :  { %v2622_v49 = vpop.eup %2621  ;;  %2633 = vtanh.f32 %v2031_v44  ;;  %v2034_v50 = vpop.f32.mrb[51].mxu1 }
 0x145   :  { %v2624_v51 = vpop.eup %2623 }
 0x146   :  { %v2626_v52 = vpop.eup %2625  ;;  %v1738_v53 = vcombine.low %v2620_v46, %v2624_v51 }
 0x147   :  { %v1739_v54 = vcombine.low %v2622_v49, %v2626_v52 }
 0x148   :  { %2479 = vst [vmem:[%s3295_s2 + $0xb0] sm:$0x77] %v1738_v53  ;;  %v2070_v55 = vpop.f32.mrb[52].mxu0  ;;  %v2111_v56 = vpop.f32.mrb[52].mxu1 }
 0x149   :  { %2480 = vst [vmem:[%s3295_s2 + $0xb8] sm:$0x77] %v1739_v54  ;;  %2635 = vtanh.f32 %v2070_v55  ;;  %v2072_v57 = vpop.f32.mrb[53].mxu0  ;;  %v2113_v58 = vpop.f32.mrb[53].mxu1 }
 0x14a   :  { %2637 = vtanh.f32 %v2111_v56  ;;  %v2074_v59 = vpop.f32.mrb[54].mxu0  ;;  %v2115_v61 = vpop.f32.mrb[54].mxu1 }
 0x14b   :  { %v2628_v60 = vpop.eup %2627  ;;  %2639 = vtanh.f32 %v2072_v57  ;;  %v2075_v62 = vpop.f32.mrb[55].mxu0 }
 0x14c   :  { %v2630_v63 = vpop.eup %2629  ;;  %2641 = vtanh.f32 %v2113_v58  ;;  %v2116_v0 = vpop.f32.mrb[55].mxu1 }
 0x14d   :  { %v2632_v1 = vpop.eup %2631 }
 0x14e   :  { %v2634_v2 = vpop.eup %2633  ;;  %v2314_v4 = vcombine.low %v2628_v60, %v2632_v1 }
 0x14f   :  { %v2315_v5 = vcombine.low %v2630_v63, %v2634_v2 }
 0x150   :  { %2522 = vst [vmem:[%s3295_s2 + $0xc0] sm:$0x77] %v2314_v4  ;;  %v2152_v6 = vpop.f32.mrb[56].mxu0  ;;  %v2193_v7 = vpop.f32.mrb[56].mxu1 }
 0x151   :  { %2523 = vst [vmem:[%s3295_s2 + $0xc8] sm:$0x77] %v2315_v5  ;;  %2643 = vtanh.f32 %v2152_v6  ;;  %v2154_v8 = vpop.f32.mrb[57].mxu0  ;;  %v2195_v9 = vpop.f32.mrb[57].mxu1 }
 0x152   :  { %2645 = vtanh.f32 %v2193_v7  ;;  %v2156_v10 = vpop.f32.mrb[58].mxu0  ;;  %v2197_v12 = vpop.f32.mrb[58].mxu1 }
 0x153   :  { %v2636_v11 = vpop.eup %2635  ;;  %2647 = vtanh.f32 %v2154_v8  ;;  %v2157_v13 = vpop.f32.mrb[59].mxu0 }
 0x154   :  { %v2638_v14 = vpop.eup %2637  ;;  %2649 = vtanh.f32 %v2195_v9  ;;  %v2198_v15 = vpop.f32.mrb[59].mxu1 }
 0x155   :  { %v2640_v16 = vpop.eup %2639 }
 0x156   :  { %v2642_v3 = vpop.eup %2641  ;;  %v2316_v17 = vcombine.low %v2636_v11, %v2640_v16 }
 0x157   :  { %v2317_v18 = vcombine.low %v2638_v14, %v2642_v3 }
 0x158   :  { %2524 = vst [vmem:[%s3295_s2 + $0xd0] sm:$0x77] %v2316_v17  ;;  %v2234_v19 = vpop.f32.mrb[60].mxu0  ;;  %v2275_v20 = vpop.f32.mrb[60].mxu1 }
 0x159   :  { %2525 = vst [vmem:[%s3295_s2 + $0xd8] sm:$0x77] %v2317_v18  ;;  %2651 = vtanh.f32 %v2234_v19  ;;  %v2236_v21 = vpop.f32.mrb[61].mxu0  ;;  %v2277_v22 = vpop.f32.mrb[61].mxu1 }
 0x15a   :  { %2653 = vtanh.f32 %v2275_v20  ;;  %v2238_v23 = vpop.f32.mrb[62].mxu0  ;;  %v2279_v25 = vpop.f32.mrb[62].mxu1 }
 0x15b   :  { %v2644_v24 = vpop.eup %2643  ;;  %2655 = vtanh.f32 %v2236_v21  ;;  %v2239_v26 = vpop.f32.mrb[63].mxu0 }
 0x15c   :  { %v2646_v27 = vpop.eup %2645  ;;  %2657 = vtanh.f32 %v2277_v22  ;;  %v2280_v28 = vpop.f32.mrb[63].mxu1 }
 0x15d   :  { %v2648_v29 = vpop.eup %2647 }
 0x15e   :  { %v2650_v30 = vpop.eup %2649  ;;  %v2318_v31 = vcombine.low %v2644_v24, %v2648_v29 }
 0x15f   :  { %v2319_v32 = vcombine.low %v2646_v27, %v2650_v30 }
 0x160   :  { %2526 = vst [vmem:[%s3295_s2 + $0xe0] sm:$0x77] %v2318_v31 }
 0x161   :  { %2527 = vst [vmem:[%s3295_s2 + $0xe8] sm:$0x77] %v2319_v32 }
 0x163   :  { %v2652_v33 = vpop.eup %2651 }
 0x164   :  { %v2654_v34 = vpop.eup %2653 }
 0x165   :  { %v2656_v35 = vpop.eup %2655 }
 0x166   :  { %v2658_v36 = vpop.eup %2657  ;;  %v2320_v37 = vcombine.low %v2652_v33, %v2656_v35 }
 0x167   :  { %v2321_v38 = vcombine.low %v2654_v34, %v2658_v36 }
 0x168   :  { %2528 = vst [vmem:[%s3295_s2 + $0xf0] sm:$0x77] %v2320_v37 }
 0x169   :  { %2529 = vst [vmem:[%s3295_s2 + $0xf8] sm:$0x77] %v2321_v38 }

</bundles_post_ra>
